<compile_context>
chip_gen: v6e
topology: v6e:2x2x1
jax: 0.10.0
libtpu: 0.0.40
codegen_flags: <defaults>
</compile_context>

<pallas_src>
import jax
import jax.numpy as jnp
from jax import lax
from jax.experimental import pallas as pl
from jax.experimental.pallas import tpu as pltpu

# ----------------------------------------------------------------------------
# Hyperparameters (scaled down from the original: n_embed=208, block_size=256,
# n_head=4, n_layer=8, vocab_size=1500 -- same architecture, smaller sizes).
# ----------------------------------------------------------------------------
VOCAB_SIZE = 512
N_EMBED    = 128
BLOCK_SIZE = 64
N_HEAD     = 4
N_LAYER    = 2
HEAD_SIZE  = N_EMBED // N_HEAD
FF_HIDDEN  = 4 * N_EMBED
LN_EPS     = 1e-5
MASK_FILL  = -1e30   # finite fill: exp() still underflows to exactly 0 in f32


def _layernorm(x, gamma, beta):
    """LayerNorm over the last axis (biased variance, eps=1e-5), f32 math."""
    mu = jnp.mean(x, axis=-1, keepdims=True)
    var = jnp.mean((x - mu) ** 2, axis=-1, keepdims=True)
    return (x - mu) * lax.rsqrt(var + LN_EPS) * gamma + beta


# ----------------------------------------------------------------------------
# Single fused Pallas kernel: all blocks + final LN + lm_head.
# Grid = (B, N_LAYER): batch "parallel" (megacore), layers "arbitrary".
# ----------------------------------------------------------------------------
def fused_forward(x_btd, p):
    """x_btd: (B, T, D) f32 embeddings.  Returns (B, T, V) bf16 logits."""
    B, T, D = x_btd.shape
    V = p['lm_w'].shape[-1]
    L = p['wqkv'].shape[0]

    def kernel(x_ref,
               ln1g_ref, ln1b_ref, wqkv_ref, wo_ref, bo_ref,
               ln2g_ref, ln2b_ref, w1_ref, b1_ref, w2_ref, b2_ref,
               lnfg_ref, lnfb_ref, lmw_ref, lmb_ref,
               out_ref,
               x_acc, att_buf):
        l = pl.program_id(1)

        # Load this batch element's embeddings into the residual accumulator
        # at the first layer; x stays VMEM-resident for all layers.
        @pl.when(l == 0)
        def _():
            x_acc[...] = x_ref[...]

        x = x_acc[...]                               # (T, D) f32

        # Per-batch causal mask built in-kernel (cheap VPU compares).
        row = lax.broadcasted_iota(jnp.int32, (T, T), 0)
        col = lax.broadcasted_iota(jnp.int32, (T, T), 1)
        causal = row >= col

        # ---- Multi-head self-attention: x = x + MHA(ln1(x)) ---------------
        xn = _layernorm(x, ln1g_ref[...], ln1b_ref[...])
        # Fused QKV projection (bf16 operands, f32 acc); cast the result to
        # bf16 immediately so q/k/v slices feed the MXU directly.
        qkv = jnp.dot(xn.astype(jnp.bfloat16), wqkv_ref[...],
                      preferred_element_type=jnp.float32).astype(jnp.bfloat16)
        for h in range(N_HEAD):
            lo = h * HEAD_SIZE
            qh = qkv[:, lo:lo + HEAD_SIZE]                       # bf16 (T,hs)
            kh = qkv[:, D + lo:D + lo + HEAD_SIZE]
            vh = qkv[:, 2 * D + lo:2 * D + lo + HEAD_SIZE]
            # q @ k^T via contracting dims (no explicit transpose), bf16 MXU.
            s = lax.dot_general(qh, kh,
                                dimension_numbers=(((1,), (1,)), ((), ())),
                                preferred_element_type=jnp.float32)  # (T, T)
            s = jnp.where(causal, s, MASK_FILL)
            s = s - jnp.max(s, axis=-1, keepdims=True)
            pr = jnp.exp(s)                                      # f32 (T, T)
            denom = jnp.sum(pr, axis=-1, keepdims=True)          # (T, 1)
            oh = jnp.dot(pr.astype(jnp.bfloat16), vh,
                         preferred_element_type=jnp.float32)     # (T, hs)
            # Normalize AFTER P@V (scales (T,hs) instead of (T,T)).
            att_buf[:, lo:lo + HEAD_SIZE] = oh * pl.reciprocal(denom,
                                                               approx=True)
        # Single full-contraction output projection for all heads.
        sa = jnp.dot(att_buf[...].astype(jnp.bfloat16), wo_ref[...],
                     preferred_element_type=jnp.float32) + bo_ref[...]
        x = x + sa                     # dropout == identity (eval mode)

        # ---- FeedForward: x = x + FFN(ln2(x)) -----------------------------
        xn2 = _layernorm(x, ln2g_ref[...], ln2b_ref[...])
        h1 = jnp.dot(xn2.astype(jnp.bfloat16), w1_ref[...],
                     preferred_element_type=jnp.float32) + b1_ref[...]
        h1 = jnp.maximum(h1, 0.0)                                # ReLU
        ff = jnp.dot(h1.astype(jnp.bfloat16), w2_ref[...],
                     preferred_element_type=jnp.float32) + b2_ref[...]
        x = x + ff
        x_acc[...] = x

        # ---- Final LayerNorm + lm_head, only on the last layer ------------
        @pl.when(l == pl.num_programs(1) - 1)
        def _():
            xn_f = _layernorm(x, lnfg_ref[...], lnfb_ref[...])
            logits = jnp.dot(xn_f.astype(jnp.bfloat16), lmw_ref[...],
                             preferred_element_type=jnp.float32) + lmb_ref[...]
            out_ref[...] = logits.astype(out_ref.dtype)          # bf16 out

    def layer_spec(arr):
        nd = arr.ndim
        return pl.BlockSpec((None,) + arr.shape[1:],
                            lambda b, l, _nd=nd: (l,) + (0,) * (_nd - 1))

    def const_spec(arr):
        nd = arr.ndim
        return pl.BlockSpec(arr.shape, lambda b, l, _nd=nd: (0,) * _nd)

    in_specs = [
        pl.BlockSpec((None, T, D), lambda b, l: (b, 0, 0)),      # x (per batch)
        layer_spec(p['ln1_g']), layer_spec(p['ln1_b']),
        layer_spec(p['wqkv']), layer_spec(p['wo']), layer_spec(p['bo']),
        layer_spec(p['ln2_g']), layer_spec(p['ln2_b']),
        layer_spec(p['w1']), layer_spec(p['b1']),
        layer_spec(p['w2']), layer_spec(p['b2']),
        const_spec(p['ln_f_g']), const_spec(p['ln_f_b']),
        const_spec(p['lm_w']), const_spec(p['lm_b']),
    ]
    inputs = [x_btd,
              p['ln1_g'], p['ln1_b'], p['wqkv'], p['wo'], p['bo'],
              p['ln2_g'], p['ln2_b'], p['w1'], p['b1'], p['w2'], p['b2'],
              p['ln_f_g'], p['ln_f_b'], p['lm_w'], p['lm_b']]

    # TODO(synk): at the real config (n_embed=208, ffn=832, vocab=1500), pad
    # D / FF_HIDDEN / vocab host-side to multiples of 256 so v6e/v7x MXU
    # contractions stay full-width.
    return pl.pallas_call(
        kernel,
        out_shape=jax.ShapeDtypeStruct((B, T, V), jnp.bfloat16),
        grid_spec=pltpu.PrefetchScalarGridSpec(
            num_scalar_prefetch=0,
            grid=(B, L),
            in_specs=in_specs,
            out_specs=pl.BlockSpec((None, T, V), lambda b, l: (b, 0, 0)),
            scratch_shapes=[pltpu.VMEM((T, D), jnp.float32),   # residual x
                            pltpu.VMEM((T, D), jnp.float32)],  # head outputs
        ),
        compiler_params=pltpu.CompilerParams(
            dimension_semantics=("parallel", "arbitrary")),
    )(*inputs)


# ----------------------------------------------------------------------------
# Deterministic parameter construction (weights pre-stacked / pre-fused).
# ----------------------------------------------------------------------------
def init_params(key):
    def nrm(k, shape, scale=0.02):
        return (scale * jax.random.normal(k, shape)).astype(jnp.float32)

    D, FH, L = N_EMBED, FF_HIDDEN, N_LAYER
    keys = jax.random.split(key, 4 + L)

    attn_scale = 1.0 / (N_EMBED ** 0.5)      # original scales by n_embed**-0.5
    wqkv, wo, w1, w2 = [], [], [], []
    for l in range(L):
        ks = jax.random.split(keys[4 + l], 6)
        wq = nrm(ks[0], (D, D)) * attn_scale  # fold logit scale into Wq
        wk = nrm(ks[1], (D, D))
        wv = nrm(ks[2], (D, D))
        wqkv.append(jnp.concatenate([wq, wk, wv], axis=1))       # (D, 3D)
        wo.append(nrm(ks[3], (D, D)))
        w1.append(nrm(ks[4], (D, FH)))
        w2.append(nrm(ks[5], (FH, D)))

    params = {
        'tok_emb': nrm(keys[0], (VOCAB_SIZE, D)),
        'pos_emb': nrm(keys[1], (BLOCK_SIZE, D)),
        # stacked per-layer parameters (leading L axis)
        'ln1_g': jnp.ones((L, 1, D), jnp.float32),
        'ln1_b': jnp.zeros((L, 1, D), jnp.float32),
        'wqkv': jnp.stack(wqkv).astype(jnp.bfloat16),            # (L, D, 3D)
        'wo': jnp.stack(wo).astype(jnp.bfloat16),                # (L, D, D)
        'bo': jnp.zeros((L, 1, D), jnp.float32),
        'ln2_g': jnp.ones((L, 1, D), jnp.float32),
        'ln2_b': jnp.zeros((L, 1, D), jnp.float32),
        'w1': jnp.stack(w1).astype(jnp.bfloat16),                # (L, D, 4D)
        'b1': jnp.zeros((L, 1, FH), jnp.float32),
        'w2': jnp.stack(w2).astype(jnp.bfloat16),                # (L, 4D, D)
        'b2': jnp.zeros((L, 1, D), jnp.float32),
        # final LN + lm_head
        'ln_f_g': jnp.ones((1, D), jnp.float32),
        'ln_f_b': jnp.zeros((1, D), jnp.float32),
        'lm_w': nrm(keys[2], (D, VOCAB_SIZE)).astype(jnp.bfloat16),
        'lm_b': jnp.zeros((1, VOCAB_SIZE), jnp.float32),
    }
    return params


# ----------------------------------------------------------------------------
# Full forward pass (embedding gather + fused kernel + optional CE loss).
# ----------------------------------------------------------------------------
def one_piece_transformer_forward(params, idx, targets=None):
    """idx: int32 (B, T) token ids; returns (logits (B,T,V) bf16, loss or None)."""
    B, T = idx.shape
    tok_emb = params['tok_emb'][idx]                 # (B, T, D) gather (JAX)
    pos_emb = params['pos_emb'][:T]                  # (T, D)
    x = (tok_emb + pos_emb[None, :, :]).astype(jnp.float32)

    logits = fused_forward(x, params)                # (B, T, V) bf16, Pallas

    loss = None
    if targets is not None:
        lf = logits.reshape(B * T, VOCAB_SIZE).astype(jnp.float32)
        tf = targets.reshape(B * T)
        lse = jax.nn.logsumexp(lf, axis=-1)
        picked = jnp.take_along_axis(lf, tf[:, None], axis=-1)[:, 0]
        loss = jnp.mean(lse - picked)                # F.cross_entropy (mean)
    return logits, loss


if __name__ == "__main__":
    key = jax.random.PRNGKey(0)
    k_idx, k_tgt, _ = jax.random.split(key, 3)

    B, T = 2, BLOCK_SIZE
    idx = jax.random.randint(k_idx, (B, T), 0, VOCAB_SIZE, dtype=jnp.int32)
    targets = jax.random.randint(k_tgt, (B, T), 0, VOCAB_SIZE, dtype=jnp.int32)

    params = init_params(jax.random.PRNGKey(42))

    logits, loss = one_piece_transformer_forward(params, idx, targets)
    logits = jax.block_until_ready(logits)
    loss = jax.block_until_ready(loss)

    assert logits.shape == (B, T, VOCAB_SIZE)
    assert jnp.isfinite(loss)
    print("KERNEL_OK")
</pallas_src>

<mosaic_0001>
module attributes {stable_mosaic.version = 11 : i64} {
  func.func @kernel(%arg0: i32, %arg1: i32, %arg2: memref<1x64x128xf32, #tpu.memory_space<vmem>>, %arg3: memref<1x1x128xf32, #tpu.memory_space<vmem>>, %arg4: memref<1x1x128xf32, #tpu.memory_space<vmem>>, %arg5: memref<1x128x384xbf16, #tpu.memory_space<vmem>>, %arg6: memref<1x128x128xbf16, #tpu.memory_space<vmem>>, %arg7: memref<1x1x128xf32, #tpu.memory_space<vmem>>, %arg8: memref<1x1x128xf32, #tpu.memory_space<vmem>>, %arg9: memref<1x1x128xf32, #tpu.memory_space<vmem>>, %arg10: memref<1x128x512xbf16, #tpu.memory_space<vmem>>, %arg11: memref<1x1x512xf32, #tpu.memory_space<vmem>>, %arg12: memref<1x512x128xbf16, #tpu.memory_space<vmem>>, %arg13: memref<1x1x128xf32, #tpu.memory_space<vmem>>, %arg14: memref<1x128xf32, #tpu.memory_space<vmem>>, %arg15: memref<1x128xf32, #tpu.memory_space<vmem>>, %arg16: memref<128x512xbf16, #tpu.memory_space<vmem>>, %arg17: memref<1x512xf32, #tpu.memory_space<vmem>>, %arg18: memref<1x64x512xbf16, #tpu.memory_space<vmem>>, %arg19: memref<64x128xf32, #tpu.memory_space<vmem>>, %arg20: memref<64x128xf32, #tpu.memory_space<vmem>>) attributes {dimension_semantics = [#tpu.dimension_semantics<parallel>, #tpu.dimension_semantics<arbitrary>], iteration_bounds = array<i64: 2, 2>, scalar_prefetch = 0 : i64, scratch_operands = 2 : i64, tpu.core_type = #tpu.core_type<tc>, window_params = [{transform_indices = @transform_0, window_bounds = array<i64: 1, 64, 128>}, {transform_indices = @transform_1, window_bounds = array<i64: 1, 1, 128>}, {transform_indices = @transform_2, window_bounds = array<i64: 1, 1, 128>}, {transform_indices = @transform_3, window_bounds = array<i64: 1, 128, 384>}, {transform_indices = @transform_4, window_bounds = array<i64: 1, 128, 128>}, {transform_indices = @transform_5, window_bounds = array<i64: 1, 1, 128>}, {transform_indices = @transform_6, window_bounds = array<i64: 1, 1, 128>}, {transform_indices = @transform_7, window_bounds = array<i64: 1, 1, 128>}, {transform_indices = @transform_8, window_bounds = array<i64: 1, 128, 512>}, {transform_indices = @transform_9, window_bounds = array<i64: 1, 1, 512>}, {transform_indices = @transform_10, window_bounds = array<i64: 1, 512, 128>}, {transform_indices = @transform_11, window_bounds = array<i64: 1, 1, 128>}, {pipeline_mode = #tpu.pipeline_mode<synchronous>, transform_indices = @transform_12, window_bounds = array<i64: 1, 128>}, {pipeline_mode = #tpu.pipeline_mode<synchronous>, transform_indices = @transform_13, window_bounds = array<i64: 1, 128>}, {pipeline_mode = #tpu.pipeline_mode<synchronous>, transform_indices = @transform_14, window_bounds = array<i64: 128, 512>}, {pipeline_mode = #tpu.pipeline_mode<synchronous>, transform_indices = @transform_15, window_bounds = array<i64: 1, 512>}, {transform_indices = @transform_16, window_bounds = array<i64: 1, 64, 512>}]} {
    %c0_i32 = arith.constant 0 : i32
    %0 = arith.cmpi eq, %arg1, %c0_i32 : i32
    %1 = arith.extui %0 : i1 to i32
    %c0_i32_0 = arith.constant 0 : i32
    %2 = arith.cmpi ne, %1, %c0_i32_0 : i32
    scf.if %2 {
      %c0_79 = arith.constant 0 : index
      %c0_80 = arith.constant 0 : index
      %c0_81 = arith.constant 0 : index
      %173 = vector.load %arg2[%c0_79, %c0_80, %c0_81] : memref<1x64x128xf32, #tpu.memory_space<vmem>>, vector<1x64x128xf32>
      %174 = vector.shape_cast %173 : vector<1x64x128xf32> to vector<64x128xf32>
      %c0_82 = arith.constant 0 : index
      %c0_83 = arith.constant 0 : index
      %175 = vector.load %arg19[%c0_82, %c0_83] : memref<64x128xf32, #tpu.memory_space<vmem>>, vector<64x128xf32>
      tpu.vector_store %arg19[%c0_82, %c0_83], %174 {strides = array<i32>} : memref<64x128xf32, #tpu.memory_space<vmem>>, vector<64x128xf32>,
    } else {
    }
    %c0 = arith.constant 0 : index
    %c0_1 = arith.constant 0 : index
    %3 = vector.load %arg19[%c0, %c0_1] : memref<64x128xf32, #tpu.memory_space<vmem>>, vector<64x128xf32>
    %4 = tpu.iota {dimensions = array<i32: 0>} : vector<64x64xi32>
    %5 = tpu.iota {dimensions = array<i32: 1>} : vector<64x64xi32>
    %6 = arith.cmpi sge, %4, %5 : vector<64x64xi32>
    %c0_2 = arith.constant 0 : index
    %c0_3 = arith.constant 0 : index
    %c0_4 = arith.constant 0 : index
    %7 = vector.load %arg3[%c0_2, %c0_3, %c0_4] : memref<1x1x128xf32, #tpu.memory_space<vmem>>, vector<1x1x128xf32>
    %8 = vector.shape_cast %7 : vector<1x1x128xf32> to vector<1x128xf32>
    %c0_5 = arith.constant 0 : index
    %c0_6 = arith.constant 0 : index
    %c0_7 = arith.constant 0 : index
    %9 = vector.load %arg4[%c0_5, %c0_6, %c0_7] : memref<1x1x128xf32, #tpu.memory_space<vmem>>, vector<1x1x128xf32>
    %10 = vector.shape_cast %9 : vector<1x1x128xf32> to vector<1x128xf32>
    %cst = arith.constant dense<0.000000e+00> : vector<64xf32>
    %11 = vector.multi_reduction <add>, %3, %cst [1] : vector<64x128xf32> to vector<64xf32>
    %12 = vector.shape_cast %11 : vector<64xf32> to vector<64x1xf32>
    %cst_8 = arith.constant 1.280000e+02 : f32
    %13 = vector.broadcast %cst_8 : f32 to vector<64x1xf32>
    %14 = arith.divf %12, %13 : vector<64x1xf32>
    %15 = vector.broadcast %14 : vector<64x1xf32> to vector<64x128xf32>
    %16 = arith.subf %3, %15 : vector<64x128xf32>
    %17 = arith.mulf %16, %16 : vector<64x128xf32>
    %cst_9 = arith.constant dense<0.000000e+00> : vector<64xf32>
    %18 = vector.multi_reduction <add>, %17, %cst_9 [1] : vector<64x128xf32> to vector<64xf32>
    %19 = vector.shape_cast %18 : vector<64xf32> to vector<64x1xf32>
    %cst_10 = arith.constant 1.280000e+02 : f32
    %20 = vector.broadcast %cst_10 : f32 to vector<64x1xf32>
    %21 = arith.divf %19, %20 : vector<64x1xf32>
    %22 = vector.broadcast %14 : vector<64x1xf32> to vector<64x128xf32>
    %23 = arith.subf %3, %22 : vector<64x128xf32>
    %cst_11 = arith.constant 9.99999974E-6 : f32
    %24 = vector.broadcast %cst_11 : f32 to vector<64x1xf32>
    %25 = arith.addf %21, %24 : vector<64x1xf32>
    %26 = math.rsqrt %25 : vector<64x1xf32>
    %27 = vector.broadcast %26 : vector<64x1xf32> to vector<64x128xf32>
    %28 = arith.mulf %23, %27 : vector<64x128xf32>
    %29 = vector.broadcast %8 : vector<1x128xf32> to vector<64x128xf32>
    %30 = arith.mulf %28, %29 : vector<64x128xf32>
    %31 = vector.broadcast %10 : vector<1x128xf32> to vector<64x128xf32>
    %32 = arith.addf %30, %31 : vector<64x128xf32>
    %33 = arith.truncf %32 : vector<64x128xf32> to vector<64x128xbf16>
    %c0_12 = arith.constant 0 : index
    %c0_13 = arith.constant 0 : index
    %c0_14 = arith.constant 0 : index
    %34 = vector.load %arg5[%c0_12, %c0_13, %c0_14] : memref<1x128x384xbf16, #tpu.memory_space<vmem>>, vector<1x128x384xbf16>
    %35 = vector.shape_cast %34 : vector<1x128x384xbf16> to vector<128x384xbf16>
    %cst_15 = arith.constant dense<0.000000e+00> : vector<64x384xf32>
    %36 = tpu.matmul %33, %35, %cst_15 {dimension_numbers = #tpu.dot_dimension_numbers<[1], [0], [0], [1], [0, 0, 1, 1], [], []>} : vector<64x128xbf16>, vector<128x384xbf16>, vector<64x384xf32> -> vector<64x384xf32>
    %37 = arith.truncf %36 : vector<64x384xf32> to vector<64x384xbf16>
    %38 = vector.extract_strided_slice %37 {offsets = [0, 0], sizes = [64, 32], strides = [1, 1]} : vector<64x384xbf16> to vector<64x32xbf16>
    %39 = vector.extract_strided_slice %37 {offsets = [0, 128], sizes = [64, 32], strides = [1, 1]} : vector<64x384xbf16> to vector<64x32xbf16>
    %40 = vector.extract_strided_slice %37 {offsets = [0, 256], sizes = [64, 32], strides = [1, 1]} : vector<64x384xbf16> to vector<64x32xbf16>
    %cst_16 = arith.constant dense<0.000000e+00> : vector<64x64xf32>
    %41 = tpu.matmul %38, %39, %cst_16 {dimension_numbers = #tpu.dot_dimension_numbers<[1], [1], [0], [0], [0, 0, 1, 0], [], []>} : vector<64x32xbf16>, vector<64x32xbf16>, vector<64x64xf32> -> vector<64x64xf32>
    %cst_17 = arith.constant -1.000000e+30 : f32
    %42 = vector.broadcast %cst_17 : f32 to vector<64x64xf32>
    %43 = arith.select %6, %41, %42 : vector<64x64xi1>, vector<64x64xf32>
    %cst_18 = arith.constant dense<0xFF800000> : vector<64xf32>
    %44 = vector.multi_reduction <maximumf>, %43, %cst_18 [1] : vector<64x64xf32> to vector<64xf32>
    %45 = vector.shape_cast %44 : vector<64xf32> to vector<64x1xf32>
    %46 = vector.broadcast %45 : vector<64x1xf32> to vector<64x64xf32>
    %47 = arith.subf %43, %46 : vector<64x64xf32>
    %48 = math.exp %47 : vector<64x64xf32>
    %cst_19 = arith.constant dense<0.000000e+00> : vector<64xf32>
    %49 = vector.multi_reduction <add>, %48, %cst_19 [1] : vector<64x64xf32> to vector<64xf32>
    %50 = vector.shape_cast %49 : vector<64xf32> to vector<64x1xf32>
    %51 = arith.truncf %48 : vector<64x64xf32> to vector<64x64xbf16>
    %cst_20 = arith.constant dense<0.000000e+00> : vector<64x32xf32>
    %52 = tpu.matmul %51, %40, %cst_20 {dimension_numbers = #tpu.dot_dimension_numbers<[1], [0], [0], [1], [0, 0, 1, 1], [], []>} : vector<64x64xbf16>, vector<64x32xbf16>, vector<64x32xf32> -> vector<64x32xf32>
    %53 = tpu.reciprocal %50 {approx = true} : vector<64x1xf32> -> vector<64x1xf32>
    %54 = vector.broadcast %53 : vector<64x1xf32> to vector<64x32xf32>
    %55 = arith.mulf %52, %54 : vector<64x32xf32>
    %c0_21 = arith.constant 0 : index
    %c0_22 = arith.constant 0 : index
    %56 = vector.load %arg20[%c0_21, %c0_22] : memref<64x128xf32, #tpu.memory_space<vmem>>, vector<64x32xf32>
    tpu.vector_store %arg20[%c0_21, %c0_22], %55 {strides = array<i32>} : memref<64x128xf32, #tpu.memory_space<vmem>>, vector<64x32xf32>,
    %57 = vector.extract_strided_slice %37 {offsets = [0, 32], sizes = [64, 32], strides = [1, 1]} : vector<64x384xbf16> to vector<64x32xbf16>
    %58 = vector.extract_strided_slice %37 {offsets = [0, 160], sizes = [64, 32], strides = [1, 1]} : vector<64x384xbf16> to vector<64x32xbf16>
    %59 = vector.extract_strided_slice %37 {offsets = [0, 288], sizes = [64, 32], strides = [1, 1]} : vector<64x384xbf16> to vector<64x32xbf16>
    %cst_23 = arith.constant dense<0.000000e+00> : vector<64x64xf32>
    %60 = tpu.matmul %57, %58, %cst_23 {dimension_numbers = #tpu.dot_dimension_numbers<[1], [1], [0], [0], [0, 0, 1, 0], [], []>} : vector<64x32xbf16>, vector<64x32xbf16>, vector<64x64xf32> -> vector<64x64xf32>
    %cst_24 = arith.constant -1.000000e+30 : f32
    %61 = vector.broadcast %cst_24 : f32 to vector<64x64xf32>
    %62 = arith.select %6, %60, %61 : vector<64x64xi1>, vector<64x64xf32>
    %cst_25 = arith.constant dense<0xFF800000> : vector<64xf32>
    %63 = vector.multi_reduction <maximumf>, %62, %cst_25 [1] : vector<64x64xf32> to vector<64xf32>
    %64 = vector.shape_cast %63 : vector<64xf32> to vector<64x1xf32>
    %65 = vector.broadcast %64 : vector<64x1xf32> to vector<64x64xf32>
    %66 = arith.subf %62, %65 : vector<64x64xf32>
    %67 = math.exp %66 : vector<64x64xf32>
    %cst_26 = arith.constant dense<0.000000e+00> : vector<64xf32>
    %68 = vector.multi_reduction <add>, %67, %cst_26 [1] : vector<64x64xf32> to vector<64xf32>
    %69 = vector.shape_cast %68 : vector<64xf32> to vector<64x1xf32>
    %70 = arith.truncf %67 : vector<64x64xf32> to vector<64x64xbf16>
    %cst_27 = arith.constant dense<0.000000e+00> : vector<64x32xf32>
    %71 = tpu.matmul %70, %59, %cst_27 {dimension_numbers = #tpu.dot_dimension_numbers<[1], [0], [0], [1], [0, 0, 1, 1], [], []>} : vector<64x64xbf16>, vector<64x32xbf16>, vector<64x32xf32> -> vector<64x32xf32>
    %72 = tpu.reciprocal %69 {approx = true} : vector<64x1xf32> -> vector<64x1xf32>
    %73 = vector.broadcast %72 : vector<64x1xf32> to vector<64x32xf32>
    %74 = arith.mulf %71, %73 : vector<64x32xf32>
    %c0_28 = arith.constant 0 : index
    %c32 = arith.constant 32 : index
    %75 = vector.load %arg20[%c0_28, %c32] : memref<64x128xf32, #tpu.memory_space<vmem>>, vector<64x32xf32>
    tpu.vector_store %arg20[%c0_28, %c32], %74 {strides = array<i32>} : memref<64x128xf32, #tpu.memory_space<vmem>>, vector<64x32xf32>,
    %76 = vector.extract_strided_slice %37 {offsets = [0, 64], sizes = [64, 32], strides = [1, 1]} : vector<64x384xbf16> to vector<64x32xbf16>
    %77 = vector.extract_strided_slice %37 {offsets = [0, 192], sizes = [64, 32], strides = [1, 1]} : vector<64x384xbf16> to vector<64x32xbf16>
    %78 = vector.extract_strided_slice %37 {offsets = [0, 320], sizes = [64, 32], strides = [1, 1]} : vector<64x384xbf16> to vector<64x32xbf16>
    %cst_29 = arith.constant dense<0.000000e+00> : vector<64x64xf32>
    %79 = tpu.matmul %76, %77, %cst_29 {dimension_numbers = #tpu.dot_dimension_numbers<[1], [1], [0], [0], [0, 0, 1, 0], [], []>} : vector<64x32xbf16>, vector<64x32xbf16>, vector<64x64xf32> -> vector<64x64xf32>
    %cst_30 = arith.constant -1.000000e+30 : f32
    %80 = vector.broadcast %cst_30 : f32 to vector<64x64xf32>
    %81 = arith.select %6, %79, %80 : vector<64x64xi1>, vector<64x64xf32>
    %cst_31 = arith.constant dense<0xFF800000> : vector<64xf32>
    %82 = vector.multi_reduction <maximumf>, %81, %cst_31 [1] : vector<64x64xf32> to vector<64xf32>
    %83 = vector.shape_cast %82 : vector<64xf32> to vector<64x1xf32>
    %84 = vector.broadcast %83 : vector<64x1xf32> to vector<64x64xf32>
    %85 = arith.subf %81, %84 : vector<64x64xf32>
    %86 = math.exp %85 : vector<64x64xf32>
    %cst_32 = arith.constant dense<0.000000e+00> : vector<64xf32>
    %87 = vector.multi_reduction <add>, %86, %cst_32 [1] : vector<64x64xf32> to vector<64xf32>
    %88 = vector.shape_cast %87 : vector<64xf32> to vector<64x1xf32>
    %89 = arith.truncf %86 : vector<64x64xf32> to vector<64x64xbf16>
    %cst_33 = arith.constant dense<0.000000e+00> : vector<64x32xf32>
    %90 = tpu.matmul %89, %78, %cst_33 {dimension_numbers = #tpu.dot_dimension_numbers<[1], [0], [0], [1], [0, 0, 1, 1], [], []>} : vector<64x64xbf16>, vector<64x32xbf16>, vector<64x32xf32> -> vector<64x32xf32>
    %91 = tpu.reciprocal %88 {approx = true} : vector<64x1xf32> -> vector<64x1xf32>
    %92 = vector.broadcast %91 : vector<64x1xf32> to vector<64x32xf32>
    %93 = arith.mulf %90, %92 : vector<64x32xf32>
    %c0_34 = arith.constant 0 : index
    %c64 = arith.constant 64 : index
    %94 = vector.load %arg20[%c0_34, %c64] : memref<64x128xf32, #tpu.memory_space<vmem>>, vector<64x32xf32>
    tpu.vector_store %arg20[%c0_34, %c64], %93 {strides = array<i32>} : memref<64x128xf32, #tpu.memory_space<vmem>>, vector<64x32xf32>,
    %95 = vector.extract_strided_slice %37 {offsets = [0, 96], sizes = [64, 32], strides = [1, 1]} : vector<64x384xbf16> to vector<64x32xbf16>
    %96 = vector.extract_strided_slice %37 {offsets = [0, 224], sizes = [64, 32], strides = [1, 1]} : vector<64x384xbf16> to vector<64x32xbf16>
    %97 = vector.extract_strided_slice %37 {offsets = [0, 352], sizes = [64, 32], strides = [1, 1]} : vector<64x384xbf16> to vector<64x32xbf16>
    %cst_35 = arith.constant dense<0.000000e+00> : vector<64x64xf32>
    %98 = tpu.matmul %95, %96, %cst_35 {dimension_numbers = #tpu.dot_dimension_numbers<[1], [1], [0], [0], [0, 0, 1, 0], [], []>} : vector<64x32xbf16>, vector<64x32xbf16>, vector<64x64xf32> -> vector<64x64xf32>
    %cst_36 = arith.constant -1.000000e+30 : f32
    %99 = vector.broadcast %cst_36 : f32 to vector<64x64xf32>
    %100 = arith.select %6, %98, %99 : vector<64x64xi1>, vector<64x64xf32>
    %cst_37 = arith.constant dense<0xFF800000> : vector<64xf32>
    %101 = vector.multi_reduction <maximumf>, %100, %cst_37 [1] : vector<64x64xf32> to vector<64xf32>
    %102 = vector.shape_cast %101 : vector<64xf32> to vector<64x1xf32>
    %103 = vector.broadcast %102 : vector<64x1xf32> to vector<64x64xf32>
    %104 = arith.subf %100, %103 : vector<64x64xf32>
    %105 = math.exp %104 : vector<64x64xf32>
    %cst_38 = arith.constant dense<0.000000e+00> : vector<64xf32>
    %106 = vector.multi_reduction <add>, %105, %cst_38 [1] : vector<64x64xf32> to vector<64xf32>
    %107 = vector.shape_cast %106 : vector<64xf32> to vector<64x1xf32>
    %108 = arith.truncf %105 : vector<64x64xf32> to vector<64x64xbf16>
    %cst_39 = arith.constant dense<0.000000e+00> : vector<64x32xf32>
    %109 = tpu.matmul %108, %97, %cst_39 {dimension_numbers = #tpu.dot_dimension_numbers<[1], [0], [0], [1], [0, 0, 1, 1], [], []>} : vector<64x64xbf16>, vector<64x32xbf16>, vector<64x32xf32> -> vector<64x32xf32>
    %110 = tpu.reciprocal %107 {approx = true} : vector<64x1xf32> -> vector<64x1xf32>
    %111 = vector.broadcast %110 : vector<64x1xf32> to vector<64x32xf32>
    %112 = arith.mulf %109, %111 : vector<64x32xf32>
    %c0_40 = arith.constant 0 : index
    %c96 = arith.constant 96 : index
    %113 = vector.load %arg20[%c0_40, %c96] : memref<64x128xf32, #tpu.memory_space<vmem>>, vector<64x32xf32>
    tpu.vector_store %arg20[%c0_40, %c96], %112 {strides = array<i32>} : memref<64x128xf32, #tpu.memory_space<vmem>>, vector<64x32xf32>,
    %c0_41 = arith.constant 0 : index
    %c0_42 = arith.constant 0 : index
    %114 = vector.load %arg20[%c0_41, %c0_42] : memref<64x128xf32, #tpu.memory_space<vmem>>, vector<64x128xf32>
    %115 = arith.truncf %114 : vector<64x128xf32> to vector<64x128xbf16>
    %c0_43 = arith.constant 0 : index
    %c0_44 = arith.constant 0 : index
    %c0_45 = arith.constant 0 : index
    %116 = vector.load %arg6[%c0_43, %c0_44, %c0_45] : memref<1x128x128xbf16, #tpu.memory_space<vmem>>, vector<1x128x128xbf16>
    %117 = vector.shape_cast %116 : vector<1x128x128xbf16> to vector<128x128xbf16>
    %cst_46 = arith.constant dense<0.000000e+00> : vector<64x128xf32>
    %118 = tpu.matmul %115, %117, %cst_46 {dimension_numbers = #tpu.dot_dimension_numbers<[1], [0], [0], [1], [0, 0, 1, 1], [], []>} : vector<64x128xbf16>, vector<128x128xbf16>, vector<64x128xf32> -> vector<64x128xf32>
    %c0_47 = arith.constant 0 : index
    %c0_48 = arith.constant 0 : index
    %c0_49 = arith.constant 0 : index
    %119 = vector.load %arg7[%c0_47, %c0_48, %c0_49] : memref<1x1x128xf32, #tpu.memory_space<vmem>>, vector<1x1x128xf32>
    %120 = vector.shape_cast %119 : vector<1x1x128xf32> to vector<1x128xf32>
    %121 = vector.broadcast %120 : vector<1x128xf32> to vector<64x128xf32>
    %122 = arith.addf %118, %121 : vector<64x128xf32>
    %123 = arith.addf %3, %122 : vector<64x128xf32>
    %c0_50 = arith.constant 0 : index
    %c0_51 = arith.constant 0 : index
    %c0_52 = arith.constant 0 : index
    %124 = vector.load %arg8[%c0_50, %c0_51, %c0_52] : memref<1x1x128xf32, #tpu.memory_space<vmem>>, vector<1x1x128xf32>
    %125 = vector.shape_cast %124 : vector<1x1x128xf32> to vector<1x128xf32>
    %c0_53 = arith.constant 0 : index
    %c0_54 = arith.constant 0 : index
    %c0_55 = arith.constant 0 : index
    %126 = vector.load %arg9[%c0_53, %c0_54, %c0_55] : memref<1x1x128xf32, #tpu.memory_space<vmem>>, vector<1x1x128xf32>
    %127 = vector.shape_cast %126 : vector<1x1x128xf32> to vector<1x128xf32>
    %cst_56 = arith.constant dense<0.000000e+00> : vector<64xf32>
    %128 = vector.multi_reduction <add>, %123, %cst_56 [1] : vector<64x128xf32> to vector<64xf32>
    %129 = vector.shape_cast %128 : vector<64xf32> to vector<64x1xf32>
    %cst_57 = arith.constant 1.280000e+02 : f32
    %130 = vector.broadcast %cst_57 : f32 to vector<64x1xf32>
    %131 = arith.divf %129, %130 : vector<64x1xf32>
    %132 = vector.broadcast %131 : vector<64x1xf32> to vector<64x128xf32>
    %133 = arith.subf %123, %132 : vector<64x128xf32>
    %134 = arith.mulf %133, %133 : vector<64x128xf32>
    %cst_58 = arith.constant dense<0.000000e+00> : vector<64xf32>
    %135 = vector.multi_reduction <add>, %134, %cst_58 [1] : vector<64x128xf32> to vector<64xf32>
    %136 = vector.shape_cast %135 : vector<64xf32> to vector<64x1xf32>
    %cst_59 = arith.constant 1.280000e+02 : f32
    %137 = vector.broadcast %cst_59 : f32 to vector<64x1xf32>
    %138 = arith.divf %136, %137 : vector<64x1xf32>
    %139 = vector.broadcast %131 : vector<64x1xf32> to vector<64x128xf32>
    %140 = arith.subf %123, %139 : vector<64x128xf32>
    %cst_60 = arith.constant 9.99999974E-6 : f32
    %141 = vector.broadcast %cst_60 : f32 to vector<64x1xf32>
    %142 = arith.addf %138, %141 : vector<64x1xf32>
    %143 = math.rsqrt %142 : vector<64x1xf32>
    %144 = vector.broadcast %143 : vector<64x1xf32> to vector<64x128xf32>
    %145 = arith.mulf %140, %144 : vector<64x128xf32>
    %146 = vector.broadcast %125 : vector<1x128xf32> to vector<64x128xf32>
    %147 = arith.mulf %145, %146 : vector<64x128xf32>
    %148 = vector.broadcast %127 : vector<1x128xf32> to vector<64x128xf32>
    %149 = arith.addf %147, %148 : vector<64x128xf32>
    %150 = arith.truncf %149 : vector<64x128xf32> to vector<64x128xbf16>
    %c0_61 = arith.constant 0 : index
    %c0_62 = arith.constant 0 : index
    %c0_63 = arith.constant 0 : index
    %151 = vector.load %arg10[%c0_61, %c0_62, %c0_63] : memref<1x128x512xbf16, #tpu.memory_space<vmem>>, vector<1x128x512xbf16>
    %152 = vector.shape_cast %151 : vector<1x128x512xbf16> to vector<128x512xbf16>
    %cst_64 = arith.constant dense<0.000000e+00> : vector<64x512xf32>
    %153 = tpu.matmul %150, %152, %cst_64 {dimension_numbers = #tpu.dot_dimension_numbers<[1], [0], [0], [1], [0, 0, 1, 1], [], []>} : vector<64x128xbf16>, vector<128x512xbf16>, vector<64x512xf32> -> vector<64x512xf32>
    %c0_65 = arith.constant 0 : index
    %c0_66 = arith.constant 0 : index
    %c0_67 = arith.constant 0 : index
    %154 = vector.load %arg11[%c0_65, %c0_66, %c0_67] : memref<1x1x512xf32, #tpu.memory_space<vmem>>, vector<1x1x512xf32>
    %155 = vector.shape_cast %154 : vector<1x1x512xf32> to vector<1x512xf32>
    %156 = vector.broadcast %155 : vector<1x512xf32> to vector<64x512xf32>
    %157 = arith.addf %153, %156 : vector<64x512xf32>
    %cst_68 = arith.constant 0.000000e+00 : f32
    %158 = vector.broadcast %cst_68 : f32 to vector<64x512xf32>
    %159 = arith.maximumf %157, %158 : vector<64x512xf32>
    %160 = arith.truncf %159 : vector<64x512xf32> to vector<64x512xbf16>
    %c0_69 = arith.constant 0 : index
    %c0_70 = arith.constant 0 : index
    %c0_71 = arith.constant 0 : index
    %161 = vector.load %arg12[%c0_69, %c0_70, %c0_71] : memref<1x512x128xbf16, #tpu.memory_space<vmem>>, vector<1x512x128xbf16>
    %162 = vector.shape_cast %161 : vector<1x512x128xbf16> to vector<512x128xbf16>
    %cst_72 = arith.constant dense<0.000000e+00> : vector<64x128xf32>
    %163 = tpu.matmul %160, %162, %cst_72 {dimension_numbers = #tpu.dot_dimension_numbers<[1], [0], [0], [1], [0, 0, 1, 1], [], []>} : vector<64x512xbf16>, vector<512x128xbf16>, vector<64x128xf32> -> vector<64x128xf32>
    %c0_73 = arith.constant 0 : index
    %c0_74 = arith.constant 0 : index
    %c0_75 = arith.constant 0 : index
    %164 = vector.load %arg13[%c0_73, %c0_74, %c0_75] : memref<1x1x128xf32, #tpu.memory_space<vmem>>, vector<1x1x128xf32>
    %165 = vector.shape_cast %164 : vector<1x1x128xf32> to vector<1x128xf32>
    %166 = vector.broadcast %165 : vector<1x128xf32> to vector<64x128xf32>
    %167 = arith.addf %163, %166 : vector<64x128xf32>
    %168 = arith.addf %123, %167 : vector<64x128xf32>
    %c0_76 = arith.constant 0 : index
    %c0_77 = arith.constant 0 : index
    %169 = vector.load %arg19[%c0_76, %c0_77] : memref<64x128xf32, #tpu.memory_space<vmem>>, vector<64x128xf32>
    tpu.vector_store %arg19[%c0_76, %c0_77], %168 {strides = array<i32>} : memref<64x128xf32, #tpu.memory_space<vmem>>, vector<64x128xf32>,
    %c1_i32 = arith.constant 1 : i32
    %170 = arith.cmpi eq, %arg1, %c1_i32 : i32
    %171 = arith.extui %170 : i1 to i32
    %c0_i32_78 = arith.constant 0 : i32
    %172 = arith.cmpi ne, %171, %c0_i32_78 : i32
    scf.if %172 {
      %c0_79 = arith.constant 0 : index
      %c0_80 = arith.constant 0 : index
      %173 = vector.load %arg14[%c0_79, %c0_80] : memref<1x128xf32, #tpu.memory_space<vmem>>, vector<1x128xf32>
      %c0_81 = arith.constant 0 : index
      %c0_82 = arith.constant 0 : index
      %174 = vector.load %arg15[%c0_81, %c0_82] : memref<1x128xf32, #tpu.memory_space<vmem>>, vector<1x128xf32>
      %cst_83 = arith.constant dense<0.000000e+00> : vector<64xf32>
      %175 = vector.multi_reduction <add>, %168, %cst_83 [1] : vector<64x128xf32> to vector<64xf32>
      %176 = vector.shape_cast %175 : vector<64xf32> to vector<64x1xf32>
      %cst_84 = arith.constant 1.280000e+02 : f32
      %177 = vector.broadcast %cst_84 : f32 to vector<64x1xf32>
      %178 = arith.divf %176, %177 : vector<64x1xf32>
      %179 = vector.broadcast %178 : vector<64x1xf32> to vector<64x128xf32>
      %180 = arith.subf %168, %179 : vector<64x128xf32>
      %181 = arith.mulf %180, %180 : vector<64x128xf32>
      %cst_85 = arith.constant dense<0.000000e+00> : vector<64xf32>
      %182 = vector.multi_reduction <add>, %181, %cst_85 [1] : vector<64x128xf32> to vector<64xf32>
      %183 = vector.shape_cast %182 : vector<64xf32> to vector<64x1xf32>
      %cst_86 = arith.constant 1.280000e+02 : f32
      %184 = vector.broadcast %cst_86 : f32 to vector<64x1xf32>
      %185 = arith.divf %183, %184 : vector<64x1xf32>
      %186 = vector.broadcast %178 : vector<64x1xf32> to vector<64x128xf32>
      %187 = arith.subf %168, %186 : vector<64x128xf32>
      %cst_87 = arith.constant 9.99999974E-6 : f32
      %188 = vector.broadcast %cst_87 : f32 to vector<64x1xf32>
      %189 = arith.addf %185, %188 : vector<64x1xf32>
      %190 = math.rsqrt %189 : vector<64x1xf32>
      %191 = vector.broadcast %190 : vector<64x1xf32> to vector<64x128xf32>
      %192 = arith.mulf %187, %191 : vector<64x128xf32>
      %193 = vector.broadcast %173 : vector<1x128xf32> to vector<64x128xf32>
      %194 = arith.mulf %192, %193 : vector<64x128xf32>
      %195 = vector.broadcast %174 : vector<1x128xf32> to vector<64x128xf32>
      %196 = arith.addf %194, %195 : vector<64x128xf32>
      %197 = arith.truncf %196 : vector<64x128xf32> to vector<64x128xbf16>
      %c0_88 = arith.constant 0 : index
      %c0_89 = arith.constant 0 : index
      %198 = vector.load %arg16[%c0_88, %c0_89] : memref<128x512xbf16, #tpu.memory_space<vmem>>, vector<128x512xbf16>
      %cst_90 = arith.constant dense<0.000000e+00> : vector<64x512xf32>
      %199 = tpu.matmul %197, %198, %cst_90 {dimension_numbers = #tpu.dot_dimension_numbers<[1], [0], [0], [1], [0, 0, 1, 1], [], []>} : vector<64x128xbf16>, vector<128x512xbf16>, vector<64x512xf32> -> vector<64x512xf32>
      %c0_91 = arith.constant 0 : index
      %c0_92 = arith.constant 0 : index
      %200 = vector.load %arg17[%c0_91, %c0_92] : memref<1x512xf32, #tpu.memory_space<vmem>>, vector<1x512xf32>
      %201 = vector.broadcast %200 : vector<1x512xf32> to vector<64x512xf32>
      %202 = arith.addf %199, %201 : vector<64x512xf32>
      %203 = arith.truncf %202 : vector<64x512xf32> to vector<64x512xbf16>
      %c0_93 = arith.constant 0 : index
      %c0_94 = arith.constant 0 : index
      %c0_95 = arith.constant 0 : index
      %204 = vector.load %arg18[%c0_93, %c0_94, %c0_95] : memref<1x64x512xbf16, #tpu.memory_space<vmem>>, vector<1x64x512xbf16>
      %205 = vector.shape_cast %204 : vector<1x64x512xbf16> to vector<64x512xbf16>
      %206 = vector.shape_cast %203 : vector<64x512xbf16> to vector<1x64x512xbf16>
      tpu.vector_store %arg18[%c0_93, %c0_94, %c0_95], %206 {strides = array<i32>} : memref<1x64x512xbf16, #tpu.memory_space<vmem>>, vector<1x64x512xbf16>,
    } else {
    }
    return
  }
  func.func @transform_0(%arg0: i32, %arg1: i32) -> (i32, i32, i32) {
    %c0_i32 = arith.constant 0 : i32
    %c0_i32_0 = arith.constant 0 : i32
    %c0_i32_1 = arith.constant 0 : i32
    return %arg0, %c0_i32, %c0_i32_0 : i32, i32, i32
  }
  func.func @transform_1(%arg0: i32, %arg1: i32) -> (i32, i32, i32) {
    %c0_i32 = arith.constant 0 : i32
    %c0_i32_0 = arith.constant 0 : i32
    %c0_i32_1 = arith.constant 0 : i32
    return %arg1, %c0_i32, %c0_i32_0 : i32, i32, i32
  }
  func.func @transform_2(%arg0: i32, %arg1: i32) -> (i32, i32, i32) {
    %c0_i32 = arith.constant 0 : i32
    %c0_i32_0 = arith.constant 0 : i32
    %c0_i32_1 = arith.constant 0 : i32
    return %arg1, %c0_i32, %c0_i32_0 : i32, i32, i32
  }
  func.func @transform_3(%arg0: i32, %arg1: i32) -> (i32, i32, i32) {
    %c0_i32 = arith.constant 0 : i32
    %c0_i32_0 = arith.constant 0 : i32
    %c0_i32_1 = arith.constant 0 : i32
    return %arg1, %c0_i32, %c0_i32_0 : i32, i32, i32
  }
  func.func @transform_4(%arg0: i32, %arg1: i32) -> (i32, i32, i32) {
    %c0_i32 = arith.constant 0 : i32
    %c0_i32_0 = arith.constant 0 : i32
    %c0_i32_1 = arith.constant 0 : i32
    return %arg1, %c0_i32, %c0_i32_0 : i32, i32, i32
  }
  func.func @transform_5(%arg0: i32, %arg1: i32) -> (i32, i32, i32) {
    %c0_i32 = arith.constant 0 : i32
    %c0_i32_0 = arith.constant 0 : i32
    %c0_i32_1 = arith.constant 0 : i32
    return %arg1, %c0_i32, %c0_i32_0 : i32, i32, i32
  }
  func.func @transform_6(%arg0: i32, %arg1: i32) -> (i32, i32, i32) {
    %c0_i32 = arith.constant 0 : i32
    %c0_i32_0 = arith.constant 0 : i32
    %c0_i32_1 = arith.constant 0 : i32
    return %arg1, %c0_i32, %c0_i32_0 : i32, i32, i32
  }
  func.func @transform_7(%arg0: i32, %arg1: i32) -> (i32, i32, i32) {
    %c0_i32 = arith.constant 0 : i32
    %c0_i32_0 = arith.constant 0 : i32
    %c0_i32_1 = arith.constant 0 : i32
    return %arg1, %c0_i32, %c0_i32_0 : i32, i32, i32
  }
  func.func @transform_8(%arg0: i32, %arg1: i32) -> (i32, i32, i32) {
    %c0_i32 = arith.constant 0 : i32
    %c0_i32_0 = arith.constant 0 : i32
    %c0_i32_1 = arith.constant 0 : i32
    return %arg1, %c0_i32, %c0_i32_0 : i32, i32, i32
  }
  func.func @transform_9(%arg0: i32, %arg1: i32) -> (i32, i32, i32) {
    %c0_i32 = arith.constant 0 : i32
    %c0_i32_0 = arith.constant 0 : i32
    %c0_i32_1 = arith.constant 0 : i32
    return %arg1, %c0_i32, %c0_i32_0 : i32, i32, i32
  }
  func.func @transform_10(%arg0: i32, %arg1: i32) -> (i32, i32, i32) {
    %c0_i32 = arith.constant 0 : i32
    %c0_i32_0 = arith.constant 0 : i32
    %c0_i32_1 = arith.constant 0 : i32
    return %arg1, %c0_i32, %c0_i32_0 : i32, i32, i32
  }
  func.func @transform_11(%arg0: i32, %arg1: i32) -> (i32, i32, i32) {
    %c0_i32 = arith.constant 0 : i32
    %c0_i32_0 = arith.constant 0 : i32
    %c0_i32_1 = arith.constant 0 : i32
    return %arg1, %c0_i32, %c0_i32_0 : i32, i32, i32
  }
  func.func @transform_12(%arg0: i32, %arg1: i32) -> (i32, i32) {
    %c0_i32 = arith.constant 0 : i32
    %c0_i32_0 = arith.constant 0 : i32
    %c0_i32_1 = arith.constant 0 : i32
    return %c0_i32, %c0_i32_0 : i32, i32
  }
  func.func @transform_13(%arg0: i32, %arg1: i32) -> (i32, i32) {
    %c0_i32 = arith.constant 0 : i32
    %c0_i32_0 = arith.constant 0 : i32
    %c0_i32_1 = arith.constant 0 : i32
    return %c0_i32, %c0_i32_0 : i32, i32
  }
  func.func @transform_14(%arg0: i32, %arg1: i32) -> (i32, i32) {
    %c0_i32 = arith.constant 0 : i32
    %c0_i32_0 = arith.constant 0 : i32
    %c0_i32_1 = arith.constant 0 : i32
    return %c0_i32, %c0_i32_0 : i32, i32
  }
  func.func @transform_15(%arg0: i32, %arg1: i32) -> (i32, i32) {
    %c0_i32 = arith.constant 0 : i32
    %c0_i32_0 = arith.constant 0 : i32
    %c0_i32_1 = arith.constant 0 : i32
    return %c0_i32, %c0_i32_0 : i32, i32
  }
  func.func @transform_16(%arg0: i32, %arg1: i32) -> (i32, i32, i32) {
    %c0_i32 = arith.constant 0 : i32
    %c0_i32_0 = arith.constant 0 : i32
    %c0_i32_1 = arith.constant 0 : i32
    return %arg0, %c0_i32, %c0_i32_0 : i32, i32, i32
  }
}

</mosaic_0001>

<bundles_post_ra>
// kernel: tpu_custom_call.1
= control target key start
LH: loop header
LB: loop body
LE: loop exit
PB: predicated region body
PF: predicated region fallthrough
CT: control target
= control target key end

     0   :  { %s7917_s0 = inlined_call_operand.hbm [shape: f32[2,64,128], index: 0, kind: input, shape index: {}]   ;;  %s7918_s1 = inlined_call_operand.hbm [shape: f32[2,1,128], index: 1, kind: input, shape index: {}]   ;;  %s7919_s2 = inlined_call_operand.vmem [shape: f32[2,1,128], index: 2, kind: input, shape index: {}]   ;;  %s7920_s3 = inlined_call_operand.hbm [shape: bf16[2,128,384], index: 3, kind: input, shape index: {}]   ;;  %s7921_s4 = inlined_call_operand.hbm [shape: bf16[2,128,128], index: 4, kind: input, shape index: {}]   ;;  %s7922_s5 = inlined_call_operand.vmem [shape: f32[2,1,128], index: 5, kind: input, shape index: {}]   ;;  %s7923_s6 = inlined_call_operand.hbm [shape: f32[2,1,128], index: 6, kind: input, shape index: {}]   ;;  %s7924_s7 = inlined_call_operand.hbm [shape: f32[2,1,128], index: 7, kind: input, shape index: {}]   ;;  %s7925_s8 = inlined_call_operand.hbm [shape: bf16[2,128,512], index: 8, kind: input, shape index: {}]   ;;  %s7926_s9 = inlined_call_operand.vmem [shape: f32[2,1,512], index: 9, kind: input, shape index: {}]   ;;  %s7927_s10 = inlined_call_operand.hbm [shape: bf16[2,512,128], index: 10, kind: input, shape index: {}]   ;;  %s7928_s11 = inlined_call_operand.vmem [shape: f32[2,1,128], index: 11, kind: input, shape index: {}]   ;;  %s7929_s12 = inlined_call_operand.vmem [shape: f32[1,128], index: 12, kind: input, shape index: {}]   ;;  %s7930_s13 = inlined_call_operand.vmem [shape: f32[1,128], index: 13, kind: input, shape index: {}]   ;;  %s7931_s14 = inlined_call_operand.hbm [shape: bf16[128,512], index: 14, kind: input, shape index: {}]   ;;  %s7932_s15 = inlined_call_operand.vmem [shape: f32[1,512], index: 15, kind: input, shape index: {}]   ;;  %s7933_s16 = inlined_call_operand.hbm [shape: bf16[2,64,512], index: 16, kind: output, shape index: {}]  }
   0x1   :  { %7963 = sst [smem:[#allocation50_spill]] %s7917_s0 }
   0x2   :  { %7964 = sst [smem:[#allocation51_spill]] %s7918_s1 }
   0x3   :  { %7965 = sst [smem:[#allocation52_spill]] %s7919_s2 }
   0x4   :  { %7966 = sst [smem:[#allocation53_spill]] %s7920_s3 }
   0x5   :  { %7967 = sst [smem:[#allocation54_spill]] %s7921_s4 }
   0x6   :  { %7968 = sst [smem:[#allocation55_spill]] %s7922_s5 }
   0x7   :  { %7969 = sst [smem:[#allocation56_spill]] %s7923_s6 }
   0x8   :  { %7970 = sst [smem:[#allocation57_spill]] %s7924_s7 }
   0x9   :  { %7971 = sst [smem:[#allocation58_spill]] %s7925_s8 }
   0xa   :  { %7972 = sst [smem:[#allocation59_spill]] %s7926_s9 }
   0xb   :  { %7973 = sst [smem:[#allocation60_spill]] %s7927_s10 }
   0xc   :  { %7974 = sst [smem:[#allocation61_spill]] %s7928_s11 }
   0xd   :  { %7975 = sst [smem:[#allocation62_spill]] %s7929_s12 }
   0xe   :  { %7976 = sst [smem:[#allocation63_spill]] %s7930_s13 }
   0xf   :  { %7977 = sst [smem:[#allocation64_spill]] %s7931_s14 }
  0x10   :  { %7978 = sst [smem:[#allocation65_spill]] %s7932_s15 }
  0x11   :  { %7979 = sst [smem:[#allocation66_spill]] %s7933_s16 }
  0x12   :  { %21 = vsyncpa [#allocation5], 0 }
  0x13   :  { %23 = vsyncpa [#allocation5 + $0x1], 0 }
  0x14   :  { %24 = vsyncpa [#allocation8], 0 }
  0x15   :  { %26 = vsyncpa [#allocation8 + $0x1], 0 }
  0x16   :  { %27 = vsyncpa [#allocation11], 0 }
  0x17   :  { %29 = vsyncpa [#allocation11 + $0x1], 0 }
  0x18   :  { %30 = vsyncpa [#allocation14], 0 }
  0x19   :  { %32 = vsyncpa [#allocation14 + $0x1], 0 }
  0x1a   :  { %33 = vsyncpa [#allocation17], 0 }
  0x1b   :  { %35 = vsyncpa [#allocation17 + $0x1], 0 }
  0x1c   :  { %36 = vsyncpa [#allocation6], 0 }
  0x1d   :  { %38 = vsyncpa [#allocation6 + $0x1], 0  ;;  %s6255_s21 = smov 0   ;;  %s6257_s22 = smov 0  }
  0x1e   :  { %s6259_s23 = smov 0   ;;  %s6261_s24 = smov 0  }
  0x1f   :  { %s6263_s25 = smov 0   ;;  %s6265_s26 = smov 0  }
  0x20   :  { %s6267_s27 = smov 0   ;;  %s6269_s28 = smov 0  }
  0x21   :  { %s6271_s29 = smov 0   ;;  %s6273_s30 = smov 0  }
  0x22   :  { %s6275_s0 = smov 0  }
  0x23 LB: > { %7980 = sst [smem:[#allocation27_spill]] %s6107_s22  ;;  %s6309_s17 = sadd.s32 4294967295, %s6143_s0   ;;  %s6143_s0 = sphi %s6275_s0, %s44_s0   ;;  %s6139_s30 = sphi %s6273_s30, %s8076_s30   ;;  %s6135_s29 = sphi %s6271_s29, %s8075_s29   ;;  %s6131_s28 = sphi %s6269_s28, %s8074_s28   ;;  %s6127_s27 = sphi %s6267_s27, %s8073_s27   ;;  %s6123_s26 = sphi %s6265_s26, %s8072_s26   ;;  %s6119_s25 = sphi %s6263_s25, %s8078_s25   ;;  %s6115_s24 = sphi %s6261_s24, %s8077_s24   ;;  %s6111_s23 = sphi %s6259_s23, %s8070_s23   ;;  %s6107_s22 = sphi %s6257_s22, %s8069_s22   ;;  %s6103_s21 = sphi %s6255_s21, %s8068_s21  }
  0x24   : > { %7981 = sst [smem:[#allocation28_spill]] %s6111_s23  ;;  %s4635_s18 = sadd.s32 4294967294, %s6143_s0  }
  0x25   : > { %7982 = sst [smem:[#allocation29_spill]] %s6115_s24  ;;  %p76_p0 = scmp.ne.s32.totalorder %s6119_s25, %s6115_s24 }
  0x26   : > { %7983 = sst [smem:[#allocation30_spill]] %s6123_s26  ;;  %p7943_p1 = scmp.eq.s32.totalorder %s6309_s17, 0 }
  0x27   : > { %7984 = sst [smem:[#allocation31_spill]] %s6127_s27  ;;  %p102_p2 = scmp.ne.s32.totalorder %s6107_s22, %s6103_s21 }
  0x28   : > { %7985 = sst [smem:[#allocation32_spill]] %s6131_s28  ;;  %p6319_p4 = por %p7943_p1, %p76_p0 }
  0x29   : > { %7986 = sst [smem:[#allocation33_spill]] %s6135_s29  ;;  %p476_p5 = scmp.eq.s32.totalorder %s4635_s18, 3 }
  0x2a   : > { %7987 = sst [smem:[#allocation34_spill]] %s6139_s30  ;;  %p6325_p6 = por %p102_p2, %p7943_p1 }
  0x2b   : > { %s7988_s19 = scalar_select %p6319_p4, 1, 0 }
  0x2c   : > { %s7990_s20 = scalar_select %p6325_p6, 1, 0 }
  0x2d   : > { %7989 = sst [smem:[#allocation35_spill]] %s7988_s19  ;;  %p4636_p7 = scmp.ge.s32.totalorder %s6143_s0, 1 }
  0x2e   : > { %7991 = sst [smem:[#allocation36_spill]] %s7990_s20  ;;  %p6330_p8 = por %p476_p5, %p76_p0 }
  0x2f   : > { %p483_p9 = scmp.lt.s32.totalorder %s6143_s0, 5  ;;  %s6145_s24 = smov [#allocation18]  }
  0x30   : > { %s7992_s16 = scalar_select %p6330_p8, 1, 0 }
  0x31   : > { %p6335_p10 = pnand %p4636_p7, %p483_p9  ;;  %s501_s28 = sshll.u32 %s6145_s24, 4  ;;  %s502_s28 = int_to_ptr.vmem [resolvable:$true] %s501_s28 }
  0x32   : > { %7993 = sst [smem:[#allocation37_spill]] %s7992_s16  ;;  %s53_s15 = sadd.s32 1, %s6135_s29 }
  0x33   : > { %s7994_s21 = scalar_select %p6335_p10, 1, 0 }
  0x34   : > { %p5260_p11 = pneg %p6335_p10  ;;  %s5764_s16 = scalar_lea.vmem %s502_s28, 4096 }
  0x35   : > { %7995 = sst [smem:[#allocation38_spill]] %s7994_s21  ;;  %p5765_p0 = scmp.ne.s32.totalorder %s502_s28, %s5764_s16 }
  0x36   : > { %p6343_p12 = pnand %p5260_p11, %p7943_p1  ;;  %p5772_p7 = scmp.lt.s32.totalorder %s502_s28, %s502_s28 }
  0x37   : > { %p5773_p9 = scmp.lt.s32.totalorder %s5764_s16, %s5764_s16 }
  0x38   : > { %p5755_p13 = pneg %p6343_p12 }
  0x39   : > { %p5774_p3 = por %p5773_p9, %p5772_p7 }
  0x3a   : > { %p5767_p2 = pnand %p5765_p0, %p5755_p13 }
  0x3c   : > { %p5768_p5 = pneg %p5767_p2 }
  0x3e   : > { %p5775_p8 = pnand %p5774_p3, %p5768_p5 }
  0x40   : > { %5778 = shalt.err (!%p5775_p8)
}
  0x41   : > { %s7937_s24 = smov 256   ;;  %s7938_s13 = smov 16  }
  0x42   : > { %s7997_s14 = sld [smem:[#allocation64_spill]]  ;;  %p6358_p3 = scmp.ge.s32.totalorder %s53_s15, 2 }
  0x43   : > { %p71_p8 = scmp.eq.s32.totalorder %s6143_s0, 0  ;;  %s89_s11 = sadd.s32 1, %s6111_s23 }
  0x44   : > { %p96_p11 = scmp.ne.s32.totalorder %s6111_s23, %s6107_s22  ;;  %s8080_s15 = smov (%p6358_p3, %s53_s15), 0 }
  0x45   : > { %7999 = sst [smem:[#allocation39_spill]] %s8080_s15  ;;  %p7944_p0 = scmp.lt.s32.totalorder %s6143_s0, 4 }
  0x46   : > { %p98_p13 = por %p96_p11, %p71_p8  ;;  %s86_s18 = ssub.s32 %s6135_s29, %s8080_s15 }
  0x47   : > { %s6376_s5 = sand.u32 1, %s6143_s0   ;;  %s6379_s12 = sand.u32 1, %s6111_s23  }
  0x48   : > { %5263 = dma.hbm_to_vmem [thread:$0]  (!%p6343_p12), %s7997_s14, 4096, %s502_s28, [#allocation17], %s7937_s24, %s7937_s24, %s7938_s13  }
  0x49   : > { %p87_p12 = scmp.eq.s32.totalorder %s86_s18, 0  ;;  %s6382_s28 = sshll.u32 %s6135_s29, 4 }
  0x4a   : > { %s8001_s1 = sld [smem:[#allocation51_spill]]  ;;  %s542_s2 = scalar_lea.vmem [#allocation7], %s6379_s12 }
  0x4b   : > { %s6385_s16 = scalar_select %p87_p12, %s6111_s23, %s89_s11  }
  0x4c   : > { %s549_s27 = sshll.u32 %s542_s2, 4  ;;  %p6394_p2 = pnand %p7944_p0, %p98_p13  ;;  %s550_s27 = int_to_ptr.vmem [resolvable:$true] %s549_s27 }
  0x4d   : > { %8000 = sst [smem:[#allocation40_spill]] %s6385_s16  ;;  %s7950_s18 = scalar_lea.sflag [#allocation8], %s6376_s5 }
  0x4e   : > { %p6401_p5 = pneg %p6394_p2  ;;  %s5792_s11 = scalar_lea.vmem %s550_s27, 16 }
  0x4f   : > { %p5793_p7 = scmp.ne.s32.totalorder %s550_s27, %s5792_s11  ;;  %s6148_s2 = smov [#allocation7]  }
  0x50   : > { %s547_s14 = scalar_lea.hbm %s8001_s1, %s6382_s28  ;;  %s5797_s13 = sshll.u32 %s6148_s2, 4  ;;  %s5798_s13 = int_to_ptr.vmem [resolvable:$false] %s5797_s13 }
  0x51   : > { %p5795_p9 = pnand %p5793_p7, %p6401_p5  ;;  %s5799_s24 = scalar_lea.vmem %s5798_s13, 32 }
  0x52   : > { %p5800_p13 = scmp.lt.s32.totalorder %s550_s27, %s5798_s13  ;;  %p5801_p12 = scmp.lt.s32.totalorder %s5799_s24, %s5792_s11 }
  0x53   : > { %p5796_p11 = pneg %p5795_p9 }
  0x54   : > { %p5802_p1 = por %p5801_p12, %p5800_p13 }
  0x56   : > { %p5803_p0 = pnand %p5802_p1, %p5796_p11 }
  0x58   : > { %5806 = shalt.err (!%p5803_p0)
}
  0x59   : > { %5270 = dma.hbm_to_vmem [thread:$0]  (!%p6394_p2), %s547_s14, 16, %s550_s27, %s7950_s18  }
  0x5a   : > { %s4644_s1 = sshll.u32 %s6379_s12, 6  ;;  %s4855_s16 = sshll.u32 %s6135_s29, 10 }
  0x5b   : > { %s8004_s4 = sld [smem:[#allocation54_spill]]  ;;  %s587_s13 = scalar_lea.vmem [#allocation10], %s4644_s1 }
  0x5c   : > { %s594_s11 = sshll.u32 %s587_s13, 4  ;;  %s7954_s24 = scalar_lea.sflag [#allocation11], %s6376_s5  ;;  %s595_s11 = int_to_ptr.vmem [resolvable:$true] %s594_s11 }
  0x5d   : > { %s5820_s19 = scalar_lea.vmem %s595_s11, 1024  ;;  %s6149_s21 = smov [#allocation10]  }
  0x5e   : > { %p5821_p1 = scmp.ne.s32.totalorder %s595_s11, %s5820_s19  ;;  %s5825_s10 = sshll.u32 %s6149_s21, 4  ;;  %s5826_s10 = int_to_ptr.vmem [resolvable:$false] %s5825_s10 }
  0x5f   : > { %s5827_s8 = scalar_lea.vmem %s5826_s10, 2048  ;;  %p5828_p9 = scmp.lt.s32.totalorder %s595_s11, %s5826_s10 }
  0x60   : > { %p5823_p0 = pnand %p5821_p1, %p6401_p5  ;;  %p5829_p11 = scmp.lt.s32.totalorder %s5827_s8, %s5820_s19 }
  0x61   : > { %s593_s22 = scalar_lea.hbm %s8004_s4, %s4855_s16 }
  0x62   : > { %p5824_p7 = pneg %p5823_p0  ;;  %p5830_p13 = por %p5829_p11, %p5828_p9 }
  0x64   : > { %p5831_p12 = pnand %p5830_p13, %p5824_p7 }
  0x66   : > { %5834 = shalt.err (!%p5831_p12)
}
  0x67   : > { %s7951_s14 = smov 64   ;;  %s7952_s1 = smov 4  }
  0x68   : > { %5276 = dma.hbm_to_vmem [thread:$0]  (!%p6394_p2), %s593_s22, 1024, %s595_s11, %s7954_s24, %s7951_s14, %s7951_s14, %s7952_s1  }
  0x69   : > { %s8005_s7 = sld [smem:[#allocation57_spill]]  ;;  %s630_s27 = scalar_lea.vmem [#allocation13], %s6379_s12 }
  0x6a   : > { %s637_s19 = sshll.u32 %s630_s27, 4  ;;  %s7953_s21 = scalar_lea.sflag [#allocation14], %s6376_s5  ;;  %s638_s19 = int_to_ptr.vmem [resolvable:$true] %s637_s19 }
  0x6b   : > { %s5848_s16 = scalar_lea.vmem %s638_s19, 16  ;;  %s6152_s2 = smov [#allocation13]  }
  0x6c   : > { %p5849_p1 = scmp.ne.s32.totalorder %s638_s19, %s5848_s16  ;;  %s5853_s13 = sshll.u32 %s6152_s2, 4  ;;  %s5854_s13 = int_to_ptr.vmem [resolvable:$false] %s5853_s13 }
  0x6d   : > { %s5855_s18 = scalar_lea.vmem %s5854_s13, 32  ;;  %p5856_p9 = scmp.lt.s32.totalorder %s638_s19, %s5854_s13 }
  0x6e   : > { %p5851_p0 = pnand %p5849_p1, %p6401_p5  ;;  %p5857_p11 = scmp.lt.s32.totalorder %s5855_s18, %s5848_s16 }
  0x6f   : > { %s635_s8 = scalar_lea.hbm %s8005_s7, %s6382_s28 }
  0x70   : > { %p5852_p7 = pneg %p5851_p0  ;;  %p5858_p13 = por %p5857_p11, %p5856_p9 }
  0x72   : > { %p5859_p12 = pnand %p5858_p13, %p5852_p7 }
  0x74   : > { %5862 = shalt.err (!%p5859_p12)
}
  0x75   : > { %5282 = dma.hbm_to_vmem [thread:$0]  (!%p6394_p2), %s635_s8, 16, %s638_s19, %s7953_s21  }
  0x76   : > { %s63_s22 = sadd.s32 1, %s6123_s26  ;;  %s56_s18 = sadd.s32 1, %s6139_s30 }
  0x77   : > { %p70_p1 = scmp.ne.s32.totalorder %s6123_s26, %s6119_s25  ;;  %s8082_s18 = smov (!%p6358_p3, %s56_s18), %s6139_s30 }
  0x78   : > { %p8007_p7 = scmp.eq.s32.totalorder %s6309_s17, 3  ;;  %p58_p11 = scmp.ge.s32.totalorder %s8082_s18, 2 }
  0x79   : > { %p6447_p0 = por %p71_p8, %p70_p1  ;;  %s518_s10 = sand.u32 1, %s6123_s26  }
  0x7a   : > { %p6453_p9 = por %p8007_p7, %p70_p1  ;;  %s4639_s8 = sshll.u32 %s518_s10, 6 }
  0x7b   : > { %s8084_s18 = smov (%p58_p11, %s8082_s18), 0  ;;  %s4854_s9 = sshll.u32 %s6139_s30, 10 }
  0x7c   : > { %s8008_s23 = scalar_select %p6453_p9, 1, 0 }
  0x7d   : > { %8009 = sst [smem:[#allocation41_spill]] %s8084_s18  ;;  %s60_s27 = ssub.s32 %s6139_s30, %s8084_s18 }
  0x7e   : > { %s8010_s2 = sld [smem:[#allocation50_spill]]  ;;  %p61_p3 = scmp.eq.s32.totalorder %s60_s27, 0 }
  0x7f   : > { %s522_s14 = scalar_lea.vmem [#allocation4], %s4639_s8  ;;  %p8011_p8 = scmp.lt.s32.totalorder %s6143_s0, 4 }
  0x80   : > { %s529_s1 = sshll.u32 %s522_s14, 4  ;;  %s5235_s4 = smul.u32 192, %s6379_s12  ;;  %s530_s1 = int_to_ptr.vmem [resolvable:$true] %s529_s1 }
  0x81   : > { %p6472_p13 = pnand %p8011_p8, %p6447_p0  ;;  %s519_s7 = scalar_lea.sflag [#allocation5], %s518_s10 }
  0x82   : > { %s6477_s24 = scalar_select %p61_p3, %s6123_s26, %s63_s22  }
  0x83   : > { %p5865_p12 = pneg %p6472_p13  ;;  %s5876_s19 = scalar_lea.vmem %s530_s1, 1024 }
  0x84   : > { %s6466_s13 = scalar_lea.hbm %s8010_s2, %s4854_s9  ;;  %8013 = sst [smem:[#allocation42_spill]] %s6477_s24 }
  0x85   : > { %p5877_p1 = scmp.ne.s32.totalorder %s530_s1, %s5876_s19  ;;  %s6153_s8 = smov [#allocation4]  }
  0x86   : > { %s5881_s14 = sshll.u32 %s6153_s8, 4  ;;  %s5882_s14 = int_to_ptr.vmem [resolvable:$false] %s5881_s14 }
  0x87   : > { %p5879_p7 = pnand %p5877_p1, %p5865_p12  ;;  %s5883_s11 = scalar_lea.vmem %s5882_s14, 2048 }
  0x88   : > { %p5884_p9 = scmp.lt.s32.totalorder %s530_s1, %s5882_s14  ;;  %p5885_p0 = scmp.lt.s32.totalorder %s5883_s11, %s5876_s19 }
  0x89   : > { %p5880_p11 = pneg %p5879_p7 }
  0x8a   : > { %p5886_p8 = por %p5885_p0, %p5884_p9 }
  0x8c   : > { %p5887_p6 = pnand %p5886_p8, %p5880_p11 }
  0x8e   : > { %5890 = shalt.err (!%p5887_p6)
}
  0x8f   : > { %s6154_s9 = smov 128   ;;  %s6155_s22 = smov 8  }
  0x90   : > { %5267 = dma.hbm_to_vmem [thread:$0]  (!%p6472_p13), %s6466_s13, 1024, %s530_s1, %s519_s7, %s6154_s9, %s6154_s9, %s6155_s22  }
  0x91   : > { %s5236_s10 = smul.u32 3072, %s6135_s29  ;;  %s566_s27 = scalar_lea.vmem [#allocation9], %s5235_s4 }
  0x92   : > { %s573_s16 = sshll.u32 %s566_s27, 4  ;;  %s8014_s3 = sld [smem:[#allocation53_spill]]  ;;  %s574_s16 = int_to_ptr.vmem [resolvable:$true] %s573_s16 }
  0x93   : > { %s5904_s19 = scalar_lea.vmem %s574_s16, 3072  ;;  %s6156_s14 = smov [#allocation9]  }
  0x94   : > { %p5905_p9 = scmp.ne.s32.totalorder %s574_s16, %s5904_s19  ;;  %s5909_s11 = sshll.u32 %s6156_s14, 4  ;;  %s5910_s11 = int_to_ptr.vmem [resolvable:$false] %s5909_s11 }
  0x95   : > { %s5911_s30 = scalar_lea.vmem %s5910_s11, 6144  ;;  %p5912_p12 = scmp.lt.s32.totalorder %s574_s16, %s5910_s11 }
  0x96   : > { %p5907_p6 = pnand %p5905_p9, %p6401_p5  ;;  %p5913_p1 = scmp.lt.s32.totalorder %s5911_s30, %s5904_s19 }
  0x98   : > { %s572_s18 = scalar_lea.hbm %s8014_s3, %s5236_s10  ;;  %p5908_p3 = pneg %p5907_p6 }
  0x99   : > { %p5914_p13 = por %p5913_p1, %p5912_p12 }
  0x9b   : > { %p5915_p7 = pnand %p5914_p13, %p5908_p3 }
  0x9d   : > { %5918 = shalt.err (!%p5915_p7)
}
  0x9e   : > { %s6157_s4 = smov 192   ;;  %s6158_s7 = smov 12  }
  0x9f   : > { %s8015_s1 = scalar_lea.sflag [#allocation8], %s6376_s5  ;;  %s8016_s6 = sld [smem:[#allocation56_spill]] }
  0xa0   : > { %5273 = dma.hbm_to_vmem [thread:$0]  (!%p6394_p2), %s572_s18, 3072, %s574_s16, %s8015_s1, %s6157_s4, %s6157_s4, %s6158_s7  }
  0xa1   : > { %s613_s22 = scalar_lea.vmem [#allocation12], %s6379_s12  ;;  %s4649_s10 = sshll.u32 %s6379_s12, 8 }
  0xa2   : > { %s620_s30 = sshll.u32 %s613_s22, 4  ;;  %s6159_s2 = smov [#allocation12]   ;;  %s621_s30 = int_to_ptr.vmem [resolvable:$true] %s620_s30 }
  0xa3   : > { %s5932_s27 = scalar_lea.vmem %s621_s30, 16  ;;  %s5937_s8 = sshll.u32 %s6159_s2, 4  ;;  %s5938_s8 = int_to_ptr.vmem [resolvable:$false] %s5937_s8 }
  0xa4   : > { %p5933_p11 = scmp.ne.s32.totalorder %s621_s30, %s5932_s27  ;;  %s5939_s19 = scalar_lea.vmem %s5938_s8, 32 }
  0xa5   : > { %s618_s9 = scalar_lea.hbm %s8016_s6, %s6382_s28  ;;  %p5940_p9 = scmp.lt.s32.totalorder %s621_s30, %s5938_s8 }
  0xa6   : > { %p5935_p0 = pnand %p5933_p11, %p6401_p5  ;;  %p5941_p6 = scmp.lt.s32.totalorder %s5939_s19, %s5932_s27 }
  0xa8   : > { %p5936_p8 = pneg %p5935_p0  ;;  %p5942_p3 = por %p5941_p6, %p5940_p9 }
  0xaa   : > { %p5943_p12 = pnand %p5942_p3, %p5936_p8 }
  0xac   : > { %5946 = shalt.err (!%p5943_p12)
}
  0xad   : > { %s8017_s28 = scalar_lea.sflag [#allocation11], %s6376_s5  ;;  %s4856_s18 = sshll.u32 %s6135_s29, 12 }
  0xae   : > { %5279 = dma.hbm_to_vmem [thread:$0]  (!%p6394_p2), %s618_s9, 16, %s621_s30, %s8017_s28  }
  0xaf   : > { %s8018_s11 = sld [smem:[#allocation58_spill]]  ;;  %s648_s7 = scalar_lea.vmem [#allocation15], %s4649_s10 }
  0xb0   : > { %s655_s1 = sshll.u32 %s648_s7, 4  ;;  %s6160_s13 = smov [#allocation15]   ;;  %s656_s1 = int_to_ptr.vmem [resolvable:$true] %s655_s1 }
  0xb1   : > { %s5960_s21 = scalar_lea.vmem %s656_s1, 4096  ;;  %s5965_s22 = sshll.u32 %s6160_s13, 4  ;;  %s5966_s22 = int_to_ptr.vmem [resolvable:$false] %s5965_s22 }
  0xb2   : > { %p5961_p1 = scmp.ne.s32.totalorder %s656_s1, %s5960_s21  ;;  %s5967_s27 = scalar_lea.vmem %s5966_s22, 8192 }
  0xb3   : > { %p5968_p11 = scmp.lt.s32.totalorder %s656_s1, %s5966_s22  ;;  %p5969_p0 = scmp.lt.s32.totalorder %s5967_s27, %s5960_s21 }
  0xb4   : > { %p5963_p13 = pnand %p5961_p1, %p6401_p5 }
  0xb5   : > { %s654_s4 = scalar_lea.hbm %s8018_s11, %s4856_s18  ;;  %p5970_p8 = por %p5969_p0, %p5968_p11 }
  0xb6   : > { %p5964_p7 = pneg %p5963_p13 }
  0xb8   : > { %p5971_p9 = pnand %p5970_p8, %p5964_p7 }
  0xba   : > { %5974 = shalt.err (!%p5971_p9)
}
  0xbb   : > { %s8019_s9 = smov 16   ;;  %s8020_s30 = smov 256  }
  0xbc   : > { %s8021_s2 = scalar_lea.sflag [#allocation14], %s6376_s5  ;;  %s8022_s28 = sld [smem:[#allocation60_spill]] }
  0xbd   : > { %5285 = dma.hbm_to_vmem [thread:$0]  (!%p6394_p2), %s654_s4, 4096, %s656_s1, %s8021_s2, %s8020_s30, %s8020_s30, %s8019_s9  }
  0xbe   : > { %s676_s14 = scalar_lea.vmem [#allocation16], %s4649_s10  ;;  %s673_s7 = scalar_lea.sflag [#allocation17], %s6376_s5 }
  0xbf   : > { %s683_s11 = sshll.u32 %s676_s14, 4  ;;  %s6161_s13 = smov [#allocation16]   ;;  %s684_s11 = int_to_ptr.vmem [resolvable:$true] %s683_s11 }
  0xc0   : > { %s5988_s21 = scalar_lea.vmem %s684_s11, 4096  ;;  %s5993_s22 = sshll.u32 %s6161_s13, 4  ;;  %s5994_s22 = int_to_ptr.vmem [resolvable:$false] %s5993_s22 }
  0xc1   : > { %p5989_p6 = scmp.ne.s32.totalorder %s684_s11, %s5988_s21  ;;  %s5995_s27 = scalar_lea.vmem %s5994_s22, 8192 }
  0xc2   : > { %s682_s16 = scalar_lea.hbm %s8022_s28, %s4856_s18  ;;  %p5996_p1 = scmp.lt.s32.totalorder %s684_s11, %s5994_s22 }
  0xc3   : > { %p5991_p3 = pnand %p5989_p6, %p6401_p5  ;;  %p5997_p13 = scmp.lt.s32.totalorder %s5995_s27, %s5988_s21 }
  0xc5   : > { %p5992_p12 = pneg %p5991_p3  ;;  %p5998_p7 = por %p5997_p13, %p5996_p1 }
  0xc7   : > { %p5999_p11 = pnand %p5998_p7, %p5992_p12 }
  0xc9   : > { %6002 = shalt.err (!%p5999_p11)
}
  0xca   : > { %s8023_s12 = smov 4   ;;  %s8024_s10 = smov 64  }
  0xcb   : > { %5288 = dma.hbm_to_vmem [thread:$0]  (!%p6394_p2), %s682_s16, 4096, %s684_s11, %s673_s7, %s8024_s10, %s8024_s10, %s8023_s12  }
  0xcc   : > { %701 = sbr.rel (%p6335_p10) target bundleno = 3945 (0xf69), region = 84 }
  0xd1   : > { %s6538_s18 = sand.u32 1, %s6119_s25  }
  0xd2   : > { %s4656_s4 = sshll.u32 %s6538_s18, 6  ;;  %s704_s1 = scalar_lea.sflag [#allocation5], %s6538_s18 }
  0xd3   : > { %s6542_s9 = scalar_lea.vmem [#allocation4], %s4656_s4 }
  0xd4   : > { %6074 = dma.done.wait (%p6319_p4), %s704_s1, 1024  }
  0xd5   : > { %6076 = vsyncadd (%p6319_p4), %s704_s1, 4294966272  ;;  %s8027_s15 = sld [smem:[#allocation27_spill]]  ;;  %s712_s2 = sand.u32 1, %s6309_s17  }
  0xd6   : > { %s8028_s30 = sld [smem:[#allocation36_spill]]  ;;  %s713_s19 = scalar_lea.sflag [#allocation8], %s712_s2 }
  0xdb   : > { %s6550_s8 = sand.u32 1, %s8027_s15  }
  0xdc   : > { %p8029_p10 = scmp.ne.s32.totalorder %s8028_s30, 0 }
  0xde   : > { %6078 = dma.done.wait (%p8029_p10), %s713_s19, 3088  }
  0xdf   : > { %6080 = vsyncadd (%p8029_p10), %s713_s19, 4294964208  ;;  %s5237_s16 = smul.u32 192, %s6550_s8  ;;  %s4657_s14 = sshll.u32 %s6550_s8, 6 }
  0xe0   : > { %s730_s7 = scalar_lea.sflag [#allocation11], %s712_s2  ;;  %s6561_s21 = scalar_lea.vmem [#allocation10], %s4657_s14 }
  0xe1   : > { %s6559_s11 = scalar_lea.vmem [#allocation9], %s5237_s16 }
  0xe2   : > { %6082 = dma.done.wait (%p8029_p10), %s730_s7, 1040  }
  0xe3   : > { %6084 = vsyncadd (%p8029_p10), %s730_s7, 4294966256  ;;  %s747_s22 = scalar_lea.sflag [#allocation14], %s712_s2 }
  0xe4   : > { %6086 = dma.done.wait (%p8029_p10), %s747_s22, 4112  }
  0xe5   : > { %6088 = vsyncadd (%p8029_p10), %s747_s22, 4294963184  ;;  %s4658_s12 = sshll.u32 %s6550_s8, 8  ;;  %s764_s5 = scalar_lea.sflag [#allocation17], %s712_s2 }
  0xe6   : > { %s6574_s10 = scalar_lea.vmem [#allocation15], %s4658_s12  ;;  %s6576_s20 = scalar_lea.vmem [#allocation16], %s4658_s12 }
  0xe7   : > { %6090 = dma.done.wait (%p8029_p10), %s764_s5, 4096  }
  0xe8   : > { %6092 = vsyncadd (%p8029_p10), %s764_s5, 4294963200  ;;  %p8030_p4 = scmp.eq.s32.totalorder %s6309_s17, 0 }
  0xea   : > { %6094 = dma.done.wait (%p8030_p4), [#allocation17], 4096   ;;  %p8031_p2 = pmov %p8030_p4 }
  0xeb   : > { %s8032_s4 = sld [smem:[#allocation31_spill]]  ;;  %s4661_s1 = sshll.u32 %s6538_s18, 7 }
  0xec   : > { %6096 = vsyncadd (%p8031_p2), [#allocation17], 4294963200  ;;  %s8033_s16 = sld [smem:[#allocation52_spill]]  ;;  %s6609_s26 = scalar_lea.vmem [#allocation19], %s4661_s1 }
  0xed   : > { %s8034_s22 = sld [smem:[#allocation55_spill]] }
  0xee   : > { %s8035_s13 = sld [smem:[#allocation61_spill]] }
  0xef   : > { %s8036_s29 = sld [smem:[#allocation59_spill]] }
  0xf1   : > { %p865_p5 = scmp.lt.s32.totalorder %s8032_s4, 1  ;;  %p4663_p0 = scmp.ne.s32.totalorder %s8032_s4, 0 }
  0xf3   : > { %s6589_s15 = scalar_select %p865_p5, %s8032_s4, 1 }
  0xf4   : > { %882 = sbr.rel (%p4663_p0) target bundleno = 254 (0xfe), region = 124 }
  0xf5   : > { %s867_s30 = scalar_lea.vmem %s8033_s16, %s6589_s15  ;;  %s870_s17 = scalar_lea.vmem %s8034_s22, %s6589_s15 }
  0xf6   : > { %s4662_s12 = sshll.u32 %s6589_s15, 2  ;;  %s877_s28 = scalar_lea.vmem %s8035_s13, %s6589_s15 }
  0xf7   : > { %s6607_s24 = scalar_lea.vmem %s8036_s29, %s4662_s12 }
  0xf9   : > { %v883_v0 = vld [vmem:[%s6542_s9] sm:$0xff]  ;;  %v884_v1 = vld [vmem:[%s6542_s9 + $0x8] sm:$0xff]  ;;  %v885_v2 = vld [vmem:[%s6542_s9 + $0x10] sm:$0xff] }
  0xfa   : > { %891 = vst [vmem:[#allocation2 + $0x30] sm:$0xff] %v883_v0  ;;  %892 = vst [vmem:[#allocation2] sm:$0xff] %v884_v1  ;;  %v886_v3 = vld [vmem:[%s6542_s9 + $0x18] sm:$0xff]  ;;  %v887_v4 = vld [vmem:[%s6542_s9 + $0x20] sm:$0xff] }
  0xfb   : > { %893 = vst [vmem:[#allocation2 + $0x18] sm:$0xff] %v885_v2  ;;  %v888_v5 = vld [vmem:[%s6542_s9 + $0x28] sm:$0xff]  ;;  %894 = vst [vmem:[#allocation2 + $0x10] sm:$0xff] %v886_v3  ;;  %v889_v6 = vld [vmem:[%s6542_s9 + $0x30] sm:$0xff] }
  0xfc   : > { %895 = vst [vmem:[#allocation2 + $0x8] sm:$0xff] %v887_v4  ;;  %896 = vst [vmem:[#allocation2 + $0x20] sm:$0xff] %v888_v5  ;;  %v890_v7 = vld [vmem:[%s6542_s9 + $0x38] sm:$0xff] }
  0xfd   : > { %897 = vst [vmem:[#allocation2 + $0x28] sm:$0xff] %v889_v6  ;;  %898 = vst [vmem:[#allocation2 + $0x38] sm:$0xff] %v890_v7 }
  0xfe PF: > { %v5401_v16 = vld [vmem:[%s6559_s11 + $0xac] ss:$12 sps:$4 sm:$0xff]   ;;  %v5403_v17 = vld [vmem:[%s6559_s11 + $0xa8] ss:$12 sps:$4 sm:$0xff]   ;;  %v5406_v50 = vld [vmem:[%s6559_s11 + $0xb0] ss:$12 sps:$4 sm:$0xff]  }
  0xff   : > { %1209 = vmatprep.subr.bf16.mxu0 %v5401_v16  ;;  %v5404_v49 = vld [vmem:[%s6559_s11 + $0x94] ss:$12 sps:$4 sm:$0xff]   ;;  %v5407_v51 = vld [vmem:[%s6559_s11 + $0x90] ss:$12 sps:$4 sm:$0xff]   ;;  %5043 = vmatprep.subr.bf16.mxu1 %v5406_v50  ;;  %v5410_v54 = vld [vmem:[%s6559_s11 + $0x98] ss:$12 sps:$4 sm:$0xff]  }
 0x100   : > { %1210 = vmatpush1.bf16.msra.mxu0 %v5403_v17  ;;  %5044 = vmatpush3.bf16.msra.mxu1 %v5406_v50  ;;  %v5408_v53 = vld [vmem:[%s6559_s11 + $0x7c] ss:$12 sps:$4 sm:$0xff]   ;;  %v5411_v55 = vld [vmem:[%s6559_s11 + $0x78] ss:$12 sps:$4 sm:$0xff]   ;;  %v5414_v57 = vld [vmem:[%s6559_s11 + $0x80] ss:$12 sps:$4 sm:$0xff]  }
 0x101   : > { %v899_v8 = vld [vmem:[#allocation2 + $0x30] sm:$0xff]  ;;  %v900_v10 = vld [vmem:[#allocation2] sm:$0xff]  ;;  %1211 = vmatprep.subr.bf16.mxu0 %v5404_v49  ;;  %5045 = vmatprep.subr.bf16.mxu1 %v5410_v54  ;;  %v7961_v6 = vmov 0   ;;  %s8037_s3 = scalar_lea.vmem [#allocation7], %s6550_s8  ;;  %vm1359_vm0 = vcmask 261120   ;;  %vm1457_vm2 = vcmask 523264  }
 0x102   : > { %v901_v9 = vld [vmem:[#allocation2 + $0x18] sm:$0xff]  ;;  %928 = vadd.xlane.f32.xlu0 %v899_v8  ;;  %v902_v11 = vld [vmem:[#allocation2 + $0x10] sm:$0xff]  ;;  %1241 = vmatprep.mubr.bf16.mxu0 %v7961_v6  ;;  %s6164_s13 = smov 64   ;;  %s6165_s27 = smov 32   ;;  %vm1973_vm10 = vcmask 523520   ;;  %vm2308_vm11 = vcmask 785920  }
 0x103   : > { %932 = vadd.xlane.f32.xlu1 %v901_v9  ;;  %v903_v12 = vld [vmem:[#allocation2 + $0x8] sm:$0xff]  ;;  %v904_v13 = vld [vmem:[#allocation2 + $0x20] sm:$0xff]  ;;  %vm2643_vm12 = vcmask 1048320   ;;  %s8056_s2 = scalar_lea.vmem [#allocation13], %s6550_s8 }
 0x104   : > { %v905_v14 = vld [vmem:[#allocation2 + $0x28] sm:$0xff]  ;;  %v906_v15 = vld [vmem:[#allocation2 + $0x38] sm:$0xff]  ;;  %1212 = vmatpush1.bf16.msra.mxu0 %v5407_v51  ;;  %5046 = vmatpush3.bf16.msra.mxu1 %v5410_v54 }
 0x105   : > { %1213 = vmatprep.subr.bf16.mxu0 %v5408_v53  ;;  %v5412_v56 = vld [vmem:[%s6559_s11 + $0x64] ss:$12 sps:$4 sm:$0xff]   ;;  %v5415_v58 = vld [vmem:[%s6559_s11 + $0x60] ss:$12 sps:$4 sm:$0xff]   ;;  %5047 = vmatprep.subr.bf16.mxu1 %v5414_v57  ;;  %v5418_v60 = vld [vmem:[%s6559_s11 + $0x68] ss:$12 sps:$4 sm:$0xff]  }
 0x106   : > { %930 = vadd.xlane.f32.xlu0 %v900_v10  ;;  %v5416_v59 = vld [vmem:[%s6559_s11 + $0x4c] ss:$12 sps:$4 sm:$0xff]   ;;  %v5419_v61 = vld [vmem:[%s6559_s11 + $0x48] ss:$12 sps:$4 sm:$0xff]   ;;  %v5422_v63 = vld [vmem:[%s6559_s11 + $0x50] ss:$12 sps:$4 sm:$0xff]  }
 0x107   : > { %934 = vadd.xlane.f32.xlu1 %v902_v11  ;;  %v5420_v62 = vld [vmem:[%s6559_s11 + $0x34] ss:$12 sps:$4 sm:$0xff]   ;;  %v5423_v0 = vld [vmem:[%s6559_s11 + $0x30] ss:$12 sps:$4 sm:$0xff]   ;;  %v5426_v2 = vld [vmem:[%s6559_s11 + $0x38] ss:$12 sps:$4 sm:$0xff]  }
 0x108   : > { %1214 = vmatpush1.bf16.msra.mxu0 %v5411_v55  ;;  %5048 = vmatpush3.bf16.msra.mxu1 %v5414_v57  ;;  %v5424_v1 = vld [vmem:[%s6559_s11 + $0x1c] ss:$12 sps:$4 sm:$0xff]   ;;  %v5427_v3 = vld [vmem:[%s6559_s11 + $0x18] ss:$12 sps:$4 sm:$0xff]   ;;  %v5430_v5 = vld [vmem:[%s6559_s11 + $0x20] ss:$12 sps:$4 sm:$0xff]  }
 0x109   : > { %1215 = vmatprep.subr.bf16.mxu0 %v5412_v56  ;;  %5049 = vmatprep.subr.bf16.mxu1 %v5418_v60  ;;  %v5428_v4 = vld [vmem:[%s6559_s11 + $0x4] ss:$12 sps:$4 sm:$0xff]   ;;  %v5431_v7 = vld [vmem:[%s6559_s11] ss:$12 sps:$4 sm:$0xff]  }
 0x10a   : > { %936 = vadd.xlane.f32.xlu0 %v903_v12 }
 0x10b   : > { %938 = vadd.xlane.f32.xlu1 %v904_v13 }
 0x10c   : > { %1216 = vmatpush1.bf16.msra.mxu0 %v5415_v58  ;;  %5050 = vmatpush3.bf16.msra.mxu1 %v5418_v60 }
 0x10d   : > { %1217 = vmatprep.subr.bf16.mxu0 %v5416_v59  ;;  %5051 = vmatprep.subr.bf16.mxu1 %v5422_v63 }
 0x10e   : > { %940 = vadd.xlane.f32.xlu0 %v905_v14 }
 0x10f   : > { %942 = vadd.xlane.f32.xlu1 %v906_v15 }
 0x110   : > { %1218 = vmatpush1.bf16.msra.mxu0 %v5419_v61  ;;  %5052 = vmatpush3.bf16.msra.mxu1 %v5422_v63 }
 0x111   : > { %1219 = vmatprep.subr.bf16.mxu0 %v5420_v62  ;;  %5053 = vmatprep.subr.bf16.mxu1 %v5426_v2 }
 0x114   : > { %1220 = vmatpush1.bf16.msra.mxu0 %v5423_v0  ;;  %5054 = vmatpush3.bf16.msra.mxu1 %v5426_v2 }
 0x115   : > { %1221 = vmatprep.subr.bf16.mxu0 %v5424_v1  ;;  %5055 = vmatprep.subr.bf16.mxu1 %v5430_v5 }
 0x118   : > { %1222 = vmatpush1.bf16.msra.mxu0 %v5427_v3  ;;  %5056 = vmatpush3.bf16.msra.mxu1 %v5430_v5 }
 0x119   : > { %1223 = vmatprep.subr.bf16.mxu0 %v5428_v4 }
 0x11c   : > { %1224 = vmatpush1.bf16.msra.mxu0 %v5431_v7 }
 0x18b   : > { %v929_v18 = vpop.xlane.xlu0 %928 }
 0x18c   : > { %v933_v19 = vpop.xlane.xlu1 %932  ;;  %v945_v20 = vmul.f32 0.0078125, %v929_v18 }
 0x18d   : > { %v947_v21 = vmul.f32 0.0078125, %v933_v19 }
 0x18e   : > { %v6622_v22 = vsub.f32 %v899_v8, %v945_v20  ;;  %v5432_v8 = vld [vmem:[%s6559_s11 + $0x8] ss:$12 sps:$4 sm:$0xff]   ;;  %s6163_s11 = smov 96  }
 0x18f   : > { %v6624_v23 = vsub.f32 %v901_v9, %v947_v21  ;;  %v931_v24 = vpop.xlane.xlu0 %930  ;;  %5057 = vmatprep.subr.bf16.mxu1 %v5432_v8 }
 0x190   : > { %v935_v25 = vpop.xlane.xlu1 %934  ;;  %v946_v26 = vmul.f32 0.0078125, %v931_v24  ;;  %v961_v27 = vmul.f32 %v6622_v22, %v6622_v22  ;;  %5058 = vmatpush3.bf16.msra.mxu1 %v5432_v8 }
 0x191   : > { %v948_v28 = vmul.f32 0.0078125, %v935_v25  ;;  %v963_v29 = vmul.f32 %v6624_v23, %v6624_v23 }
 0x192   : > { %969 = vadd.xlane.f32.xlu0 %v961_v27  ;;  %v6630_v30 = vsub.f32 %v900_v10, %v946_v26 }
 0x193   : > { %v6632_v31 = vsub.f32 %v902_v11, %v948_v28  ;;  %v937_v32 = vpop.xlane.xlu0 %936 }
 0x194   : > { %v939_v33 = vpop.xlane.xlu1 %938  ;;  %v949_v34 = vmul.f32 0.0078125, %v937_v32  ;;  %v962_v35 = vmul.f32 %v6630_v30, %v6630_v30 }
 0x195   : > { %v950_v36 = vmul.f32 0.0078125, %v939_v33  ;;  %v964_v37 = vmul.f32 %v6632_v31, %v6632_v31 }
 0x196   : > { %973 = vadd.xlane.f32.xlu0 %v963_v29  ;;  %971 = vadd.xlane.f32.xlu1 %v962_v35  ;;  %v6638_v38 = vsub.f32 %v903_v12, %v949_v34 }
 0x197   : > { %v6640_v39 = vsub.f32 %v904_v13, %v950_v36  ;;  %v941_v40 = vpop.xlane.xlu0 %940 }
 0x198   : > { %v943_v41 = vpop.xlane.xlu1 %942  ;;  %v951_v42 = vmul.f32 0.0078125, %v941_v40  ;;  %v965_v43 = vmul.f32 %v6638_v38, %v6638_v38 }
 0x199   : > { %v952_v44 = vmul.f32 0.0078125, %v943_v41  ;;  %v966_v45 = vmul.f32 %v6640_v39, %v6640_v39  ;;  %v4664_v41 = vld [vmem:[%s8037_s3] ss:$0 sm:$0xff] }
 0x19a   : > { %975 = vadd.xlane.f32.xlu1 %v964_v37  ;;  %977 = vadd.xlane.f32.xlu0 %v965_v43  ;;  %v6646_v46 = vsub.f32 %v905_v14, %v951_v42 }
 0x19b   : > { %v6648_v47 = vsub.f32 %v906_v15, %v952_v44 }
 0x19c   : > { %v967_v48 = vmul.f32 %v6646_v46, %v6646_v46 }
 0x19d   : > { %v968_v52 = vmul.f32 %v6648_v47, %v6648_v47 }
 0x19e   : > { %979 = vadd.xlane.f32.xlu1 %v966_v45  ;;  %981 = vadd.xlane.f32.xlu0 %v967_v48  ;;  %v4665_v48 = vld [vmem:[%s867_s30] ss:$0 sm:$0xff] }
 0x1a2   : > { %983 = vadd.xlane.f32.xlu1 %v968_v52 }
 0x21b   : > { %v970_v9 = vpop.xlane.xlu0 %969 }
 0x21c   : > { %v985_v10 = vmul.f32 0.0078125, %v970_v9 }
 0x21e   : > { %v993_v11 = vadd.f32 1e-05, %v985_v10 }
 0x21f   : > { %v972_v12 = vpop.xlane.xlu1 %971  ;;  %v974_v13 = vpop.xlane.xlu0 %973 }
 0x220   : > { %5521 = vrsqrt.f32 %v993_v11  ;;  %v986_v14 = vmul.f32 0.0078125, %v972_v12  ;;  %v987_v15 = vmul.f32 0.0078125, %v974_v13 }
 0x222   : > { %v994_v16 = vadd.f32 1e-05, %v986_v14  ;;  %v995_v17 = vadd.f32 1e-05, %v987_v15 }
 0x223   : > { %v976_v18 = vpop.xlane.xlu1 %975  ;;  %v978_v19 = vpop.xlane.xlu0 %977 }
 0x224   : > { %5523 = vrsqrt.f32 %v994_v16  ;;  %v988_v20 = vmul.f32 0.0078125, %v976_v18  ;;  %v989_v21 = vmul.f32 0.0078125, %v978_v19 }
 0x225   : > { %5525 = vrsqrt.f32 %v995_v17 }
 0x226   : > { %v996_v24 = vadd.f32 1e-05, %v988_v20  ;;  %v997_v25 = vadd.f32 1e-05, %v989_v21 }
 0x227   : > { %v980_v26 = vpop.xlane.xlu1 %979  ;;  %v982_v27 = vpop.xlane.xlu0 %981 }
 0x228   : > { %5527 = vrsqrt.f32 %v996_v24  ;;  %v990_v28 = vmul.f32 0.0078125, %v980_v26  ;;  %v991_v29 = vmul.f32 0.0078125, %v982_v27 }
 0x229   : > { %5529 = vrsqrt.f32 %v997_v25 }
 0x22a   : > { %v998_v32 = vadd.f32 1e-05, %v990_v28  ;;  %v999_v33 = vadd.f32 1e-05, %v991_v29 }
 0x22b   : > { %v984_v34 = vpop.xlane.xlu1 %983 }
 0x22c   : > { %5531 = vrsqrt.f32 %v998_v32  ;;  %v992_v35 = vmul.f32 0.0078125, %v984_v34 }
 0x22d   : > { %v5522_v36 = vpop.eup %5521  ;;  %5533 = vrsqrt.f32 %v999_v33 }
 0x22e   : > { %v1000_v37 = vadd.f32 1e-05, %v992_v35  ;;  %v1009_v40 = vmul.f32 %v5522_v36, %v6622_v22 }
 0x230   : > { %5535 = vrsqrt.f32 %v1000_v37  ;;  %v1023_v45 = vmul.f32 %v4664_v41, %v1009_v40 }
 0x231   : > { %v5524_v42 = vpop.eup %5523 }
 0x232   : > { %v5526_v43 = vpop.eup %5525  ;;  %v1010_v44 = vmul.f32 %v5524_v42, %v6630_v30  ;;  %v1037_v22 = vadd.f32 %v4665_v48, %v1023_v45 }
 0x233   : > { %v1011_v49 = vmul.f32 %v5526_v43, %v6624_v23 }
 0x234   : > { %v1024_v50 = vmul.f32 %v4664_v41, %v1010_v44 }
 0x235   : > { %v5528_v51 = vpop.eup %5527  ;;  %v1025_v52 = vmul.f32 %v4664_v41, %v1011_v49 }
 0x236   : > { %v5530_v53 = vpop.eup %5529  ;;  %v1038_v54 = vadd.f32 %v4665_v48, %v1024_v50  ;;  %v1012_v55 = vmul.f32 %v5528_v51, %v6632_v31 }
 0x237   : > { %v1013_v56 = vmul.f32 %v5530_v53, %v6638_v38  ;;  %v1039_v59 = vadd.f32 %v4665_v48, %v1025_v52 }
 0x238   : > { %v1045_v57 = vpack.c.bf16 %v1038_v54, %v1037_v22  ;;  %v1026_v30 = vmul.f32 %v4664_v41, %v1012_v55  ;;  %v907_v55 = vlaneseq }
 0x239   : > { %v5532_v58 = vpop.eup %5531  ;;  %v1027_v62 = vmul.f32 %v4664_v41, %v1013_v56 }
 0x23a   : > { %v5534_v60 = vpop.eup %5533  ;;  %1242 = vmatmul.mubr.bf16.vlgmr.msra.gmra.mxu0 %v1045_v57  ;;  %5059 = vmatprep.mubr.bf16.mxu1 %v1045_v57  ;;  %v1040_v61 = vadd.f32 %v4665_v48, %v1026_v30  ;;  %v1014_v23 = vmul.f32 %v5532_v58, %v6640_v39  ;;  %v6751_v56 = vshrl.u32 %v907_v55, 7  ;;  %v6756_v30 = vand.u32 127, %v907_v55 }
 0x23b   : > { %1251 = vmatprep.mubr.bf16.mxu0 %v7961_v6  ;;  %v1015_v63 = vmul.f32 %v5534_v60, %v6646_v46  ;;  %v1041_v38 = vadd.f32 %v4665_v48, %v1027_v62 }
 0x23c   : > { %v1046_v0 = vpack.c.bf16 %v1040_v61, %v1039_v59  ;;  %v1028_v1 = vmul.f32 %v4664_v41, %v1014_v23  ;;  %v6754_v57 = vadd.s32 16, %v6751_v56  ;;  %v6761_v58 = vadd.s32 24, %v6751_v56 }
 0x23d   : > { %v5536_v31 = vpop.eup %5535  ;;  %v1029_v4 = vmul.f32 %v4664_v41, %v1015_v63  ;;  %vm918_vm3 = vcmp.ge.s32.totalorder %v6751_v56, %v6756_v30  ;;  %v6766_v60 = vadd.s32 8, %v6751_v56  ;;  %v6778_v63 = vadd.s32 48, %v6751_v56 }
 0x23e   : > { %5060 = vmatmul.mubr.bf16.vlgmr.msra.gmra.mxu1 %v1046_v0  ;;  %v1042_v2 = vadd.f32 %v4665_v48, %v1028_v1  ;;  %v1016_v3 = vmul.f32 %v5536_v31, %v6648_v47  ;;  %vm920_vm1 = vcmp.ge.s32.totalorder %v6754_v57, %v6756_v30  ;;  %vm921_vm4 = vcmp.ge.s32.totalorder %v6761_v58, %v6756_v30 }
 0x23f   : > { %v1043_v8 = vadd.f32 %v4665_v48, %v1029_v4  ;;  %vm919_vm5 = vcmp.ge.s32.totalorder %v6766_v60, %v6756_v30  ;;  %v6788_v31 = vadd.s32 32, %v6751_v56  ;;  %vm924_vm6 = vcmp.ge.s32.totalorder %v6778_v63, %v6756_v30 }
 0x240   : > { %v1047_v5 = vpack.c.bf16 %v1042_v2, %v1041_v38  ;;  %v1030_v7 = vmul.f32 %v4664_v41, %v1016_v3 }
 0x241   : > { %vm922_vm7 = vcmp.ge.s32.totalorder %v6788_v31, %v6756_v30 }
 0x242   : > { %1252 = vmatmul.mubr.bf16.gmra.mxu0 %v1046_v0  ;;  %5063 = vmatprep.mubr.bf16.mxu1 %v1047_v5  ;;  %v1044_v39 = vadd.f32 %v4665_v48, %v1030_v7 }
 0x243   : > { %1261 = vmatprep.mubr.bf16.mxu0 %v7961_v6 }
 0x244   : > { %v1048_v9 = vpack.c.bf16 %v1044_v39, %v1043_v8 }
 0x246   : > { %5064 = vmatmul.mubr.bf16.gmra.mxu1 %v1048_v9 }
 0x24a   : > { %1262 = vmatmul.mubr.bf16.gmra.mxu0 %v1047_v5 }
 0x24b   : > { %1271 = vmatprep.mubr.bf16.mxu0 %v7961_v6 }
 0x252   : > { %1272 = vmatmul.mubr.bf16.gmra.mxu0 %v1048_v9 }
 0x2fa   : > { %v1243_v46 = vpop.f32.mrf.mxu0 }
 0x2fc   : > { %v1245_v10 = vpop.f32.mrf.mxu0 }
 0x2fe   : > { %v1247_v11 = vpop.f32.mrf.mxu0  ;;  %v5061_v12 = vpop.f32.mrf.mxu1 }
 0x2ff   : > { %v6695_v47 = vpack.c.bf16 %v1247_v11, %v1243_v46 }
 0x300   : > { %v1249_v13 = vpop.f32.mrf.mxu0  ;;  %v1316_v14 = vpop.f32.mrf.mxu1 }
 0x301   : > { %5075 = vmatprep.mubr.msk.bf16.mxu0 %vm1359_vm0, %v6695_v47  ;;  %v6731_v50 = vpack.c.bf16 %v1249_v13, %v1245_v10 }
 0x302   : > { %v1253_v15 = vpop.f32.mrf.mxu0  ;;  %v5062_v16 = vpop.f32.mrf.mxu1 }
 0x303   : > { %v6706_v35 = vpack.c.bf16 %v5062_v16, %v5061_v12  ;;  %v1373_v52 = vsel %vm1359_vm0, %v6731_v50, 0  ;;  %v6840_v12 = vadd.s32 56, %v6751_v56 }
 0x304   : > { %v1255_v17 = vpop.f32.mrf.mxu0  ;;  %v1319_v18 = vpop.f32.mrf.mxu1 }
 0x305   : > { %v6710_v40 = vpack.c.bf16 %v1319_v18, %v1316_v14  ;;  %vm925_vm8 = vcmp.ge.s32.totalorder %v6840_v12, %v6756_v30  ;;  %v6847_v14 = vadd.s32 40, %v6751_v56 }
 0x306   : > { %v1257_v19 = vpop.f32.mrf.mxu0  ;;  %v5065_v20 = vpop.f32.mrf.mxu1 }
 0x307   : > { %v6739_v53 = vpack.c.bf16 %v1257_v19, %v1253_v15  ;;  %vm923_vm9 = vcmp.ge.s32.totalorder %v6847_v14, %v6756_v30 }
 0x308   : > { %v1259_v21 = vpop.f32.mrf.mxu0  ;;  %v1332_v24 = vpop.f32.mrf.mxu1 }
 0x309   : > { %v6725_v48 = vpack.c.bf16 %v1259_v21, %v1255_v17 }
 0x30a   : > { %v1263_v25 = vpop.f32.mrf.mxu0  ;;  %v5066_v26 = vpop.f32.mrf.mxu1 }
 0x30b   : > { %v6699_v27 = vpack.c.bf16 %v5066_v26, %v5065_v20  ;;  %v1376_v51 = vsel %vm1359_vm0, %v6725_v48, 0 }
 0x30c   : > { %v1265_v28 = vpop.f32.mrf.mxu0  ;;  %v1335_v29 = vpop.f32.mrf.mxu1 }
 0x30d   : > { %v6701_v32 = vpack.c.bf16 %v1335_v29, %v1332_v24  ;;  %5083 = vmatprep.subr.bf16.mxu1 %v6699_v27 }
 0x30e   : > { %v1267_v33 = vpop.f32.mrf.mxu0  ;;  %5084 = vmatpush3.bf16.msra.mxu1 %v6699_v27 }
 0x30f   : > { %5085 = vmatprep.subr.bf16.mxu1 %v6701_v32  ;;  %v6741_v22 = vpack.c.bf16 %v1267_v33, %v1263_v25 }
 0x310   : > { %v1269_v34 = vpop.f32.mrf.mxu0 }
 0x311   : > { %v6717_v44 = vpack.c.bf16 %v1269_v34, %v1265_v28 }
 0x312   : > { %v1273_v36 = vpop.f32.mrf.mxu0  ;;  %5086 = vmatpush3.bf16.msra.mxu1 %v6701_v32 }
 0x313   : > { %5087 = vmatprep.subr.bf16.mxu1 %v6706_v35  ;;  %v1379_v49 = vsel %vm1359_vm0, %v6717_v44, 0 }
 0x314   : > { %v1275_v37 = vpop.f32.mrf.mxu0 }
 0x316   : > { %v1277_v41 = vpop.f32.mrf.mxu0  ;;  %5088 = vmatpush3.bf16.msra.mxu1 %v6706_v35 }
 0x317   : > { %5089 = vmatprep.subr.bf16.mxu1 %v6710_v40  ;;  %v6747_v54 = vpack.c.bf16 %v1277_v41, %v1273_v36 }
 0x318   : > { %v1279_v42 = vpop.f32.mrf.mxu0 }
 0x319   : > { %v6714_v43 = vpack.c.bf16 %v1279_v42, %v1275_v37 }
 0x31a   : > { %5090 = vmatpush3.bf16.msra.mxu1 %v6710_v40 }
 0x31b   : > { %5219 = vmatprep.subr.msk.bf16.mxu0 %vm1359_vm0, %v6714_v43  ;;  %v1382_v45 = vsel %vm1359_vm0, %v6714_v43, 0 }
 0x31c   : > { %5068 = vmatpush3.bf16.xpose.msra.mxu0 %v1382_v45 }
 0x31d   : > { %5220 = vmatprep.subr.msk.bf16.mxu0 %vm1359_vm0, %v6717_v44 }
 0x324   : > { %5070 = vmatpush3.bf16.xpose.msra.mxu0 %v1379_v49 }
 0x325   : > { %5221 = vmatprep.subr.msk.bf16.mxu0 %vm1359_vm0, %v6725_v48 }
 0x32c   : > { %5072 = vmatpush3.bf16.xpose.msra.mxu0 %v1376_v51 }
 0x32d   : > { %5222 = vmatprep.subr.msk.bf16.mxu0 %vm1359_vm0, %v6731_v50 }
 0x334   : > { %5074 = vmatpush3.bf16.xpose.msra.mxu0 %v1373_v52 }
 0x33b   : > { %5076 = vmatmul.mubr.msk.bf16.vlgmr.msra.gmra.mxu0 %vm1359_vm0, %v6739_v53 }
 0x33c   : > { %5079 = vmatprep.mubr.msk.bf16.mxu0 %vm1359_vm0, %v6741_v22 }
 0x343   : > { %5080 = vmatmul.mubr.msk.bf16.gmra.mxu0 %vm1359_vm0, %v6747_v54 }
 0x3fb   : > { %v5077_v59 = vpop.f32.mrf.mxu0 }
 0x3fc   : > { %v6771_v61 = vsel %vm920_vm1, %v5077_v59, -1e+30 }
 0x3fd   : > { %v1418_v23 = vpop.f32.mrf.mxu0  ;;  %v1464_v62 = vsel %vm1457_vm2, %v6771_v61, -inf }
 0x3fe   : > { %v6783_v0 = vsel %vm918_vm3, %v1418_v23, -1e+30  ;;  %1465 = vmax.xlane.f32.xlu0 %v1464_v62 }
 0x3ff   : > { %v5078_v1 = vpop.f32.mrf.mxu0  ;;  %v1458_v3 = vsel %vm1457_vm2, %v6783_v0, -inf }
 0x400   : > { %v1452_v38 = vsel %vm921_vm4, %v5078_v1, -1e+30 }
 0x401   : > { %v1421_v2 = vpop.f32.mrf.mxu0  ;;  %v1467_v4 = vsel %vm1457_vm2, %v1452_v38, -inf }
 0x402   : > { %v6801_v5 = vsel %vm919_vm5, %v1421_v2, -1e+30  ;;  %1459 = vmax.xlane.f32.xlu0 %v1458_v3  ;;  %1468 = vmax.xlane.f32.xlu1 %v1467_v4 }
 0x403   : > { %v5081_v7 = vpop.f32.mrf.mxu0  ;;  %v1461_v9 = vsel %vm1457_vm2, %v6801_v5, -inf }
 0x404   : > { %v6808_v8 = vsel %vm924_vm6, %v5081_v7, -1e+30 }
 0x405   : > { %v1434_v39 = vpop.f32.mrf.mxu0  ;;  %v1476_v46 = vsel %vm1457_vm2, %v6808_v8, -inf }
 0x406   : > { %v6817_v10 = vsel %vm922_vm7, %v1434_v39, -1e+30  ;;  %1462 = vmax.xlane.f32.xlu1 %v1461_v9  ;;  %1477 = vmax.xlane.f32.xlu0 %v1476_v46 }
 0x407   : > { %v1470_v11 = vsel %vm1457_vm2, %v6817_v10, -inf  ;;  %v5082_v13 = vpop.f32.mrf.mxu0 }
 0x408   : > { %v6854_v15 = vsel %vm925_vm8, %v5082_v13, -1e+30 }
 0x409   : > { %v1437_v16 = vpop.f32.mrf.mxu0  ;;  %v1479_v17 = vsel %vm1457_vm2, %v6854_v15, -inf }
 0x40a   : > { %1471 = vmax.xlane.f32.xlu0 %v1470_v11  ;;  %v6865_v18 = vsel %vm923_vm9, %v1437_v16, -1e+30 }
 0x40b   : > { %v1473_v19 = vsel %vm1457_vm2, %v6865_v18, -inf }
 0x417   : > { %1655 = vrot.lane.b32.xlu1 %v6717_v44, %s6163_s11 }
 0x41b   : > { %1653 = vrot.lane.b32.xlu1 %v6725_v48, %s6163_s11 }
 0x41f   : > { %1996 = vrot.lane.b32.xlu1 %v6714_v43, %s6164_s13 }
 0x420   : > { %1657 = vrot.lane.b32.xlu0 %v6714_v43, %s6163_s11 }
 0x424   : > { %1651 = vrot.lane.b32.xlu0 %v6731_v50, %s6163_s11 }
 0x428   : > { %1639 = vrot.lane.b32.xlu0 %v6695_v47, %s6163_s11 }
 0x42c   : > { %1992 = vrot.lane.b32.xlu0 %v6725_v48, %s6164_s13 }
 0x430   : > { %1645 = vrot.lane.b32.xlu0 %v6747_v54, %s6163_s11 }
 0x434   : > { %1982 = vrot.lane.b32.xlu0 %v6695_v47, %s6164_s13 }
 0x438   : > { %1986 = vrot.lane.b32.xlu0 %v6741_v22, %s6164_s13 }
 0x43c   : > { %1842 = vrot.lane.b32.xlu0 %v6699_v27, %s6163_s11 }
 0x440   : > { %1838 = vrot.lane.b32.xlu0 %v6706_v35, %s6163_s11 }
 0x443   : > { %1480 = vmax.xlane.f32.xlu1 %v1479_v17 }
 0x444   : > { %1836 = vrot.lane.b32.xlu0 %v6710_v40, %s6163_s11 }
 0x447   : > { %1474 = vmax.xlane.f32.xlu1 %v1473_v19 }
 0x448   : > { %2177 = vrot.lane.b32.xlu0 %v6699_v27, %s6164_s13 }
 0x458   : > { %1994 = vrot.lane.b32.xlu1 %v6717_v44, %s6164_s13 }
 0x45c   : > { %1641 = vrot.lane.b32.xlu1 %v6739_v53, %s6163_s11 }
 0x460   : > { %1643 = vrot.lane.b32.xlu1 %v6741_v22, %s6163_s11 }
 0x464   : > { %1990 = vrot.lane.b32.xlu1 %v6731_v50, %s6164_s13 }
 0x468   : > { %1984 = vrot.lane.b32.xlu1 %v6739_v53, %s6164_s13 }
 0x46c   : > { %1988 = vrot.lane.b32.xlu1 %v6747_v54, %s6164_s13 }
 0x470   : > { %1840 = vrot.lane.b32.xlu1 %v6701_v32, %s6163_s11 }
 0x474   : > { %2175 = vrot.lane.b32.xlu1 %v6701_v32, %s6164_s13 }
 0x487   : > { %v1466_v20 = vpop.xlane.xlu0 %1465 }
 0x488   : > { %v1484_v28 = vsub.f32 %v6771_v61, %v1466_v20 }
 0x48a   : > { %v1494_v41 = vmul.f32 1.442695, %v1484_v28 }
 0x48b   : > { %v1460_v21 = vpop.xlane.xlu0 %1459  ;;  %v1469_v24 = vpop.xlane.xlu1 %1468 }
 0x48c   : > { %v1482_v25 = vsub.f32 %v6783_v0, %v1460_v21  ;;  %v1485_v26 = vsub.f32 %v1452_v38, %v1469_v24 }
 0x48e   : > { %v1490_v29 = vmul.f32 1.442695, %v1482_v25  ;;  %v1496_v33 = vmul.f32 1.442695, %v1485_v26 }
 0x48f   : > { %v1463_v34 = vpop.xlane.xlu1 %1462  ;;  %v1478_v36 = vpop.xlane.xlu0 %1477 }
 0x490   : > { %v1483_v37 = vsub.f32 %v6801_v5, %v1463_v34  ;;  %5537 = vpow2.f32 %v1490_v29  ;;  %v1488_v21 = vsub.f32 %v6808_v8, %v1478_v36 }
 0x491   : > { %5539 = vpow2.f32 %v1496_v33 }
 0x492   : > { %v1492_v42 = vmul.f32 1.442695, %v1483_v37  ;;  %v1502_v29 = vmul.f32 1.442695, %v1488_v21 }
 0x493   : > { %v1656_v45 = vpop.permute.xlu1 %1655  ;;  %v1472_v49 = vpop.xlane.xlu0 %1471 }
 0x494   : > { %5541 = vpow2.f32 %v1492_v42  ;;  %v1678_v9 = vsel %vm1359_vm0, %v1656_v45, 0  ;;  %v1486_v17 = vsub.f32 %v6817_v10, %v1472_v49 }
 0x495   : > { %5543 = vpow2.f32 %v1494_v41 }
 0x496   : > { %v1498_v24 = vmul.f32 1.442695, %v1486_v17 }
 0x497   : > { %v1654_v51 = vpop.permute.xlu1 %1653  ;;  %v1658_v52 = vpop.permute.xlu0 %1657 }
 0x498   : > { %5223 = vmatprep.subr.msk.bf16.mxu1 %vm1359_vm0, %v1658_v52  ;;  %v1681_v5 = vsel %vm1359_vm0, %v1658_v52, 0  ;;  %v1675_v46 = vsel %vm1359_vm0, %v1654_v51, 0  ;;  %5545 = vpow2.f32 %v1498_v24 }
 0x49b   : > { %v1997_v55 = vpop.permute.xlu1 %1996  ;;  %v1652_v59 = vpop.permute.xlu0 %1651 }
 0x49c   : > { %5227 = vmatprep.subr.msk.bf16.mxu0 %vm1359_vm0, %v1997_v55  ;;  %v2020_v61 = vsel %vm1359_vm0, %v1997_v55, 0  ;;  %v1672_v13 = vsel %vm1359_vm0, %v1652_v59, 0 }
 0x49d   : > { %5132 = vmatpush3.bf16.xpose.msra.mxu0 %v2020_v61  ;;  %v6895_v23 = vpop.eup %5537 }
 0x49e   : > { %v6897_v0 = vpop.eup %5539 }
 0x49f   : > { %v1640_v62 = vpop.permute.xlu0 %1639 }
 0x4a1   : > { %v6899_v1 = vpop.eup %5541 }
 0x4a2   : > { %v6901_v38 = vpop.eup %5543  ;;  %v1530_v2 = vpack.c.bf16 %v6899_v1, %v6895_v23 }
 0x4a3   : > { %v1531_v3 = vpack.c.bf16 %v6897_v0, %v6901_v38  ;;  %v1993_v4 = vpop.permute.xlu0 %1992 }
 0x4a4   : > { %5091 = vmatprep.mubr.msk.bf16.mxu1 %vm1457_vm2, %v1530_v2  ;;  %v2014_v36 = vsel %vm1359_vm0, %v1993_v4, 0 }
 0x4a5   : > { %5092 = vmatmul.mubr.msk.bf16.vlgmr.msra.gmra.mxu1 %vm1457_vm2, %v1531_v3 }
 0x4a6   : > { %5100 = vmatpush3.bf16.xpose.msra.mxu1 %v1681_v5 }
 0x4a7   : > { %5224 = vmatprep.subr.msk.bf16.mxu1 %vm1359_vm0, %v1656_v45  ;;  %v6911_v7 = vpop.permute.xlu0 %1645 }
 0x4ab   : > { %v1983_v39 = vpop.permute.xlu0 %1982 }
 0x4ac   : > { %5139 = vmatprep.mubr.msk.bf16.mxu0 %vm1359_vm0, %v1983_v39 }
 0x4ae   : > { %5102 = vmatpush3.bf16.xpose.msra.mxu1 %v1678_v9 }
 0x4af   : > { %5225 = vmatprep.subr.msk.bf16.mxu1 %vm1359_vm0, %v1654_v51  ;;  %v1987_v11 = vpop.permute.xlu0 %1986 }
 0x4b3   : > { %v1843_v16 = vpop.permute.xlu0 %1842 }
 0x4b6   : > { %5104 = vmatpush3.bf16.xpose.msra.mxu1 %v1675_v46 }
 0x4b7   : > { %5226 = vmatprep.subr.msk.bf16.mxu1 %vm1359_vm0, %v1652_v59  ;;  %v1839_v61 = vpop.permute.xlu0 %1838 }
 0x4bb   : > { %v1837_v3 = vpop.permute.xlu0 %1836 }
 0x4be   : > { %5106 = vmatpush3.bf16.xpose.msra.mxu1 %v1672_v13 }
 0x4bf   : > { %5115 = vmatprep.subr.bf16.mxu1 %v1843_v16 }
 0x4cc   : > { %v1481_v19 = vpop.xlane.xlu1 %1480 }
 0x4cd   : > { %v1489_v20 = vsub.f32 %v6854_v15, %v1481_v19 }
 0x4cf   : > { %v1504_v25 = vmul.f32 1.442695, %v1489_v20 }
 0x4d0   : > { %v1475_v26 = vpop.xlane.xlu1 %1474 }
 0x4d1   : > { %v1487_v28 = vsub.f32 %v6865_v18, %v1475_v26  ;;  %5547 = vpow2.f32 %v1504_v25  ;;  %v6927_v18 = vpop.eup %5545 }
 0x4d3   : > { %v1500_v33 = vmul.f32 1.442695, %v1487_v28 }
 0x4d4   : > { %v1995_v34 = vpop.permute.xlu1 %1994 }
 0x4d5   : > { %5549 = vpow2.f32 %v1500_v33  ;;  %5228 = vmatprep.subr.msk.bf16.mxu0 %vm1359_vm0, %v1995_v34  ;;  %v2017_v10 = vsel %vm1359_vm0, %v1995_v34, 0 }
 0x4d6   : > { %5551 = vpow2.f32 %v1502_v29  ;;  %5134 = vmatpush3.bf16.xpose.msra.mxu0 %v2017_v10 }
 0x4d7   : > { %5229 = vmatprep.subr.msk.bf16.mxu0 %vm1359_vm0, %v1993_v4 }
 0x4d8   : > { %v1642_v8 = vpop.permute.xlu1 %1641 }
 0x4dc   : > { %v1644_v15 = vpop.permute.xlu1 %1643 }
 0x4de   : > { %5136 = vmatpush3.bf16.xpose.msra.mxu0 %v2014_v36  ;;  %v6929_v41 = vpop.eup %5547 }
 0x4e0   : > { %v1991_v37 = vpop.permute.xlu1 %1990 }
 0x4e1   : > { %5230 = vmatprep.subr.msk.bf16.mxu0 %vm1359_vm0, %v1991_v37  ;;  %v2011_v55 = vsel %vm1359_vm0, %v1991_v37, 0 }
 0x4e2   : > { %v6932_v42 = vpop.eup %5549 }
 0x4e3   : > { %v6934_v45 = vpop.eup %5551  ;;  %v1532_v49 = vpack.c.bf16 %v6932_v42, %v6927_v18 }
 0x4e4   : > { %v1985_v51 = vpop.permute.xlu1 %1984  ;;  %v1533_v52 = vpack.c.bf16 %v6929_v41, %v6934_v45 }
 0x4e5   : > { %5095 = vmatprep.mubr.msk.bf16.mxu1 %vm1457_vm2, %v1532_v49 }
 0x4e6   : > { %5096 = vmatmul.mubr.msk.bf16.gmra.mxu1 %vm1457_vm2, %v1533_v52  ;;  %5138 = vmatpush3.bf16.xpose.msra.mxu0 %v2011_v55 }
 0x4e7   : > { %5107 = vmatprep.mubr.msk.bf16.mxu1 %vm1359_vm0, %v1640_v62  ;;  %v6951_v62 = vpop.permute.xlu0 %2177 }
 0x4e8   : > { %v1989_v59 = vpop.permute.xlu1 %1988 }
 0x4ec   : > { %v1841_v2 = vpop.permute.xlu1 %1840 }
 0x4ed   : > { %5140 = vmatmul.mubr.msk.bf16.vlgmr.msra.gmra.mxu0 %vm1359_vm0, %v1985_v51 }
 0x4ee   : > { %5108 = vmatmul.mubr.msk.bf16.vlgmr.msra.gmra.mxu1 %vm1359_vm0, %v1642_v8  ;;  %5143 = vmatprep.mubr.msk.bf16.mxu0 %vm1359_vm0, %v1987_v11 }
 0x4ef   : > { %5116 = vmatpush3.bf16.msra.mxu1 %v1843_v16  ;;  %5111 = vmatprep.mubr.msk.bf16.mxu1 %vm1359_vm0, %v1644_v15 }
 0x4f0   : > { %5117 = vmatprep.subr.bf16.mxu1 %v1841_v2 }
 0x4f3   : > { %5118 = vmatpush3.bf16.msra.mxu1 %v1841_v2 }
 0x4f4   : > { %5119 = vmatprep.subr.bf16.mxu1 %v1839_v61 }
 0x4f5   : > { %5144 = vmatmul.mubr.msk.bf16.gmra.mxu0 %vm1359_vm0, %v1989_v59 }
 0x4f6   : > { %5112 = vmatmul.mubr.msk.bf16.gmra.mxu1 %vm1359_vm0, %v6911_v7 }
 0x4f7   : > { %5120 = vmatpush3.bf16.msra.mxu1 %v1839_v61 }
 0x4f8   : > { %5121 = vmatprep.subr.bf16.mxu1 %v1837_v3 }
 0x4fb   : > { %5122 = vmatpush3.bf16.msra.mxu1 %v1837_v3 }
 0x4fc   : > { %5147 = vmatprep.subr.bf16.mxu1 %v6951_v62 }
 0x565   : > { %v6954_v4 = vpop.f32.mrf.mxu1 }
 0x566   : > { %8039 = vst [vmem:[#allocation43_spill] sm:$0xff] %v6954_v4 }
 0x567   : > { %v6956_v5 = vpop.f32.mrf.mxu1 }
 0x568   : > { %8040 = vst [vmem:[#allocation44_spill] sm:$0xff] %v6956_v5 }
 0x569   : > { %v6958_v39 = vpop.f32.mrf.mxu1 }
 0x56a   : > { %8041 = vst [vmem:[#allocation45_spill] sm:$0xff] %v6958_v39 }
 0x56b   : > { %v6960_v9 = vpop.f32.mrf.mxu1 }
 0x5a6   : > { %v6962_v46 = vpop.f32.mrf.mxu1 }
 0x5a7   : > { %8042 = vst [vmem:[#allocation46_spill] sm:$0xff] %v6962_v46 }
 0x5a8   : > { %v6964_v11 = vpop.f32.mrf.mxu1 }
 0x5a9   : > { %8043 = vst [vmem:[#allocation47_spill] sm:$0xff] %v6964_v11 }
 0x5aa   : > { %v6966_v7 = vpop.f32.mrf.mxu1 }
 0x5ab   : > { %8044 = vst [vmem:[#allocation48_spill] sm:$0xff] %v6966_v7 }
 0x5ac   : > { %v6968_v13 = vpop.f32.mrf.mxu1 }
 0x5ad   : > { %8045 = vst [vmem:[#allocation49_spill] sm:$0xff] %v6968_v13  ;;  %v5141_v16 = vpop.f32.mrf.mxu0 }
 0x5ae   : > { %v6973_v17 = vsel %vm920_vm1, %v5141_v16, -1e+30  ;;  %v5109_v19 = vpop.f32.mrf.mxu1 }
 0x5af   : > { %v2056_v20 = vpop.f32.mrf.mxu0  ;;  %v2101_v21 = vsel %vm1457_vm2, %v6973_v17, -inf  ;;  %v1750_v16 = vsel %vm920_vm1, %v5109_v19, -1e+30 }
 0x5b0   : > { %v6980_v24 = vsel %vm918_vm3, %v2056_v20, -1e+30  ;;  %v1717_v25 = vpop.f32.mrf.mxu1  ;;  %2102 = vmax.xlane.f32.xlu1 %v2101_v21 }
 0x5b1   : > { %v5142_v26 = vpop.f32.mrf.mxu0  ;;  %v2095_v33 = vsel %vm1457_vm2, %v6980_v24, -inf }
 0x5b2   : > { %v5110_v28 = vpop.f32.mrf.mxu1  ;;  %v6987_v34 = vsel %vm921_vm4, %v5142_v26, -1e+30  ;;  %v1762_v26 = vsel %vm1457_vm2, %v1750_v16, -inf }
 0x5b3   : > { %v2059_v29 = vpop.f32.mrf.mxu0  ;;  %v2104_v37 = vsel %vm1457_vm2, %v6987_v34, -inf }
 0x5b4   : > { %2096 = vmax.xlane.f32.xlu1 %v2095_v33  ;;  %v1720_v10 = vpop.f32.mrf.mxu1  ;;  %v7001_v51 = vsel %vm919_vm5, %v2059_v29, -1e+30  ;;  %v1748_v33 = vsel %vm918_vm3, %v1717_v25, -1e+30 }
 0x5b5   : > { %v5145_v8 = vpop.f32.mrf.mxu0  ;;  %v2098_v2 = vsel %vm1457_vm2, %v7001_v51, -inf  ;;  %v1749_v19 = vsel %vm919_vm5, %v1720_v10, -1e+30 }
 0x5b6   : > { %v6992_v15 = vsel %vm924_vm6, %v5145_v8, -1e+30  ;;  %v5113_v55 = vpop.f32.mrf.mxu1 }
 0x5b7   : > { %v2072_v36 = vpop.f32.mrf.mxu0  ;;  %v2113_v49 = vsel %vm1457_vm2, %v6992_v15, -inf }
 0x5b8   : > { %v7006_v52 = vsel %vm922_vm7, %v2072_v36, -1e+30  ;;  %2105 = vmax.xlane.f32.xlu1 %v2104_v37  ;;  %2114 = vmax.xlane.f32.xlu0 %v2113_v49  ;;  %v1733_v21 = vpop.f32.mrf.mxu1  ;;  %v1756_v36 = vsel %vm1457_vm2, %v1748_v33, -inf  ;;  %v1759_v37 = vsel %vm1457_vm2, %v1749_v19, -inf  ;;  %v1751_v49 = vsel %vm921_vm4, %v5110_v28, -1e+30 }
 0x5b9   : > { %v5146_v59 = vpop.f32.mrf.mxu0  ;;  %v2107_v3 = vsel %vm1457_vm2, %v7006_v52, -inf  ;;  %v1765_v10 = vsel %vm1457_vm2, %v1751_v49, -inf }
 0x5ba   : > { %v5114_v8 = vpop.f32.mrf.mxu1 }
 0x5bb   : > { %v2075_v61 = vpop.f32.mrf.mxu0 }
 0x5bc   : > { %v7018_v20 = vsel %vm923_vm9, %v2075_v61, -1e+30  ;;  %2099 = vmax.xlane.f32.xlu1 %v2098_v2  ;;  %2108 = vmax.xlane.f32.xlu0 %v2107_v3  ;;  %v7037_v61 = vsel %vm925_vm8, %v5114_v8, -1e+30  ;;  %v1736_v25 = vpop.f32.mrf.mxu1  ;;  %v1754_v3 = vsel %vm924_vm6, %v5113_v55, -1e+30 }
 0x5bd   : > { %v2110_v29 = vsel %vm1457_vm2, %v7018_v20, -inf  ;;  %v1777_v2 = vsel %vm1457_vm2, %v7037_v61, -inf  ;;  %v1753_v28 = vsel %vm923_vm9, %v1736_v25, -1e+30  ;;  %v1752_v8 = vsel %vm922_vm7, %v1733_v21, -1e+30 }
 0x5be   : > { %v7057_v55 = vsel %vm925_vm8, %v5146_v59, -1e+30 }
 0x5c0   : > { %1763 = vmax.xlane.f32.xlu0 %v1762_v26  ;;  %2111 = vmax.xlane.f32.xlu1 %v2110_v29  ;;  %v1774_v26 = vsel %vm1457_vm2, %v1754_v3, -inf  ;;  %v1771_v29 = vsel %vm1457_vm2, %v1753_v28, -inf }
 0x5c4   : > { %1757 = vmax.xlane.f32.xlu0 %v1756_v36  ;;  %1760 = vmax.xlane.f32.xlu1 %v1759_v37  ;;  %v1768_v36 = vsel %vm1457_vm2, %v1752_v8, -inf  ;;  %v2116_v37 = vsel %vm1457_vm2, %v7057_v55, -inf }
 0x5c8   : > { %1766 = vmax.xlane.f32.xlu0 %v1765_v10  ;;  %1778 = vmax.xlane.f32.xlu1 %v1777_v2 }
 0x5cc   : > { %1775 = vmax.xlane.f32.xlu0 %v1774_v26  ;;  %1772 = vmax.xlane.f32.xlu1 %v1771_v29 }
 0x5d0   : > { %1769 = vmax.xlane.f32.xlu0 %v1768_v36 }
 0x5d4   : > { %2117 = vmax.xlane.f32.xlu0 %v2116_v37 }
 0x5dd   : > { %2171 = vrot.lane.b32.xlu1 %v6710_v40, %s6164_s13 }
 0x5e1   : > { %2331 = vrot.lane.b32.xlu1 %v6714_v43, %s6165_s27  ;;  %v7081_v43 = vpop.permute.xlu1 %2175 }
 0x5e5   : > { %2329 = vrot.lane.b32.xlu1 %v6717_v44, %s6165_s27 }
 0x5e9   : > { %2325 = vrot.lane.b32.xlu1 %v6731_v50, %s6165_s27 }
 0x5ea   : > { %2173 = vrot.lane.b32.xlu0 %v6706_v35, %s6164_s13 }
 0x5ed   : > { %2319 = vrot.lane.b32.xlu1 %v6739_v53, %s6165_s27 }
 0x5ee   : > { %2327 = vrot.lane.b32.xlu0 %v6725_v48, %s6165_s27 }
 0x5f1   : > { %2323 = vrot.lane.b32.xlu1 %v6747_v54, %s6165_s27 }
 0x5f2   : > { %2317 = vrot.lane.b32.xlu0 %v6695_v47, %s6165_s27 }
 0x5f6   : > { %2321 = vrot.lane.b32.xlu0 %v6741_v22, %s6165_s27 }
 0x639   : > { %v2103_v44 = vpop.xlane.xlu1 %2102 }
 0x63d   : > { %v2097_v50 = vpop.xlane.xlu1 %2096 }
 0x641   : > { %v7083_v59 = vpop.xlane.xlu0 %2114  ;;  %v2106_v21 = vpop.xlane.xlu1 %2105 }
 0x645   : > { %v2109_v53 = vpop.xlane.xlu0 %2108  ;;  %v2100_v25 = vpop.xlane.xlu1 %2099 }
 0x649   : > { %v1764_v10 = vpop.xlane.xlu0 %1763  ;;  %v2112_v48 = vpop.xlane.xlu1 %2111 }
 0x64a   : > { %v1782_v2 = vsub.f32 %v1750_v16, %v1764_v10  ;;  %v2120_v16 = vsub.f32 %v7001_v51, %v2100_v25  ;;  %v2119_v10 = vsub.f32 %v6980_v24, %v2097_v50 }
 0x64c   : > { %v1792_v6 = vmul.f32 1.442695, %v1782_v2 }
 0x64d   : > { %v1758_v26 = vpop.xlane.xlu0 %1757  ;;  %v1761_v54 = vpop.xlane.xlu1 %1760 }
 0x64e   : > { %v1780_v29 = vsub.f32 %v1748_v33, %v1758_v26  ;;  %v1781_v36 = vsub.f32 %v1749_v19, %v1761_v54 }
 0x650   : > { %v1788_v47 = vmul.f32 1.442695, %v1780_v29  ;;  %v1790_v37 = vmul.f32 1.442695, %v1781_v36  ;;  %v2129_v29 = vmul.f32 1.442695, %v2120_v16 }
 0x651   : > { %v1767_v22 = vpop.xlane.xlu0 %1766  ;;  %v1779_v7 = vpop.xlane.xlu1 %1778 }
 0x652   : > { %5553 = vpow2.f32 %v1788_v47  ;;  %v1783_v46 = vsub.f32 %v1751_v49, %v1767_v22  ;;  %v1787_v33 = vsub.f32 %v7037_v61, %v1779_v7  ;;  %v2124_v7 = vsub.f32 %v7018_v20, %v2112_v48 }
 0x653   : > { %5555 = vpow2.f32 %v1790_v37 }
 0x654   : > { %v1794_v11 = vmul.f32 1.442695, %v1783_v46  ;;  %5557 = vpow2.f32 %v1792_v6  ;;  %v1802_v49 = vmul.f32 1.442695, %v1787_v33  ;;  %v2127_v6 = vmul.f32 1.442695, %v2119_v10 }
 0x655   : > { %v1776_v4 = vpop.xlane.xlu0 %1775  ;;  %v1773_v13 = vpop.xlane.xlu1 %1772 }
 0x656   : > { %5559 = vpow2.f32 %v1794_v11  ;;  %v1786_v5 = vsub.f32 %v1754_v3, %v1776_v4  ;;  %v1785_v39 = vsub.f32 %v1753_v28, %v1773_v13  ;;  %v2122_v11 = vsub.f32 %v6987_v34, %v2106_v21 }
 0x657   : > { %v2123_v13 = vsub.f32 %v7006_v52, %v2109_v53  ;;  %v2137_v3 = vmul.f32 1.442695, %v2124_v7 }
 0x658   : > { %v1800_v19 = vmul.f32 1.442695, %v1786_v5  ;;  %v1798_v2 = vmul.f32 1.442695, %v1785_v39  ;;  %v2121_v39 = vsub.f32 %v6973_v17, %v2103_v44  ;;  %v2133_v34 = vmul.f32 1.442695, %v2122_v11 }
 0x659   : > { %v1770_v26 = vpop.xlane.xlu0 %1769  ;;  %v2125_v44 = vsub.f32 %v6992_v15, %v7083_v59  ;;  %v2172_v36 = vpop.permute.xlu1 %2171 }
 0x65a   : > { %v1784_v54 = vsub.f32 %v1752_v8, %v1770_v26  ;;  %5561 = vpow2.f32 %v1800_v19  ;;  %v2131_v20 = vmul.f32 1.442695, %v2121_v39  ;;  %v2135_v8 = vmul.f32 1.442695, %v2123_v13 }
 0x65b   : > { %5563 = vpow2.f32 %v1798_v2 }
 0x65c   : > { %v1796_v46 = vmul.f32 1.442695, %v1784_v54 }
 0x65d   : > { %v2118_v28 = vpop.xlane.xlu0 %2117  ;;  %v2332_v16 = vpop.permute.xlu1 %2331 }
 0x65e   : > { %5565 = vpow2.f32 %v1796_v46  ;;  %v2126_v52 = vsub.f32 %v7057_v55, %v2118_v28  ;;  %v2355_v54 = vsel %vm1359_vm0, %v2332_v16, 0 }
 0x65f   : > { %v7089_v4 = vpop.eup %5553  ;;  %5567 = vpow2.f32 %v2129_v29 }
 0x660   : > { %v7092_v5 = vpop.eup %5555  ;;  %5569 = vpow2.f32 %v1802_v49  ;;  %v2141_v53 = vmul.f32 1.442695, %v2126_v52 }
 0x661   : > { %5571 = vpow2.f32 %v2127_v6  ;;  %v1828_v24 = vpack.c.bf16 %v7092_v5, %v7089_v4  ;;  %v7098_v51 = vpop.eup %5557  ;;  %v2174_v55 = vpop.permute.xlu0 %2173 }
 0x662   : > { %5573 = vpow2.f32 %v2133_v34  ;;  %v2330_v29 = vpop.permute.xlu1 %2329  ;;  %v1810_v12 = vsel %vm1457_vm2, %v7098_v51, 0.0 }
 0x663   : > { %v7100_v61 = vpop.eup %5559  ;;  %5123 = vmatprep.mubr.msk.bf16.mxu1 %vm1457_vm2, %v1828_v24  ;;  %5575 = vpow2.f32 %v2137_v3  ;;  %v2352_v7 = vsel %vm1359_vm0, %v2330_v29, 0 }
 0x664   : > { %v1829_v17 = vpack.c.bf16 %v7100_v61, %v7098_v51  ;;  %5577 = vpow2.f32 %v2131_v20 }
 0x665   : > { %5579 = vpow2.f32 %v2135_v8  ;;  %v2328_v49 = vpop.permute.xlu0 %2327 }
 0x666   : > { %5124 = vmatmul.mubr.msk.bf16.vlgmr.msra.gmra.mxu1 %vm1457_vm2, %v1829_v17  ;;  %5581 = vpow2.f32 %v2141_v53  ;;  %v2349_v13 = vsel %vm1359_vm0, %v2328_v49, 0  ;;  %v2326_v24 = vpop.permute.xlu1 %2325  ;;  %v8046_v17 = vmov 0  }
 0x667   : > { %5148 = vmatpush3.bf16.msra.mxu1 %v6951_v62  ;;  %v7111_v50 = vpop.eup %5561  ;;  %v2139_v62 = vmul.f32 1.442695, %v2125_v44  ;;  %v2346_v34 = vsel %vm1359_vm0, %v2326_v24, 0 }
 0x668   : > { %5149 = vmatprep.subr.bf16.mxu1 %v7081_v43  ;;  %v7113_v21 = vpop.eup %5563  ;;  %v1822_v51 = vsel %vm1457_vm2, %v7111_v50, 0.0 }
 0x669   : > { %5583 = vpow2.f32 %v2139_v62  ;;  %v2318_v39 = vpop.permute.xlu0 %2317 }
 0x66a   : > { %v2320_v3 = vpop.permute.xlu1 %2319 }
 0x66b   : > { %v7115_v25 = vpop.eup %5565  ;;  %5150 = vmatpush3.bf16.msra.mxu1 %v7081_v43 }
 0x66c   : > { %v7118_v48 = vpop.eup %5567  ;;  %5151 = vmatprep.subr.bf16.mxu1 %v2174_v55  ;;  %v1830_v15 = vpack.c.bf16 %v7113_v21, %v7115_v25 }
 0x66d   : > { %v7122_v59 = vpop.eup %5569  ;;  %v2322_v28 = vpop.permute.xlu0 %2321 }
 0x66e   : > { %v7124_v47 = vpop.eup %5571  ;;  %5127 = vmatprep.mubr.msk.bf16.mxu1 %vm1457_vm2, %v1830_v15  ;;  %v1831_v37 = vpack.c.bf16 %v7122_v59, %v7111_v50  ;;  %v2324_v20 = vpop.permute.xlu1 %2323  ;;  %v1825_v50 = vsel %vm1457_vm2, %v7122_v59, 0.0 }
 0x66f   : > { %5152 = vmatpush3.bf16.msra.mxu1 %v2174_v55  ;;  %v2167_v43 = vpack.c.bf16 %v7118_v48, %v7124_v47  ;;  %v7133_v22 = vpop.eup %5573  ;;  %v2143_v30 = vsel %vm1457_vm2, %v7124_v47, 0.0  ;;  %v2146_v47 = vsel %vm1457_vm2, %v7118_v48, 0.0 }
 0x670   : > { %5128 = vmatmul.mubr.msk.bf16.gmra.mxu1 %vm1457_vm2, %v1831_v37  ;;  %5153 = vmatprep.subr.bf16.mxu1 %v2172_v36  ;;  %v7135_v33 = vpop.eup %5575 }
 0x671   : > { %5155 = vmatprep.mubr.msk.bf16.mxu1 %vm1457_vm2, %v2167_v43  ;;  %v7138_v19 = vpop.eup %5577 }
 0x672   : > { %v7140_v10 = vpop.eup %5579  ;;  %v2168_v2 = vpack.c.bf16 %v7133_v22, %v7138_v19  ;;  %v2149_v14 = vsel %vm1457_vm2, %v7138_v19, 0.0 }
 0x673   : > { %5154 = vmatpush3.bf16.msra.mxu1 %v2172_v36  ;;  %v2169_v26 = vpack.c.bf16 %v7135_v33, %v7140_v10  ;;  %v7150_v46 = vpop.eup %5581 }
 0x674   : > { %5231 = vmatprep.subr.msk.bf16.mxu1 %vm1359_vm0, %v2332_v16 }
 0x676   : > { %v7152_v6 = vpop.eup %5583 }
 0x677   : > { %v2170_v11 = vpack.c.bf16 %v7150_v46, %v7152_v6 }
 0x678   : > { %5156 = vmatmul.mubr.msk.bf16.vlgmr.msra.gmra.mxu1 %vm1457_vm2, %v2168_v2 }
 0x679   : > { %5164 = vmatpush3.bf16.xpose.msra.mxu1 %v2355_v54  ;;  %5159 = vmatprep.mubr.msk.bf16.mxu1 %vm1457_vm2, %v2169_v26 }
 0x67a   : > { %5232 = vmatprep.subr.msk.bf16.mxu1 %vm1359_vm0, %v2330_v29 }
 0x680   : > { %5160 = vmatmul.mubr.msk.bf16.gmra.mxu1 %vm1457_vm2, %v2170_v11 }
 0x681   : > { %5166 = vmatpush3.bf16.xpose.msra.mxu1 %v2352_v7  ;;  %5171 = vmatprep.mubr.msk.bf16.mxu1 %vm1359_vm0, %v2318_v39 }
 0x682   : > { %5233 = vmatprep.subr.msk.bf16.mxu1 %vm1359_vm0, %v2328_v49 }
 0x689   : > { %5168 = vmatpush3.bf16.xpose.msra.mxu1 %v2349_v13 }
 0x68a   : > { %5234 = vmatprep.subr.msk.bf16.mxu1 %vm1359_vm0, %v2326_v24 }
 0x691   : > { %5170 = vmatpush3.bf16.xpose.msra.mxu1 %v2346_v34 }
 0x698   : > { %5172 = vmatmul.mubr.msk.bf16.vlgmr.msra.gmra.mxu1 %vm1359_vm0, %v2320_v3 }
 0x699   : > { %5175 = vmatprep.mubr.msk.bf16.mxu1 %vm1359_vm0, %v2322_v28 }
 0x6a0   : > { %5176 = vmatmul.mubr.msk.bf16.gmra.mxu1 %vm1359_vm0, %v2324_v20 }
 0x6a1   : > { %3176 = vmatprep.mubr.bf16.mxu1 %v8046_v17 }
 0x726   : > { %v7167_v8 = vpop.f32.mrf.mxu1 }
 0x728   : > { %v7169_v52 = vpop.f32.mrf.mxu1 }
 0x72a   : > { %v7171_v44 = vpop.f32.mrf.mxu1 }
 0x72c   : > { %v7173_v53 = vpop.f32.mrf.mxu1 }
 0x730   : > { %v7175_v55 = vpop.f32.mrf.mxu1 }
 0x732   : > { %v7177_v62 = vpop.f32.mrf.mxu1 }
 0x734   : > { %v7179_v15 = vpop.f32.mrf.mxu1 }
 0x736   : > { %v7181_v36 = vpop.f32.mrf.mxu1 }
 0x738   : > { %v7183_v37 = vpop.f32.mrf.mxu1 }
 0x73a   : > { %v7185_v43 = vpop.f32.mrf.mxu1 }
 0x73c   : > { %v7187_v16 = vpop.f32.mrf.mxu1 }
 0x73e   : > { %v7189_v2 = vpop.f32.mrf.mxu1 }
 0x740   : > { %v7191_v26 = vpop.f32.mrf.mxu1 }
 0x742   : > { %v7193_v54 = vpop.f32.mrf.mxu1 }
 0x744   : > { %v7195_v29 = vpop.f32.mrf.mxu1 }
 0x746   : > { %v7197_v49 = vpop.f32.mrf.mxu1 }
 0x758   : > { %v5173_v11 = vpop.f32.mrf.mxu1 }
 0x759   : > { %v2424_v7 = vsel %vm920_vm1, %v5173_v11, -1e+30 }
 0x75a   : > { %v2391_v39 = vpop.f32.mrf.mxu1  ;;  %v2436_v13 = vsel %vm1457_vm2, %v2424_v7, -inf }
 0x75b   : > { %v7206_v24 = vsel %vm918_vm3, %v2391_v39, -1e+30  ;;  %2437 = vmax.xlane.f32.xlu0 %v2436_v13 }
 0x75c   : > { %v5174_v34 = vpop.f32.mrf.mxu1  ;;  %v2430_v28 = vsel %vm1457_vm2, %v7206_v24, -inf }
 0x75d   : > { %v7213_v20 = vsel %vm921_vm4, %v5174_v34, -1e+30 }
 0x75e   : > { %v2394_v3 = vpop.f32.mrf.mxu1  ;;  %v2439_v13 = vsel %vm1457_vm2, %v7213_v20, -inf }
 0x75f   : > { %v7218_v57 = vsel %vm919_vm5, %v2394_v3, -1e+30  ;;  %2431 = vmax.xlane.f32.xlu0 %v2430_v28 }
 0x760   : > { %v5177_v11 = vpop.f32.mrf.mxu1  ;;  %v2433_v39 = vsel %vm1457_vm2, %v7218_v57, -inf }
 0x761   : > { %2434 = vmax.xlane.f32.xlu1 %v2433_v39  ;;  %v7227_v58 = vsel %vm924_vm6, %v5177_v11, -1e+30 }
 0x762   : > { %v2407_v34 = vpop.f32.mrf.mxu1  ;;  %v2448_v60 = vsel %vm1457_vm2, %v7227_v58, -inf }
 0x763   : > { %2440 = vmax.xlane.f32.xlu0 %v2439_v13  ;;  %v7234_v3 = vsel %vm922_vm7, %v2407_v34, -1e+30  ;;  %v1813_v13 = vsel %vm1457_vm2, %v7100_v61, 0.0  ;;  %v1807_v61 = vsel %vm1457_vm2, %v7092_v5, 0.0  ;;  %v2158_v5 = vsel %vm1457_vm2, %v7135_v33, 0.0 }
 0x764   : > { %v2442_v28 = vsel %vm1457_vm2, %v7234_v3, -inf  ;;  %v5178_v63 = vpop.f32.mrf.mxu1 }
 0x765   : > { %v7247_v31 = vsel %vm925_vm8, %v5178_v63, -1e+30 }
 0x766   : > { %v2410_v11 = vpop.f32.mrf.mxu1  ;;  %v2451_v39 = vsel %vm1457_vm2, %v7247_v31, -inf }
 0x767   : > { %2449 = vmax.xlane.f32.xlu0 %v2448_v60 }
 0x76b   : > { %2443 = vmax.xlane.f32.xlu0 %v2442_v28 }
 0x772   : > { %2510 = vrot.lane.b32.xlu1 %v6701_v32, %s6165_s27  ;;  %v7254_v32 = vsel %vm923_vm9, %v2410_v11, -1e+30 }
 0x776   : > { %2508 = vrot.lane.b32.xlu1 %v6706_v35, %s6165_s27  ;;  %v2445_v35 = vsel %vm1457_vm2, %v7254_v32, -inf }
 0x781   : > { %2512 = vrot.lane.b32.xlu0 %v6699_v27, %s6165_s27  ;;  %v1804_v27 = vsel %vm1457_vm2, %v7089_v4, 0.0  ;;  %v1816_v4 = vsel %vm1457_vm2, %v7115_v25, 0.0  ;;  %v1819_v25 = vsel %vm1457_vm2, %v7113_v21, 0.0  ;;  %v2164_v21 = vsel %vm1457_vm2, %v7150_v46, 0.0 }
 0x79a   : > { %2452 = vmax.xlane.f32.xlu1 %v2451_v39 }
 0x79e   : > { %2446 = vmax.xlane.f32.xlu1 %v2445_v35 }
 0x7a0   : > { %1805 = vadd.xlane.f32.xlu0 %v1804_v27 }
 0x7a4   : > { %1811 = vadd.xlane.f32.xlu0 %v1810_v12 }
 0x7a8   : > { %1814 = vadd.xlane.f32.xlu0 %v1813_v13 }
 0x7ac   : > { %2144 = vadd.xlane.f32.xlu0 %v2143_v30 }
 0x7af   : > { %2506 = vrot.lane.b32.xlu1 %v6710_v40, %s6165_s27  ;;  %v2152_v40 = vsel %vm1457_vm2, %v7133_v22, 0.0 }
 0x7b0   : > { %2150 = vadd.xlane.f32.xlu0 %v2149_v14 }
 0x7b4   : > { %1817 = vadd.xlane.f32.xlu0 %v1816_v4 }
 0x7b8   : > { %1823 = vadd.xlane.f32.xlu0 %v1822_v51 }
 0x7d3   : > { %1808 = vadd.xlane.f32.xlu1 %v1807_v61 }
 0x7d7   : > { %2147 = vadd.xlane.f32.xlu1 %v2146_v47 }
 0x7db   : > { %2153 = vadd.xlane.f32.xlu1 %v2152_v40  ;;  %v2155_v40 = vsel %vm1457_vm2, %v7140_v10, 0.0 }
 0x7df   : > { %1820 = vadd.xlane.f32.xlu1 %v1819_v25 }
 0x7e3   : > { %1826 = vadd.xlane.f32.xlu1 %v1825_v50  ;;  %v2161_v50 = vsel %vm1457_vm2, %v7152_v6, 0.0  ;;  %v1506_v6 = vsel %vm1457_vm2, %v6895_v23, 0.0 }
 0x7e4   : > { %v2438_v19 = vpop.xlane.xlu0 %2437 }
 0x7e5   : > { %v2456_v34 = vsub.f32 %v2424_v7, %v2438_v19 }
 0x7e7   : > { %v2466_v60 = vmul.f32 1.442695, %v2456_v34  ;;  %2159 = vadd.xlane.f32.xlu1 %v2158_v5 }
 0x7e8   : > { %v2432_v48 = vpop.xlane.xlu0 %2431 }
 0x7e9   : > { %5585 = vpow2.f32 %v2466_v60  ;;  %v2454_v22 = vsub.f32 %v7206_v24, %v2432_v48  ;;  %v1509_v60 = vsel %vm1457_vm2, %v6899_v1, 0.0  ;;  %v1512_v1 = vsel %vm1457_vm2, %v6901_v38, 0.0 }
 0x7ea   : > { %v2435_v28 = vpop.xlane.xlu1 %2434 }
 0x7eb   : > { %v2462_v63 = vmul.f32 1.442695, %v2454_v22  ;;  %v2455_v11 = vsub.f32 %v7218_v57, %v2435_v28  ;;  %2165 = vadd.xlane.f32.xlu1 %v2164_v21  ;;  %v1515_v22 = vsel %vm1457_vm2, %v6897_v0, 0.0  ;;  %v1521_v28 = vsel %vm1457_vm2, %v6932_v42, 0.0 }
 0x7ec   : > { %v2441_v59 = vpop.xlane.xlu0 %2440  ;;  %v1518_v21 = vsel %vm1457_vm2, %v6927_v18, 0.0  ;;  %v1524_v0 = vsel %vm1457_vm2, %v6934_v45, 0.0 }
 0x7ed   : > { %5587 = vpow2.f32 %v2462_v63  ;;  %v2464_v7 = vmul.f32 1.442695, %v2455_v11  ;;  %v2457_v39 = vsub.f32 %v7213_v20, %v2441_v59 }
 0x7ee   : > { %v2511_v14 = vpop.permute.xlu1 %2510 }
 0x7ef   : > { %5589 = vpow2.f32 %v2464_v7  ;;  %v2468_v33 = vmul.f32 1.442695, %v2457_v39 }
 0x7f0   : > { %v2450_v35 = vpop.xlane.xlu0 %2449 }
 0x7f1   : > { %5591 = vpow2.f32 %v2468_v33  ;;  %v2460_v27 = vsub.f32 %v7227_v58, %v2450_v35 }
 0x7f2   : > { %v2509_v47 = vpop.permute.xlu1 %2508 }
 0x7f3   : > { %v2474_v24 = vmul.f32 1.442695, %v2460_v27 }
 0x7f4   : > { %v2444_v12 = vpop.xlane.xlu0 %2443 }
 0x7f5   : > { %v2458_v13 = vsub.f32 %v7234_v3, %v2444_v12  ;;  %5593 = vpow2.f32 %v2474_v24 }
 0x7f6   : > { %v7293_v46 = vpop.eup %5585 }
 0x7f7   : > { %v2470_v57 = vmul.f32 1.442695, %v2458_v13  ;;  %v2484_v30 = vsel %vm1457_vm2, %v7293_v46, 0.0 }
 0x7f8   : > { %2485 = vadd.xlane.f32.xlu0 %v2484_v30  ;;  %v2513_v20 = vpop.permute.xlu0 %2512 }
 0x7f9   : > { %5179 = vmatprep.subr.bf16.mxu0 %v2513_v20  ;;  %5595 = vpow2.f32 %v2470_v57 }
 0x7fa   : > { %v5588_v4 = vpop.eup %5587  ;;  %5180 = vmatpush3.bf16.msra.mxu0 %v2513_v20  ;;  %v1527_v20 = vsel %vm1457_vm2, %v6929_v41, 0.0 }
 0x7fb   : > { %5181 = vmatprep.subr.bf16.mxu0 %v2511_v14  ;;  %v2478_v58 = vsel %vm1457_vm2, %v5588_v4, 0.0 }
 0x7fc   : > { %v5590_v51 = vpop.eup %5589  ;;  %2479 = vadd.xlane.f32.xlu0 %v2478_v58 }
 0x7fd   : > { %v2502_v3 = vpack.c.bf16 %v5590_v51, %v5588_v4  ;;  %v2481_v19 = vsel %vm1457_vm2, %v5590_v51, 0.0 }
 0x7fe   : > { %v5592_v61 = vpop.eup %5591  ;;  %5182 = vmatpush3.bf16.msra.mxu0 %v2511_v14 }
 0x7ff   : > { %5183 = vmatprep.subr.bf16.mxu0 %v2509_v47  ;;  %5187 = vmatprep.mubr.msk.bf16.mxu0 %vm1457_vm2, %v2502_v3  ;;  %v2487_v25 = vsel %vm1457_vm2, %v5592_v61, 0.0  ;;  %v2503_v33 = vpack.c.bf16 %v5592_v61, %v7293_v46 }
 0x800   : > { %2156 = vadd.xlane.f32.xlu0 %v2155_v40  ;;  %2488 = vadd.xlane.f32.xlu1 %v2487_v25 }
 0x802   : > { %5184 = vmatpush3.bf16.msra.mxu0 %v2509_v47  ;;  %v5594_v34 = vpop.eup %5593 }
 0x803   : > { %v2496_v5 = vsel %vm1457_vm2, %v5594_v34, 0.0 }
 0x804   : > { %2162 = vadd.xlane.f32.xlu0 %v2161_v50  ;;  %2482 = vadd.xlane.f32.xlu1 %v2481_v19 }
 0x806   : > { %v5596_v48 = vpop.eup %5595 }
 0x807   : > { %v2490_v10 = vsel %vm1457_vm2, %v5596_v48, 0.0 }
 0x808   : > { %2497 = vadd.xlane.f32.xlu0 %v2496_v5  ;;  %1510 = vadd.xlane.f32.xlu1 %v1509_v60 }
 0x80c   : > { %2491 = vadd.xlane.f32.xlu0 %v2490_v10  ;;  %1516 = vadd.xlane.f32.xlu1 %v1515_v22 }
 0x810   : > { %1507 = vadd.xlane.f32.xlu0 %v1506_v6  ;;  %1522 = vadd.xlane.f32.xlu1 %v1521_v28 }
 0x814   : > { %1513 = vadd.xlane.f32.xlu0 %v1512_v1 }
 0x818   : > { %1519 = vadd.xlane.f32.xlu0 %v1518_v21 }
 0x81c   : > { %1525 = vadd.xlane.f32.xlu0 %v1524_v0 }
 0x823   : > { %v2453_v63 = vpop.xlane.xlu1 %2452 }
 0x824   : > { %v2461_v23 = vsub.f32 %v7247_v31, %v2453_v63 }
 0x826   : > { %v2476_v11 = vmul.f32 1.442695, %v2461_v23  ;;  %v5433_v23 = vld [vmem:[%s6561_s21 + $0x38] sm:$0xff]  }
 0x827   : > { %v2447_v59 = vpop.xlane.xlu1 %2446 }
 0x828   : > { %5597 = vpow2.f32 %v2476_v11  ;;  %v2459_v42 = vsub.f32 %v7254_v32, %v2447_v59 }
 0x829   : > { %v1806_v7 = vpop.xlane.xlu0 %1805 }
 0x82a   : > { %v2472_v39 = vmul.f32 1.442695, %v2459_v42  ;;  %5599 = vrcp.f32 %v1806_v7  ;;  %v5435_v42 = vld [vmem:[%s6561_s21 + $0x28] sm:$0xff]  }
 0x82b   : > { %v2507_v38 = vpop.permute.xlu1 %2506 }
 0x82c   : > { %5601 = vpow2.f32 %v2472_v39  ;;  %5185 = vmatprep.subr.bf16.mxu0 %v2507_v38 }
 0x82d   : > { %v1812_v18 = vpop.xlane.xlu0 %1811  ;;  %5186 = vmatpush3.bf16.msra.mxu0 %v2507_v38  ;;  %v5436_v38 = vld [vmem:[%s6561_s21 + $0x20] sm:$0xff]  }
 0x82e   : > { %5195 = vmatprep.subr.bf16.mxu0 %v5433_v23 }
 0x830   : > { %5188 = vmatmul.mubr.msk.bf16.vlgmr.msra.gmra.mxu0 %vm1457_vm2, %v2503_v33 }
 0x831   : > { %v1815_v45 = vpop.xlane.xlu0 %1814  ;;  %5196 = vmatpush3.bf16.msra.mxu0 %v5433_v23 }
 0x835   : > { %v5598_v35 = vpop.eup %5597  ;;  %v2145_v31 = vpop.xlane.xlu0 %2144 }
 0x836   : > { %5603 = vrcp.f32 %v2145_v31  ;;  %v2499_v27 = vsel %vm1457_vm2, %v5598_v35, 0.0  ;;  %v2505_v30 = vpack.c.bf16 %v5598_v35, %v5594_v34 }
 0x837   : > { %v5600_v24 = vpop.eup %5599  ;;  %2500 = vadd.xlane.f32.xlu1 %v2499_v27 }
 0x838   : > { %v1933_v32 = vmul.f32 %v5600_v24, %v7169_v52 }
 0x839   : > { %v5602_v12 = vpop.eup %5601  ;;  %v2151_v13 = vpop.xlane.xlu0 %2150 }
 0x83a   : > { %5605 = vrcp.f32 %v2151_v13  ;;  %1949 = vrot.lane.b32.xlu0 %v1933_v32, %s6165_s27  ;;  %v2493_v57 = vsel %vm1457_vm2, %v5602_v12, 0.0  ;;  %v2504_v46 = vpack.c.bf16 %v5602_v12, %v5596_v48  ;;  %v8047_v12 = vld [vmem:[#allocation45_spill] sm:$0xff] }
 0x83b   : > { %2494 = vadd.xlane.f32.xlu1 %v2493_v57 }
 0x83c   : > { %5191 = vmatprep.mubr.msk.bf16.mxu0 %vm1457_vm2, %v2504_v46 }
 0x83d   : > { %v1818_v14 = vpop.xlane.xlu0 %1817  ;;  %5192 = vmatmul.mubr.msk.bf16.gmra.mxu0 %vm1457_vm2, %v2505_v30  ;;  %v8048_v30 = vld [vmem:[#allocation44_spill] sm:$0xff] }
 0x83e   : > { %5607 = vrcp.f32 %v1818_v14 }
 0x83f   : > { %1528 = vadd.xlane.f32.xlu1 %v1527_v20  ;;  %v8049_v20 = vld [vmem:[#allocation49_spill] sm:$0xff] }
 0x841   : > { %v7350_v22 = vpop.xlane.xlu0 %1823 }
 0x843   : > { %v5604_v52 = vpop.eup %5603 }
 0x844   : > { %v2268_v4 = vmul.f32 %v5604_v52, %v7185_v43 }
 0x846   : > { %2284 = vrot.lane.b32.xlu0 %v2268_v4, %s6164_s13 }
 0x847   : > { %v5606_v58 = vpop.eup %5605 }
 0x848   : > { %v2270_v51 = vmul.f32 %v5606_v58, %v7183_v37  ;;  %v8050_v58 = vld [vmem:[#allocation43_spill] sm:$0xff] }
 0x84a   : > { %2288 = vrot.lane.b32.xlu0 %v2270_v51, %s6164_s13 }
 0x84b   : > { %v5608_v3 = vpop.eup %5607 }
 0x84c   : > { %v1937_v61 = vmul.f32 %v5608_v3, %v7177_v62 }
 0x84e   : > { %1957 = vrot.lane.b32.xlu0 %v1937_v61, %s6165_s27  ;;  %v8051_v61 = vld [vmem:[#allocation47_spill] sm:$0xff] }
 0x85c   : > { %v1809_v47 = vpop.xlane.xlu1 %1808 }
 0x85d   : > { %5609 = vrcp.f32 %v1809_v47 }
 0x85e   : > { %5611 = vrcp.f32 %v1812_v18 }
 0x85f   : > { %5613 = vrcp.f32 %v1815_v45 }
 0x860   : > { %v2148_v41 = vpop.xlane.xlu1 %2147 }
 0x861   : > { %5615 = vrcp.f32 %v2148_v41 }
 0x864   : > { %v2154_v40 = vpop.xlane.xlu1 %2153 }
 0x865   : > { %5617 = vrcp.f32 %v2154_v40  ;;  %v8052_v40 = vld [vmem:[#allocation46_spill] sm:$0xff] }
 0x868   : > { %v1821_v37 = vpop.xlane.xlu1 %1820 }
 0x869   : > { %5619 = vrcp.f32 %v1821_v37 }
 0x86a   : > { %v5610_v43 = vpop.eup %5609 }
 0x86b   : > { %v1934_v25 = vmul.f32 %v5610_v43, %v7173_v53  ;;  %v5612_v50 = vpop.eup %5611 }
 0x86c   : > { %v1935_v62 = vmul.f32 %v5612_v50, %v7167_v8  ;;  %v5614_v19 = vpop.eup %5613  ;;  %v7346_v10 = vpop.xlane.xlu1 %1826 }
 0x86d   : > { %1951 = vrot.lane.b32.xlu1 %v1934_v25, %s6165_s27  ;;  %v1936_v34 = vmul.f32 %v5614_v19, %v7171_v44 }
 0x86e   : > { %v5616_v5 = vpop.eup %5615 }
 0x86f   : > { %v2269_v60 = vmul.f32 %v5616_v5, %v7189_v2 }
 0x870   : > { %v7353_v44 = vpop.xlane.xlu1 %2159 }
 0x871   : > { %1953 = vrot.lane.b32.xlu1 %v1935_v62, %s6165_s27 }
 0x872   : > { %v5618_v48 = vpop.eup %5617 }
 0x873   : > { %v2271_v53 = vmul.f32 %v5618_v48, %v7187_v16 }
 0x874   : > { %v7359_v2 = vpop.xlane.xlu1 %2165 }
 0x875   : > { %1955 = vrot.lane.b32.xlu1 %v1936_v34, %s6165_s27 }
 0x876   : > { %v5620_v8 = vpop.eup %5619 }
 0x877   : > { %v1938_v6 = vmul.f32 %v5620_v8, %v7181_v36  ;;  %v5434_v36 = vld [vmem:[%s6561_s21 + $0x30] sm:$0xff]  }
 0x878   : > { %5197 = vmatprep.subr.bf16.mxu0 %v5434_v36 }
 0x879   : > { %2286 = vrot.lane.b32.xlu1 %v2269_v60, %s6164_s13  ;;  %5198 = vmatpush3.bf16.msra.mxu0 %v5434_v36  ;;  %v8053_v60 = vld [vmem:[#allocation48_spill] sm:$0xff] }
 0x87a   : > { %5199 = vmatprep.subr.bf16.mxu0 %v5435_v42  ;;  %v5438_v36 = vld [vmem:[%s6561_s21 + $0x10] sm:$0xff]  }
 0x87d   : > { %2290 = vrot.lane.b32.xlu1 %v2271_v53, %s6164_s13  ;;  %5200 = vmatpush3.bf16.msra.mxu0 %v5435_v42  ;;  %v5440_v42 = vld [vmem:[%s6561_s21] sm:$0xff]  }
 0x87e   : > { %5201 = vmatprep.subr.bf16.mxu0 %v5436_v38 }
 0x881   : > { %v7356_v28 = vpop.xlane.xlu0 %2485  ;;  %1959 = vrot.lane.b32.xlu1 %v1938_v6, %s6165_s27  ;;  %5202 = vmatpush3.bf16.msra.mxu0 %v5436_v38  ;;  %v5437_v6 = vld [vmem:[%s6561_s21 + $0x18] sm:$0xff]  }
 0x882   : > { %5203 = vmatprep.subr.bf16.mxu0 %v5437_v6 }
 0x885   : > { %v7361_v1 = vpop.xlane.xlu0 %2479  ;;  %5204 = vmatpush3.bf16.msra.mxu0 %v5437_v6 }
 0x886   : > { %5205 = vmatprep.subr.bf16.mxu0 %v5438_v36 }
 0x889   : > { %v7363_v21 = vpop.xlane.xlu0 %2156  ;;  %v7365_v16 = vpop.xlane.xlu1 %2488  ;;  %5206 = vmatpush3.bf16.msra.mxu0 %v5438_v36 }
 0x88d   : > { %v7367_v0 = vpop.xlane.xlu0 %2162  ;;  %v7369_v63 = vpop.xlane.xlu1 %2482 }
 0x891   : > { %v7373_v11 = vpop.xlane.xlu0 %2497  ;;  %v1511_v59 = vpop.xlane.xlu1 %1510 }
 0x892   : > { %5621 = vrcp.f32 %v1511_v59 }
 0x895   : > { %v7376_v7 = vpop.xlane.xlu0 %2491  ;;  %v1517_v39 = vpop.xlane.xlu1 %1516 }
 0x896   : > { %5623 = vrcp.f32 %v1517_v39 }
 0x899   : > { %v1508_v18 = vpop.xlane.xlu0 %1507  ;;  %v1523_v33 = vpop.xlane.xlu1 %1522 }
 0x89a   : > { %5625 = vrcp.f32 %v1508_v18 }
 0x89b   : > { %5627 = vrcp.f32 %v1523_v33 }
 0x89d   : > { %v1514_v45 = vpop.xlane.xlu0 %1513 }
 0x89e   : > { %5629 = vrcp.f32 %v1514_v45 }
 0x89f   : > { %v5622_v35 = vpop.eup %5621 }
 0x8a0   : > { %v1620_v27 = vmul.f32 %v5622_v35, %v6960_v9 }
 0x8a1   : > { %v1520_v31 = vpop.xlane.xlu0 %1519 }
 0x8a2   : > { %5631 = vrcp.f32 %v1520_v31  ;;  %1628 = vst.msk [vmem:[#allocation3 + $0x8] sm:$0xff] %vm1359_vm0, %v1620_v27 }
 0x8a3   : > { %v5624_v24 = vpop.eup %5623 }
 0x8a4   : > { %v1622_v13 = vmul.f32 %v5624_v24, %v8047_v12 }
 0x8a5   : > { %v1526_v32 = vpop.xlane.xlu0 %1525 }
 0x8a6   : > { %5633 = vrcp.f32 %v1526_v32  ;;  %1630 = vst.msk [vmem:[#allocation3 + $0x18] sm:$0xff] %vm1359_vm0, %v1622_v13 }
 0x8a7   : > { %v5626_v57 = vpop.eup %5625 }
 0x8a8   : > { %v5628_v46 = vpop.eup %5627  ;;  %v1619_v14 = vmul.f32 %v5626_v57, %v8048_v30 }
 0x8a9   : > { %v1624_v52 = vmul.f32 %v5628_v46, %v8049_v20 }
 0x8aa   : > { %1627 = vst.msk [vmem:[#allocation3] sm:$0xff] %vm1359_vm0, %v1619_v14 }
 0x8ab   : > { %v5630_v9 = vpop.eup %5629  ;;  %1632 = vst.msk [vmem:[#allocation3 + $0x28] sm:$0xff] %vm1359_vm0, %v1624_v52 }
 0x8ac   : > { %v1950_v4 = vpop.permute.xlu0 %1949  ;;  %v1621_v51 = vmul.f32 %v5630_v9, %v8050_v58 }
 0x8ad   : > { %1974 = vst.msk [vmem:[#allocation3] sm:$0xff] %vm1973_vm10, %v1950_v4 }
 0x8ae   : > { %1629 = vst.msk [vmem:[#allocation3 + $0x10] sm:$0xff] %vm1359_vm0, %v1621_v51 }
 0x8af   : > { %v5632_v3 = vpop.eup %5631 }
 0x8b0   : > { %v1623_v47 = vmul.f32 %v5632_v3, %v8051_v61 }
 0x8b2   : > { %1631 = vst.msk [vmem:[#allocation3 + $0x20] sm:$0xff] %vm1359_vm0, %v1623_v47 }
 0x8b3   : > { %v5634_v41 = vpop.eup %5633 }
 0x8b4   : > { %v1625_v43 = vmul.f32 %v5634_v41, %v8052_v40 }
 0x8b6   : > { %1633 = vst.msk [vmem:[#allocation3 + $0x30] sm:$0xff] %vm1359_vm0, %v1625_v43 }
 0x8b8   : > { %v2285_v25 = vpop.permute.xlu0 %2284 }
 0x8b9   : > { %2309 = vst.msk [vmem:[#allocation3] sm:$0xff] %vm2308_vm11, %v2285_v25 }
 0x8bc   : > { %v2289_v50 = vpop.permute.xlu0 %2288 }
 0x8c0   : > { %v1958_v37 = vpop.permute.xlu0 %1957  ;;  %v7395_v62 = vpop.xlane.xlu1 %2500 }
 0x8c1   : > { %1978 = vst.msk [vmem:[#allocation3 + $0x20] sm:$0xff] %vm1973_vm10, %v1958_v37 }
 0x8c4   : > { %v2495_v19 = vpop.xlane.xlu1 %2494 }
 0x8c8   : > { %v1529_v34 = vpop.xlane.xlu1 %1528 }
 0x8c9   : > { %5635 = vrcp.f32 %v1529_v34 }
 0x8ca   : > { %5637 = vrcp.f32 %v7356_v28 }
 0x8cb   : > { %5639 = vrcp.f32 %v7361_v1  ;;  %v5439_v1 = vld [vmem:[%s6561_s21 + $0x8] sm:$0xff]  }
 0x8cc   : > { %5641 = vrcp.f32 %v7365_v16  ;;  %5207 = vmatprep.subr.bf16.mxu0 %v5439_v1 }
 0x8cd   : > { %5643 = vrcp.f32 %v7350_v22  ;;  %5208 = vmatpush3.bf16.msra.mxu0 %v5439_v1 }
 0x8ce   : > { %5645 = vrcp.f32 %v7369_v63  ;;  %5209 = vmatprep.subr.bf16.mxu0 %v5440_v42 }
 0x8cf   : > { %5647 = vrcp.f32 %v7346_v10 }
 0x8d0   : > { %5649 = vrcp.f32 %v7363_v21 }
 0x8d1   : > { %5651 = vrcp.f32 %v7353_v44  ;;  %5210 = vmatpush3.bf16.msra.mxu0 %v5440_v42 }
 0x8d2   : > { %5653 = vrcp.f32 %v7367_v0 }
 0x8d3   : > { %5655 = vrcp.f32 %v7359_v2 }
 0x8d4   : > { %5657 = vrcp.f32 %v7376_v7 }
 0x8d5   : > { %5659 = vrcp.f32 %v7373_v11 }
 0x8d6   : > { %v5636_v5 = vpop.eup %5635  ;;  %5661 = vrcp.f32 %v2495_v19 }
 0x8d7   : > { %v1626_v48 = vmul.f32 %v5636_v5, %v8053_v60  ;;  %v5638_v59 = vpop.eup %5637  ;;  %5663 = vrcp.f32 %v7395_v62 }
 0x8d8   : > { %v5640_v39 = vpop.eup %5639 }
 0x8d9   : > { %1634 = vst.msk [vmem:[#allocation3 + $0x38] sm:$0xff] %vm1359_vm0, %v1626_v48  ;;  %v5642_v38 = vpop.eup %5641 }
 0x8da   : > { %v5644_v45 = vpop.eup %5643 }
 0x8db   : > { %v5646_v35 = vpop.eup %5645  ;;  %v1939_v24 = vmul.f32 %v5644_v45, %v7175_v55 }
 0x8dc   : > { %v5648_v31 = vpop.eup %5647 }
 0x8dd   : > { %v5650_v32 = vpop.eup %5649  ;;  %v1940_v13 = vmul.f32 %v5648_v31, %v7179_v15 }
 0x8de   : > { %v5652_v2 = vpop.eup %5651  ;;  %v2272_v7 = vmul.f32 %v5650_v32, %v7193_v54  ;;  %v5684_v32 = vld [vmem:[#allocation2 + $0x10] sm:$0xff] }
 0x8df   : > { %v1952_v53 = vpop.permute.xlu1 %1951  ;;  %v5654_v57 = vpop.eup %5653  ;;  %v2273_v46 = vmul.f32 %v5652_v2, %v7197_v49 }
 0x8e0   : > { %1975 = vst.msk [vmem:[#allocation3 + $0x8] sm:$0xff] %vm1973_vm10, %v1952_v53  ;;  %v2274_v11 = vmul.f32 %v5654_v57, %v7191_v26  ;;  %v5656_v30 = vpop.eup %5655 }
 0x8e1   : > { %v5658_v54 = vpop.eup %5657  ;;  %v2275_v20 = vmul.f32 %v5656_v30, %v7195_v29 }
 0x8e2   : > { %v5660_v9 = vpop.eup %5659 }
 0x8e3   : > { %v1954_v8 = vpop.permute.xlu1 %1953  ;;  %v5662_v4 = vpop.eup %5661 }
 0x8e4   : > { %1976 = vst.msk [vmem:[#allocation3 + $0x10] sm:$0xff] %vm1973_vm10, %v1954_v8  ;;  %v5664_v49 = vpop.eup %5663 }
 0x8e5   : > { %2311 = vst.msk [vmem:[#allocation3 + $0x10] sm:$0xff] %vm2308_vm11, %v2289_v50 }
 0x8e7   : > { %v1956_v23 = vpop.permute.xlu1 %1955 }
 0x8e8   : > { %1977 = vst.msk [vmem:[#allocation3 + $0x18] sm:$0xff] %vm1973_vm10, %v1956_v23 }
 0x8eb   : > { %v2287_v28 = vpop.permute.xlu1 %2286 }
 0x8ec   : > { %2310 = vst.msk [vmem:[#allocation3 + $0x8] sm:$0xff] %vm2308_vm11, %v2287_v28 }
 0x8ef   : > { %v2291_v16 = vpop.permute.xlu1 %2290 }
 0x8f0   : > { %2312 = vst.msk [vmem:[#allocation3 + $0x18] sm:$0xff] %vm2308_vm11, %v2291_v16  ;;  %v5189_v22 = vpop.f32.mrf.mxu0 }
 0x8f1   : > { %v2605_v63 = vmul.f32 %v5638_v59, %v5189_v22 }
 0x8f2   : > { %v2564_v10 = vpop.f32.mrf.mxu0 }
 0x8f3   : > { %2623 = vrot.lane.b32.xlu0 %v2605_v63, %s6163_s11  ;;  %v1960_v21 = vpop.permute.xlu1 %1959  ;;  %v2603_v44 = vmul.f32 %v5640_v39, %v2564_v10  ;;  %v4722_v10 = vld [vmem:[%s870_s17] ss:$0 sm:$0xff] }
 0x8f4   : > { %1979 = vst.msk [vmem:[#allocation3 + $0x28] sm:$0xff] %vm1973_vm10, %v1960_v21  ;;  %v5190_v18 = vpop.f32.mrf.mxu0 }
 0x8f5   : > { %v2606_v33 = vmul.f32 %v5642_v38, %v5190_v18  ;;  %v5681_v18 = vld [vmem:[#allocation2 + $0x30] sm:$0xff] }
 0x8f6   : > { %v2567_v0 = vpop.f32.mrf.mxu0 }
 0x8f7   : > { %2619 = vrot.lane.b32.xlu0 %v2603_v44, %s6163_s11  ;;  %2625 = vrot.lane.b32.xlu1 %v2606_v33, %s6163_s11  ;;  %v2604_v27 = vmul.f32 %v5646_v35, %v2567_v0  ;;  %v5682_v0 = vld [vmem:[#allocation2 + $0x18] sm:$0xff] }
 0x8fb   : > { %1961 = vrot.lane.b32.xlu0 %v1939_v24, %s6165_s27  ;;  %2621 = vrot.lane.b32.xlu1 %v2604_v27, %s6163_s11  ;;  %v5683_v27 = vld [vmem:[#allocation2] sm:$0xff] }
 0x8fd   : > { %v5193_v12 = vpop.f32.mrf.mxu0 }
 0x8fe   : > { %v2609_v26 = vmul.f32 %v5660_v9, %v5193_v12 }
 0x8ff   : > { %2292 = vrot.lane.b32.xlu0 %v2272_v7, %s6164_s13  ;;  %v2580_v55 = vpop.f32.mrf.mxu0  ;;  %1963 = vrot.lane.b32.xlu1 %v1940_v13, %s6165_s27 }
 0x900   : > { %v2607_v15 = vmul.f32 %v5658_v54, %v2580_v55  ;;  %v5686_v54 = vld [vmem:[#allocation2 + $0x28] sm:$0xff] }
 0x901   : > { %v5194_v14 = vpop.f32.mrf.mxu0 }
 0x902   : > { %v2610_v51 = vmul.f32 %v5664_v49, %v5194_v14  ;;  %v5443_v49 = vld [vmem:[%s6574_s10 + $0xe4] ss:$16 sps:$4 sm:$0xff]  }
 0x903   : > { %2296 = vrot.lane.b32.xlu0 %v2274_v11, %s6164_s13  ;;  %2294 = vrot.lane.b32.xlu1 %v2273_v46, %s6164_s13  ;;  %v2583_v52 = vpop.f32.mrf.mxu0  ;;  %v5685_v11 = vld [vmem:[#allocation2 + $0x8] sm:$0xff] }
 0x904   : > { %v2608_v58 = vmul.f32 %v5662_v4, %v2583_v52  ;;  %v5687_v52 = vld [vmem:[#allocation2 + $0x20] sm:$0xff]  ;;  %v5688_v4 = vld [vmem:[#allocation2 + $0x38] sm:$0xff]  ;;  %3144 = vmatprep.subr.bf16.mxu1 %v5443_v49 }
 0x905   : > { %v5474_v49 = vld [vmem:[%s6574_s10 + $0x48] ss:$16 sps:$4 sm:$0xff]  }
 0x907   : > { %2627 = vrot.lane.b32.xlu0 %v2607_v15, %s6163_s11  ;;  %2298 = vrot.lane.b32.xlu1 %v2275_v20, %s6164_s13 }
 0x90b   : > { %2631 = vrot.lane.b32.xlu0 %v2609_v26, %s6163_s11  ;;  %2629 = vrot.lane.b32.xlu1 %v2608_v58, %s6163_s11  ;;  %v5441_v58 = vld [vmem:[%s6574_s10 + $0xe0] ss:$16 sps:$4 sm:$0xff]  }
 0x90c   : > { %3145 = vmatpush1.bf16.msra.mxu1 %v5441_v58  ;;  %v5471_v58 = vld [vmem:[%s6574_s10 + $0x40] ss:$16 sps:$4 sm:$0xff]  }
 0x90f   : > { %2633 = vrot.lane.b32.xlu1 %v2610_v51, %s6163_s11  ;;  %v5444_v51 = vld [vmem:[%s6574_s10 + $0xe8] ss:$16 sps:$4 sm:$0xff]  }
 0x965   : > { %v2624_v3 = vpop.permute.xlu0 %2623 }
 0x966   : > { %2646 = vst.msk [vmem:[#allocation3 + $0x10] sm:$0xff] %vm2643_vm12, %v2624_v3  ;;  %v5446_v3 = vld [vmem:[%s6574_s10 + $0xec] ss:$16 sps:$4 sm:$0xff]  }
 0x967   : > { %3217 = vmatprep.subr.bf16.mxu0 %v5446_v3  ;;  %v5482_v3 = vld [vmem:[%s6574_s10 + $0x2c] ss:$16 sps:$4 sm:$0xff]  }
 0x969   : > { %v2620_v29 = vpop.permute.xlu0 %2619  ;;  %v2626_v61 = vpop.permute.xlu1 %2625 }
 0x96a   : > { %2644 = vst.msk [vmem:[#allocation3] sm:$0xff] %vm2643_vm12, %v2620_v29  ;;  %2647 = vst.msk [vmem:[#allocation3 + $0x18] sm:$0xff] %vm2643_vm12, %v2626_v61 }
 0x96d   : > { %v1962_v47 = vpop.permute.xlu0 %1961  ;;  %v2622_v41 = vpop.permute.xlu1 %2621  ;;  %v2654_v5 = vld [vmem:[#allocation3 + $0x10] sm:$0xff] }
 0x96e   : > { %1980 = vst.msk [vmem:[#allocation3 + $0x30] sm:$0xff] %vm1973_vm10, %v1962_v47 }
 0x96f   : > { %2645 = vst.msk [vmem:[#allocation3 + $0x8] sm:$0xff] %vm2643_vm12, %v2622_v41 }
 0x971   : > { %v2293_v40 = vpop.permute.xlu0 %2292  ;;  %v1964_v43 = vpop.permute.xlu1 %1963  ;;  %v2655_v25 = vld [vmem:[#allocation3 + $0x18] sm:$0xff]  ;;  %v2652_v62 = vld [vmem:[#allocation3] sm:$0xff] }
 0x972   : > { %2313 = vst.msk [vmem:[#allocation3 + $0x20] sm:$0xff] %vm2308_vm11, %v2293_v40  ;;  %v2661_v60 = vpack.c.bf16 %v2655_v25, %v2654_v5 }
 0x973   : > { %1981 = vst.msk [vmem:[#allocation3 + $0x38] sm:$0xff] %vm1973_vm10, %v1964_v43 }
 0x975   : > { %v2297_v50 = vpop.permute.xlu0 %2296  ;;  %v2295_v37 = vpop.permute.xlu1 %2294 }
 0x976   : > { %v2653_v19 = vld [vmem:[#allocation3 + $0x8] sm:$0xff]  ;;  %2315 = vst.msk [vmem:[#allocation3 + $0x30] sm:$0xff] %vm2308_vm11, %v2297_v50  ;;  %2314 = vst.msk [vmem:[#allocation3 + $0x28] sm:$0xff] %vm2308_vm11, %v2295_v37 }
 0x977   : > { %v2660_v34 = vpack.c.bf16 %v2653_v19, %v2652_v62 }
 0x979   : > { %5211 = vmatprep.mubr.bf16.mxu0 %v2660_v34  ;;  %v2628_v48 = vpop.permute.xlu0 %2627  ;;  %v2299_v53 = vpop.permute.xlu1 %2298 }
 0x97a   : > { %5212 = vmatmul.mubr.bf16.vlgmr.msra.gmra.mxu0 %v2661_v60  ;;  %2648 = vst.msk [vmem:[#allocation3 + $0x20] sm:$0xff] %vm2643_vm12, %v2628_v48 }
 0x97b   : > { %2316 = vst.msk [vmem:[#allocation3 + $0x38] sm:$0xff] %vm2308_vm11, %v2299_v53  ;;  %3218 = vmatpush1.bf16.msra.mxu0 %v5444_v51  ;;  %v5479_v51 = vld [vmem:[%s6574_s10 + $0x24] ss:$16 sps:$4 sm:$0xff]  }
 0x97d   : > { %v2632_v8 = vpop.permute.xlu0 %2631  ;;  %v2630_v6 = vpop.permute.xlu1 %2629 }
 0x97e   : > { %2650 = vst.msk [vmem:[#allocation3 + $0x30] sm:$0xff] %vm2643_vm12, %v2632_v8  ;;  %2649 = vst.msk [vmem:[#allocation3 + $0x28] sm:$0xff] %vm2643_vm12, %v2630_v6  ;;  %v5449_v8 = vld [vmem:[%s6574_s10 + $0xc4] ss:$16 sps:$4 sm:$0xff]   ;;  %v5452_v6 = vld [vmem:[%s6574_s10 + $0xcc] ss:$16 sps:$4 sm:$0xff]  }
 0x97f   : > { %3146 = vmatprep.subr.bf16.mxu1 %v5449_v8  ;;  %3219 = vmatprep.subr.bf16.mxu0 %v5452_v6 }
 0x981   : > { %v2634_v23 = vpop.permute.xlu1 %2633  ;;  %v2656_v36 = vld [vmem:[#allocation3 + $0x20] sm:$0xff] }
 0x982   : > { %2651 = vst.msk [vmem:[#allocation3 + $0x38] sm:$0xff] %vm2643_vm12, %v2634_v23 }
 0x985   : > { %v2657_v28 = vld [vmem:[#allocation3 + $0x28] sm:$0xff]  ;;  %v2658_v16 = vld [vmem:[#allocation3 + $0x30] sm:$0xff] }
 0x986   : > { %v2662_v1 = vpack.c.bf16 %v2657_v28, %v2656_v36  ;;  %v5447_v36 = vld [vmem:[%s6574_s10 + $0xc0] ss:$16 sps:$4 sm:$0xff]   ;;  %v5450_v28 = vld [vmem:[%s6574_s10 + $0xc8] ss:$16 sps:$4 sm:$0xff]  }
 0x987   : > { %3147 = vmatpush1.bf16.msra.mxu1 %v5447_v36  ;;  %3220 = vmatpush1.bf16.msra.mxu0 %v5450_v28 }
 0x988   : > { %5215 = vmatprep.mubr.bf16.mxu0 %v2662_v1 }
 0x989   : > { %v2659_v59 = vld [vmem:[#allocation3 + $0x38] sm:$0xff] }
 0x98a   : > { %v2663_v22 = vpack.c.bf16 %v2659_v59, %v2658_v16  ;;  %v5455_v59 = vld [vmem:[%s6574_s10 + $0xa4] ss:$16 sps:$4 sm:$0xff]  }
 0x98b   : > { %3148 = vmatprep.subr.bf16.mxu1 %v5455_v59 }
 0x98c   : > { %5216 = vmatmul.mubr.bf16.gmra.mxu0 %v2663_v22  ;;  %v5458_v22 = vld [vmem:[%s6574_s10 + $0xac] ss:$16 sps:$4 sm:$0xff]  }
 0x98d   : > { %3249 = vmatprep.mubr.bf16.mxu0 %v8046_v17  ;;  %3221 = vmatprep.subr.bf16.mxu0 %v5458_v22 }
 0xa3a   : > { %v5213_v63 = vpop.f32.mrf.mxu0 }
 0xa3b   : > { %v2778_v38 = vadd.f32 %v5213_v63, %v4722_v10 }
 0xa3c   : > { %v2769_v42 = vpop.f32.mrf.mxu0 }
 0xa3d   : > { %v2770_v39 = vadd.f32 %v4722_v10, %v2769_v42  ;;  %v7467_v35 = vadd.f32 %v5682_v0, %v2778_v38  ;;  %v5453_v42 = vld [vmem:[%s6574_s10 + $0xa0] ss:$16 sps:$4 sm:$0xff]   ;;  %v5461_v0 = vld [vmem:[%s6574_s10 + $0x84] ss:$16 sps:$4 sm:$0xff]  }
 0xa3e   : > { %v5214_v21 = vpop.f32.mrf.mxu0  ;;  %3149 = vmatpush1.bf16.msra.mxu1 %v5453_v42 }
 0xa3f   : > { %v7464_v44 = vadd.f32 %v5681_v18, %v2770_v39  ;;  %v2781_v31 = vadd.f32 %v5214_v21, %v4722_v10  ;;  %v5456_v39 = vld [vmem:[%s6574_s10 + $0xa8] ss:$16 sps:$4 sm:$0xff]   ;;  %3150 = vmatprep.subr.bf16.mxu1 %v5461_v0 }
 0xa40   : > { %v2772_v33 = vpop.f32.mrf.mxu0  ;;  %3222 = vmatpush1.bf16.msra.mxu0 %v5456_v39 }
 0xa41   : > { %v2773_v45 = vadd.f32 %v4722_v10, %v2772_v33  ;;  %2810 = vadd.xlane.f32.xlu0 %v7464_v44  ;;  %v7473_v2 = vadd.f32 %v5684_v32, %v2781_v31  ;;  %v5464_v31 = vld [vmem:[%s6574_s10 + $0x8c] ss:$16 sps:$4 sm:$0xff]   ;;  %v5459_v32 = vld [vmem:[%s6574_s10 + $0x80] ss:$16 sps:$4 sm:$0xff]  }
 0xa42   : > { %3223 = vmatprep.subr.bf16.mxu0 %v5464_v31  ;;  %3151 = vmatpush1.bf16.msra.mxu1 %v5459_v32 }
 0xa43   : > { %v7469_v24 = vadd.f32 %v5683_v27, %v2773_v45 }
 0xa45   : > { %2812 = vadd.xlane.f32.xlu1 %v7469_v24  ;;  %2814 = vadd.xlane.f32.xlu0 %v7467_v35 }
 0xa49   : > { %2816 = vadd.xlane.f32.xlu0 %v7473_v2 }
 0xa4c   : > { %v5217_v12 = vpop.f32.mrf.mxu0 }
 0xa4d   : > { %v2794_v55 = vadd.f32 %v5217_v12, %v4722_v10  ;;  %v5462_v12 = vld [vmem:[%s6574_s10 + $0x88] ss:$16 sps:$4 sm:$0xff]  }
 0xa4e   : > { %v2785_v7 = vpop.f32.mrf.mxu0  ;;  %3224 = vmatpush1.bf16.msra.mxu0 %v5462_v12 }
 0xa4f   : > { %v2786_v13 = vadd.f32 %v4722_v10, %v2785_v7  ;;  %v7479_v15 = vadd.f32 %v5686_v54, %v2794_v55  ;;  %v5468_v54 = vld [vmem:[%s6574_s10 + $0x68] ss:$16 sps:$4 sm:$0xff]  }
 0xa50   : > { %v5218_v57 = vpop.f32.mrf.mxu0 }
 0xa51   : > { %v7476_v46 = vadd.f32 %v5685_v11, %v2786_v13  ;;  %v2797_v20 = vadd.f32 %v5218_v57, %v4722_v10  ;;  %v5467_v11 = vld [vmem:[%s6574_s10 + $0x64] ss:$16 sps:$4 sm:$0xff]  }
 0xa52   : > { %v2788_v30 = vpop.f32.mrf.mxu0  ;;  %3152 = vmatprep.subr.bf16.mxu1 %v5467_v11 }
 0xa53   : > { %v2789_v14 = vadd.f32 %v4722_v10, %v2788_v30  ;;  %2818 = vadd.xlane.f32.xlu0 %v7476_v46  ;;  %v7485_v26 = vadd.f32 %v5688_v4, %v2797_v20  ;;  %v5470_v30 = vld [vmem:[%s6574_s10 + $0x6c] ss:$16 sps:$4 sm:$0xff]  }
 0xa54   : > { %3225 = vmatprep.subr.bf16.mxu0 %v5470_v30  ;;  %v5476_v4 = vld [vmem:[%s6574_s10 + $0x4c] ss:$16 sps:$4 sm:$0xff]  }
 0xa55   : > { %v7481_v9 = vadd.f32 %v5687_v52, %v2789_v14  ;;  %v5465_v14 = vld [vmem:[%s6574_s10 + $0x60] ss:$16 sps:$4 sm:$0xff]   ;;  %3226 = vmatpush1.bf16.msra.mxu0 %v5468_v54  ;;  %v5473_v52 = vld [vmem:[%s6574_s10 + $0x44] ss:$16 sps:$4 sm:$0xff]  }
 0xa56   : > { %3153 = vmatpush1.bf16.msra.mxu1 %v5465_v14  ;;  %3227 = vmatprep.subr.bf16.mxu0 %v5476_v4 }
 0xa57   : > { %2820 = vadd.xlane.f32.xlu1 %v7481_v9  ;;  %2822 = vadd.xlane.f32.xlu0 %v7479_v15 }
 0xa58   : > { %3154 = vmatprep.subr.bf16.mxu1 %v5473_v52 }
 0xa59   : > { %3228 = vmatpush1.bf16.msra.mxu0 %v5474_v49 }
 0xa5a   : > { %3155 = vmatpush1.bf16.msra.mxu1 %v5471_v58  ;;  %3229 = vmatprep.subr.bf16.mxu0 %v5482_v3 }
 0xa5b   : > { %2824 = vadd.xlane.f32.xlu1 %v7485_v26  ;;  %3156 = vmatprep.subr.bf16.mxu1 %v5479_v51 }
 0xaca   : > { %v2811_v29 = vpop.xlane.xlu0 %2810 }
 0xacb   : > { %v2826_v61 = vmul.f32 0.0078125, %v2811_v29  ;;  %v5477_v29 = vld [vmem:[%s6574_s10 + $0x20] ss:$16 sps:$4 sm:$0xff]  }
 0xacc   : > { %3157 = vmatpush1.bf16.msra.mxu1 %v5477_v29  ;;  %v5491_v29 = vld [vmem:[%s6576_s20 + $0x38] sm:$0xff]  }
 0xacd   : > { %v7493_v47 = vsub.f32 %v7464_v44, %v2826_v61  ;;  %v5480_v61 = vld [vmem:[%s6574_s10 + $0x28] ss:$16 sps:$4 sm:$0xff]  }
 0xace   : > { %v2815_v41 = vpop.xlane.xlu0 %2814  ;;  %v2813_v40 = vpop.xlane.xlu1 %2812  ;;  %3230 = vmatpush1.bf16.msra.mxu0 %v5480_v61  ;;  %v5492_v61 = vld [vmem:[%s6576_s20 + $0xb8] sm:$0xff]  }
 0xacf   : > { %v2828_v43 = vmul.f32 0.0078125, %v2815_v41  ;;  %v2827_v25 = vmul.f32 0.0078125, %v2813_v40  ;;  %v2842_v50 = vmul.f32 %v7493_v47, %v7493_v47  ;;  %v5485_v41 = vld [vmem:[%s6574_s10 + $0x4] ss:$16 sps:$4 sm:$0xff]   ;;  %v5488_v40 = vld [vmem:[%s6574_s10 + $0xc] ss:$16 sps:$4 sm:$0xff]  }
 0xad0   : > { %3158 = vmatprep.subr.bf16.mxu1 %v5485_v41  ;;  %3231 = vmatprep.subr.bf16.mxu0 %v5488_v40  ;;  %v5493_v41 = vld [vmem:[%s6576_s20 + $0x70] sm:$0xff]  }
 0xad1   : > { %v7498_v37 = vsub.f32 %v7467_v35, %v2828_v43  ;;  %v7501_v62 = vsub.f32 %v7469_v24, %v2827_v25  ;;  %2850 = vadd.xlane.f32.xlu0 %v2842_v50  ;;  %v5483_v43 = vld [vmem:[%s6574_s10] ss:$16 sps:$4 sm:$0xff]   ;;  %v5486_v25 = vld [vmem:[%s6574_s10 + $0x8] ss:$16 sps:$4 sm:$0xff]   ;;  %s8055_s10 = scalar_lea.vmem [#allocation12], %s6550_s8 }
 0xad2   : > { %v2817_v19 = vpop.xlane.xlu0 %2816  ;;  %3159 = vmatpush1.bf16.msra.mxu1 %v5483_v43  ;;  %3232 = vmatpush1.bf16.msra.mxu0 %v5486_v25  ;;  %v5489_v50 = vld [vmem:[%s6576_s20 + $0x78] sm:$0xff]   ;;  %v5495_v43 = vld [vmem:[%s6576_s20 + $0x30] sm:$0xff]  }
 0xad3   : > { %v2829_v34 = vmul.f32 0.0078125, %v2817_v19  ;;  %v2844_v5 = vmul.f32 %v7498_v37, %v7498_v37  ;;  %v2843_v60 = vmul.f32 %v7501_v62, %v7501_v62  ;;  %v5490_v19 = vld [vmem:[%s6576_s20 + $0xf8] sm:$0xff]   ;;  %4963 = vmatprep.subr.bf16.mxu1 %v5489_v50  ;;  %v5496_v25 = vld [vmem:[%s6576_s20 + $0xb0] sm:$0xff]   ;;  %v5497_v50 = vld [vmem:[%s6576_s20 + $0x68] sm:$0xff]  }
 0xad4   : > { %5003 = vmatprep.subr.bf16.mxu0 %v5490_v19  ;;  %v5498_v19 = vld [vmem:[%s6576_s20 + $0xe8] sm:$0xff]  }
 0xad5   : > { %v7508_v48 = vsub.f32 %v7473_v2, %v2829_v34  ;;  %2854 = vadd.xlane.f32.xlu0 %v2844_v5  ;;  %2852 = vadd.xlane.f32.xlu1 %v2843_v60 }
 0xad7   : > { %v2845_v53 = vmul.f32 %v7508_v48, %v7508_v48 }
 0xad9   : > { %2856 = vadd.xlane.f32.xlu1 %v2845_v53 }
 0xadc   : > { %v2819_v23 = vpop.xlane.xlu0 %2818 }
 0xadd   : > { %v2830_v1 = vmul.f32 0.0078125, %v2819_v23 }
 0xadf   : > { %v7517_v16 = vsub.f32 %v7476_v46, %v2830_v1 }
 0xae0   : > { %v2823_v63 = vpop.xlane.xlu0 %2822  ;;  %v2821_v10 = vpop.xlane.xlu1 %2820 }
 0xae1   : > { %v2832_v21 = vmul.f32 0.0078125, %v2823_v63  ;;  %v2831_v38 = vmul.f32 0.0078125, %v2821_v10  ;;  %v2846_v18 = vmul.f32 %v7517_v16, %v7517_v16 }
 0xae3   : > { %v7526_v33 = vsub.f32 %v7479_v15, %v2832_v21  ;;  %v7529_v45 = vsub.f32 %v7481_v9, %v2831_v38  ;;  %2858 = vadd.xlane.f32.xlu0 %v2846_v18  ;;  %v7565_v21 = vld [vmem:[%s8055_s10] ss:$0 sm:$0xff] }
 0xae4   : > { %v2825_v27 = vpop.xlane.xlu1 %2824 }
 0xae5   : > { %v2833_v7 = vmul.f32 0.0078125, %v2825_v27  ;;  %v2848_v13 = vmul.f32 %v7526_v33, %v7526_v33  ;;  %v2847_v57 = vmul.f32 %v7529_v45, %v7529_v45 }
 0xae7   : > { %v7540_v55 = vsub.f32 %v7485_v26, %v2833_v7  ;;  %2862 = vadd.xlane.f32.xlu0 %v2848_v13  ;;  %2860 = vadd.xlane.f32.xlu1 %v2847_v57 }
 0xae9   : > { %v2849_v20 = vmul.f32 %v7540_v55, %v7540_v55 }
 0xaeb   : > { %2864 = vadd.xlane.f32.xlu1 %v2849_v20 }
 0xb5a   : > { %v2851_v34 = vpop.xlane.xlu0 %2850 }
 0xb5b   : > { %v2866_v5 = vmul.f32 0.0078125, %v2851_v34 }
 0xb5d   : > { %v2874_v60 = vadd.f32 1e-05, %v2866_v5 }
 0xb5e   : > { %v2855_v53 = vpop.xlane.xlu0 %2854  ;;  %v2853_v8 = vpop.xlane.xlu1 %2852 }
 0xb5f   : > { %5665 = vrsqrt.f32 %v2874_v60  ;;  %v2868_v6 = vmul.f32 0.0078125, %v2855_v53  ;;  %v2867_v23 = vmul.f32 0.0078125, %v2853_v8  ;;  %v5499_v53 = vld [vmem:[%s6576_s20 + $0x28] sm:$0xff]  }
 0xb60   : > { %v5500_v8 = vld [vmem:[%s6576_s20 + $0xa8] sm:$0xff]  }
 0xb61   : > { %v2875_v36 = vadd.f32 1e-05, %v2867_v23  ;;  %v2876_v28 = vadd.f32 1e-05, %v2868_v6  ;;  %v5501_v23 = vld [vmem:[%s6576_s20 + $0x60] sm:$0xff]  }
 0xb62   : > { %v2857_v1 = vpop.xlane.xlu1 %2856 }
 0xb63   : > { %v2869_v59 = vmul.f32 0.0078125, %v2857_v1  ;;  %5667 = vrsqrt.f32 %v2875_v36  ;;  %v5502_v36 = vld [vmem:[%s6576_s20 + $0xe0] sm:$0xff]  }
 0xb64   : > { %5669 = vrsqrt.f32 %v2876_v28  ;;  %v5503_v1 = vld [vmem:[%s6576_s20 + $0x20] sm:$0xff]  }
 0xb65   : > { %v2877_v22 = vadd.f32 1e-05, %v2869_v59  ;;  %v5504_v59 = vld [vmem:[%s6576_s20 + $0xa0] sm:$0xff]  }
 0xb67   : > { %5671 = vrsqrt.f32 %v2877_v22 }
 0xb6c   : > { %v5666_v63 = vpop.eup %5665  ;;  %v2859_v42 = vpop.xlane.xlu0 %2858 }
 0xb6d   : > { %v2890_v10 = vmul.f32 %v5666_v63, %v7493_v47  ;;  %v2870_v39 = vmul.f32 0.0078125, %v2859_v42  ;;  %v7571_v47 = vld [vmem:[%s8056_s2] ss:$0 sm:$0xff] }
 0xb6e   : > { %v5505_v63 = vld [vmem:[%s6576_s20 + $0x58] sm:$0xff]  }
 0xb6f   : > { %v2878_v38 = vadd.f32 1e-05, %v2870_v39  ;;  %v2904_v27 = vmul.f32 %v7565_v21, %v2890_v10  ;;  %v5506_v10 = vld [vmem:[%s6576_s20 + $0xd8] sm:$0xff]  }
 0xb70   : > { %v5668_v18 = vpop.eup %5667  ;;  %v2863_v0 = vpop.xlane.xlu0 %2862 }
 0xb71   : > { %v2861_v31 = vpop.xlane.xlu1 %2860  ;;  %v2891_v32 = vmul.f32 %v5668_v18, %v7501_v62  ;;  %5673 = vrsqrt.f32 %v2878_v38  ;;  %v2872_v12 = vmul.f32 0.0078125, %v2863_v0  ;;  %v5670_v13 = vpop.eup %5669  ;;  %v2918_v52 = vadd.f32 %v7571_v47, %v2904_v27  ;;  %v5507_v0 = vld [vmem:[%s6576_s20 + $0x18] sm:$0xff]  }
 0xb72   : > { %v2871_v7 = vmul.f32 0.0078125, %v2861_v31  ;;  %v2892_v58 = vmul.f32 %v5670_v13, %v7498_v37  ;;  %v5508_v31 = vld [vmem:[%s6576_s20 + $0x98] sm:$0xff]  }
 0xb73   : > { %v2905_v30 = vmul.f32 %v7565_v21, %v2891_v32  ;;  %v2880_v14 = vadd.f32 1e-05, %v2872_v12 }
 0xb74   : > { %v5672_v57 = vpop.eup %5671  ;;  %v2879_v11 = vadd.f32 1e-05, %v2871_v7  ;;  %v2906_v40 = vmul.f32 %v7565_v21, %v2892_v58  ;;  %v5520_v58 = vld [vmem:[%s6576_s20 + $0x80] sm:$0xff]  }
 0xb75   : > { %v2865_v54 = vpop.xlane.xlu1 %2864  ;;  %v2893_v20 = vmul.f32 %v5672_v57, %v7508_v48  ;;  %v2919_v4 = vadd.f32 %v7571_v47, %v2905_v30  ;;  %v5494_v48 = vld [vmem:[%s6576_s20 + $0xf0] sm:$0xff]  }
 0xb76   : > { %v2873_v62 = vmul.f32 0.0078125, %v2865_v54  ;;  %5675 = vrsqrt.f32 %v2879_v11  ;;  %v2920_v34 = vadd.f32 %v7571_v47, %v2906_v40  ;;  %v5509_v11 = vld [vmem:[%s6576_s20 + $0x50] sm:$0xff]   ;;  %v5514_v54 = vld [vmem:[%s6576_s20 + $0xc8] sm:$0xff]  }
 0xb77   : > { %v2926_v51 = vpack.c.bf16 %v2919_v4, %v2918_v52  ;;  %v2907_v3 = vmul.f32 %v7565_v21, %v2893_v20  ;;  %5677 = vrsqrt.f32 %v2880_v14  ;;  %v5510_v30 = vld [vmem:[%s6576_s20 + $0xd0] sm:$0xff]   ;;  %v5515_v20 = vld [vmem:[%s6576_s20 + $0x8] sm:$0xff]   ;;  %v5518_v52 = vld [vmem:[%s6576_s20 + $0xc0] sm:$0xff]  }
 0xb78   : > { %v2881_v49 = vadd.f32 1e-05, %v2873_v62  ;;  %v5512_v14 = vld [vmem:[%s6576_s20 + $0x90] sm:$0xff]   ;;  %v5516_v62 = vld [vmem:[%s6576_s20 + $0x88] sm:$0xff]   ;;  %v5519_v4 = vld [vmem:[%s6576_s20] sm:$0xff]  }
 0xb79   : > { %3177 = vmatmul.mubr.bf16.vlgmr.msra.gmra.mxu1 %v2926_v51  ;;  %3250 = vmatmul.mubr.bf16.vlgmr.msra.gmra.mxu0 %v2926_v51  ;;  %v2921_v37 = vadd.f32 %v7571_v47, %v2907_v3  ;;  %v2978_v51 = vsub.s32 3, %v6751_v56  ;;  %v2966_v3 = vsub.s32 0, %v6751_v56 }
 0xb7a   : > { %5679 = vrsqrt.f32 %v2881_v49  ;;  %3186 = vmatprep.mubr.bf16.mxu1 %v8046_v17  ;;  %3259 = vmatprep.mubr.bf16.mxu0 %v8046_v17  ;;  %v2970_v49 = vsub.s32 1, %v6751_v56 }
 0xb7b   : > { %4964 = vmatpush3.bf16.msra.mxu1 %v5491_v29  ;;  %5004 = vmatpush3.bf16.msra.mxu0 %v5492_v61  ;;  %v2927_v60 = vpack.c.bf16 %v2921_v37, %v2920_v34  ;;  %v2974_v29 = vsub.s32 2, %v6751_v56  ;;  %v2962_v61 = vld [vmem:[%s6607_s24] sm:$0xf] }
 0xb7c   : > { %4965 = vmatprep.subr.bf16.mxu1 %v5493_v41  ;;  %5005 = vmatprep.subr.bf16.mxu0 %v5494_v48  ;;  %v7637_v40 = vrot.slane %v2962_v61, %v2970_v49  ;;  %v7641_v37 = vrot.slane %v2962_v61, %v2978_v51 }
 0xb7e   : > { %v5674_v5 = vpop.eup %5673 }
 0xb7f   : > { %4966 = vmatpush3.bf16.msra.mxu1 %v5495_v43  ;;  %5006 = vmatpush3.bf16.msra.mxu0 %v5496_v25  ;;  %v2894_v6 = vmul.f32 %v5674_v5, %v7517_v16  ;;  %v7645_v43 = vrot.slane %v2962_v61, %v2966_v3  ;;  %v7649_v25 = vrot.slane %v2962_v61, %v2974_v29 }
 0xb80   : > { %4967 = vmatprep.subr.bf16.mxu1 %v5497_v50  ;;  %5007 = vmatprep.subr.bf16.mxu0 %v5498_v19 }
 0xb81   : > { %3187 = vmatmul.mubr.bf16.gmra.mxu1 %v2927_v60  ;;  %3260 = vmatmul.mubr.bf16.gmra.mxu0 %v2927_v60  ;;  %v2908_v22 = vmul.f32 %v7565_v21, %v2894_v6 }
 0xb82   : > { %3196 = vmatprep.mubr.bf16.mxu1 %v8046_v17  ;;  %3269 = vmatprep.mubr.bf16.mxu0 %v8046_v17 }
 0xb83   : > { %v5676_v28 = vpop.eup %5675  ;;  %4968 = vmatpush3.bf16.msra.mxu1 %v5499_v53  ;;  %5008 = vmatpush3.bf16.msra.mxu0 %v5500_v8  ;;  %v2922_v27 = vadd.f32 %v7571_v47, %v2908_v22 }
 0xb84   : > { %v2895_v16 = vmul.f32 %v5676_v28, %v7529_v45  ;;  %4969 = vmatprep.subr.bf16.mxu1 %v5501_v23  ;;  %5009 = vmatprep.subr.bf16.mxu0 %v5502_v36  ;;  %v5678_v42 = vpop.eup %5677 }
 0xb85   : > { %v2896_v32 = vmul.f32 %v5678_v42, %v7526_v33 }
 0xb86   : > { %v2909_v38 = vmul.f32 %v7565_v21, %v2895_v16 }
 0xb87   : > { %v5680_v39 = vpop.eup %5679  ;;  %4970 = vmatpush3.bf16.msra.mxu1 %v5503_v1  ;;  %5010 = vmatpush3.bf16.msra.mxu0 %v5504_v59 }
 0xb88   : > { %v2897_v18 = vmul.f32 %v5680_v39, %v7540_v55  ;;  %v2923_v45 = vadd.f32 %v7571_v47, %v2909_v38  ;;  %4971 = vmatprep.subr.bf16.mxu1 %v5505_v63  ;;  %5011 = vmatprep.subr.bf16.mxu0 %v5506_v10  ;;  %v2910_v55 = vmul.f32 %v7565_v21, %v2896_v32 }
 0xb8a   : > { %v2928_v12 = vpack.c.bf16 %v2923_v45, %v2922_v27  ;;  %v2911_v7 = vmul.f32 %v7565_v21, %v2897_v18  ;;  %v2924_v13 = vadd.f32 %v7571_v47, %v2910_v55  ;;  %v5511_v21 = vld [vmem:[%s6576_s20 + $0x10] sm:$0xff]  }
 0xb8b   : > { %4972 = vmatpush3.bf16.msra.mxu1 %v5507_v0  ;;  %5012 = vmatpush3.bf16.msra.mxu0 %v5508_v31 }
 0xb8c   : > { %3197 = vmatmul.mubr.bf16.gmra.mxu1 %v2928_v12  ;;  %3270 = vmatmul.mubr.bf16.gmra.mxu0 %v2928_v12  ;;  %v2925_v33 = vadd.f32 %v7571_v47, %v2911_v7  ;;  %v5517_v47 = vld [vmem:[%s6576_s20 + $0x40] sm:$0xff]  }
 0xb8d   : > { %3206 = vmatprep.mubr.bf16.mxu1 %v8046_v17  ;;  %3279 = vmatprep.mubr.bf16.mxu0 %v8046_v17  ;;  %v5513_v17 = vld [vmem:[%s6576_s20 + $0x48] sm:$0xff]  }
 0xb8e   : > { %v2929_v57 = vpack.c.bf16 %v2925_v33, %v2924_v13  ;;  %4973 = vmatprep.subr.bf16.mxu1 %v5509_v11  ;;  %5013 = vmatprep.subr.bf16.mxu0 %v5510_v30 }
 0xb8f   : > { %4974 = vmatpush3.bf16.msra.mxu1 %v5511_v21  ;;  %5014 = vmatpush3.bf16.msra.mxu0 %v5512_v14 }
 0xb90   : > { %4975 = vmatprep.subr.bf16.mxu1 %v5513_v17  ;;  %5015 = vmatprep.subr.bf16.mxu0 %v5514_v54 }
 0xb93   : > { %4976 = vmatpush3.bf16.msra.mxu1 %v5515_v20  ;;  %5016 = vmatpush3.bf16.msra.mxu0 %v5516_v62 }
 0xb94   : > { %3207 = vmatmul.mubr.bf16.gmra.mxu1 %v2929_v57  ;;  %3280 = vmatmul.mubr.bf16.gmra.mxu0 %v2929_v57 }
 0xb95   : > { %4977 = vmatprep.subr.bf16.mxu1 %v5517_v47  ;;  %5017 = vmatprep.subr.bf16.mxu0 %v5518_v52 }
 0xb97   : > { %4978 = vmatpush3.bf16.msra.mxu1 %v5519_v4  ;;  %5018 = vmatpush3.bf16.msra.mxu0 %v5520_v58 }
 0xc39   : > { %v3178_v41 = vpop.f32.mrf.mxu1  ;;  %v3251_v48 = vpop.f32.mrf.mxu0 }
 0xc3a   : > { %v3179_v23 = vadd.f32 %v3178_v41, %v7645_v43  ;;  %v3252_v36 = vadd.f32 %v3251_v48, %v7649_v25 }
 0xc3b   : > { %v3180_v50 = vpop.f32.mrf.mxu1  ;;  %v3253_v19 = vpop.f32.mrf.mxu0 }
 0xc3c   : > { %v3181_v60 = vadd.f32 %v3180_v50, %v7637_v40  ;;  %v3254_v53 = vadd.f32 %v3253_v19, %v7641_v37  ;;  %v3290_v31 = vmax.f32 %v3179_v23, 0.0  ;;  %v3292_v27 = vmax.f32 %v3252_v36, 0.0 }
 0xc3d   : > { %v3182_v34 = vpop.f32.mrf.mxu1  ;;  %v3255_v5 = vpop.f32.mrf.mxu0 }
 0xc3e   : > { %v3183_v8 = vadd.f32 %v3182_v34, %v7645_v43  ;;  %v3256_v6 = vadd.f32 %v3255_v5, %v7649_v25  ;;  %v3291_v39 = vmax.f32 %v3181_v60, 0.0  ;;  %v3293_v38 = vmax.f32 %v3254_v53, 0.0 }
 0xc3f   : > { %v3184_v28 = vpop.f32.mrf.mxu1  ;;  %v3257_v1 = vpop.f32.mrf.mxu0 }
 0xc40   : > { %v3185_v59 = vadd.f32 %v3184_v28, %v7637_v40  ;;  %v3258_v16 = vadd.f32 %v3257_v1, %v7641_v37  ;;  %v3294_v22 = vmax.f32 %v3183_v8, 0.0  ;;  %v3296_v63 = vmax.f32 %v3256_v6, 0.0 }
 0xc41   : > { %v3188_v10 = vpop.f32.mrf.mxu1  ;;  %v3261_v42 = vpop.f32.mrf.mxu0 }
 0xc42   : > { %v3295_v18 = vmax.f32 %v3185_v59, 0.0  ;;  %v3297_v0 = vmax.f32 %v3258_v16, 0.0  ;;  %v3322_v55 = vpack.c.bf16 %v3294_v22, %v3290_v31  ;;  %v3324_v33 = vpack.c.bf16 %v3296_v63, %v3292_v27 }
 0xc43   : > { %v3190_v45 = vpop.f32.mrf.mxu1  ;;  %v3263_v32 = vpop.f32.mrf.mxu0  ;;  %v3189_v17 = vadd.f32 %v3188_v10, %v7645_v43  ;;  %v3262_v54 = vadd.f32 %v3261_v42, %v7649_v25 }
 0xc44   : > { %v3323_v12 = vpack.c.bf16 %v3295_v18, %v3291_v39  ;;  %v3325_v7 = vpack.c.bf16 %v3297_v0, %v3293_v38  ;;  %v3191_v13 = vadd.f32 %v3190_v45, %v7637_v40  ;;  %v3264_v30 = vadd.f32 %v3263_v32, %v7641_v37 }
 0xc45   : > { %v3192_v57 = vpop.f32.mrf.mxu1  ;;  %v3265_v11 = vpop.f32.mrf.mxu0  ;;  %v3298_v19 = vmax.f32 %v3189_v17, 0.0  ;;  %v3300_v34 = vmax.f32 %v3262_v54, 0.0 }
 0xc46   : > { %v3193_v21 = vadd.f32 %v3192_v57, %v7645_v43  ;;  %v3266_v14 = vadd.f32 %v3265_v11, %v7649_v25  ;;  %3633 = vmatprep.mubr.bf16.mxu1 %v3323_v12  ;;  %3698 = vmatprep.mubr.bf16.mxu0 %v3325_v7  ;;  %v3299_v61 = vmax.f32 %v3191_v13, 0.0  ;;  %v3301_v41 = vmax.f32 %v3264_v30, 0.0 }
 0xc47   : > { %v3194_v20 = vpop.f32.mrf.mxu1  ;;  %v3267_v62 = vpop.f32.mrf.mxu0  ;;  %3634 = vmatmul.mubr.bf16.vlgmr.msra.gmra.mxu1 %v3322_v55  ;;  %3699 = vmatmul.mubr.bf16.vlgmr.msra.gmra.mxu0 %v3324_v33 }
 0xc48   : > { %v3195_v47 = vadd.f32 %v3194_v20, %v7637_v40  ;;  %v3268_v52 = vadd.f32 %v3267_v62, %v7641_v37  ;;  %v3302_v4 = vmax.f32 %v3193_v21, 0.0  ;;  %v3304_v58 = vmax.f32 %v3266_v14, 0.0 }
 0xc4a   : > { %v3303_v48 = vmax.f32 %v3195_v47, 0.0  ;;  %v3305_v50 = vmax.f32 %v3268_v52, 0.0  ;;  %v3326_v6 = vpack.c.bf16 %v3302_v4, %v3298_v19  ;;  %v3328_v23 = vpack.c.bf16 %v3304_v58, %v3300_v34 }
 0xc4c   : > { %v3327_v5 = vpack.c.bf16 %v3303_v48, %v3299_v61  ;;  %v3329_v60 = vpack.c.bf16 %v3305_v50, %v3301_v41  ;;  %v3198_v53 = vpop.f32.mrf.mxu1  ;;  %v3271_v8 = vpop.f32.mrf.mxu0 }
 0xc4d   : > { %v3199_v42 = vadd.f32 %v3198_v53, %v7645_v43  ;;  %v3272_v39 = vadd.f32 %v3271_v8, %v7649_v25 }
 0xc4e   : > { %v3200_v36 = vpop.f32.mrf.mxu1  ;;  %v3273_v28 = vpop.f32.mrf.mxu0  ;;  %3641 = vmatprep.mubr.bf16.mxu1 %v3327_v5  ;;  %3706 = vmatprep.mubr.bf16.mxu0 %v3329_v60 }
 0xc4f   : > { %3642 = vmatmul.mubr.bf16.gmra.mxu1 %v3326_v6  ;;  %3707 = vmatmul.mubr.bf16.gmra.mxu0 %v3328_v23  ;;  %v3201_v16 = vadd.f32 %v3200_v36, %v7637_v40  ;;  %v3274_v22 = vadd.f32 %v3273_v28, %v7641_v37  ;;  %v3306_v57 = vmax.f32 %v3199_v42, 0.0  ;;  %v3308_v11 = vmax.f32 %v3272_v39, 0.0 }
 0xc50   : > { %v3202_v1 = vpop.f32.mrf.mxu1  ;;  %v3275_v59 = vpop.f32.mrf.mxu0 }
 0xc51   : > { %v3203_v63 = vadd.f32 %v3202_v1, %v7645_v43  ;;  %v3276_v10 = vadd.f32 %v3275_v59, %v7649_v25  ;;  %v3307_v7 = vmax.f32 %v3201_v16, 0.0  ;;  %v3309_v55 = vmax.f32 %v3274_v22, 0.0 }
 0xc52   : > { %v3204_v38 = vpop.f32.mrf.mxu1  ;;  %v3277_v18 = vpop.f32.mrf.mxu0 }
 0xc53   : > { %v3205_v0 = vadd.f32 %v3204_v38, %v7637_v40  ;;  %v3278_v31 = vadd.f32 %v3277_v18, %v7641_v37  ;;  %v3310_v27 = vmax.f32 %v3203_v63, 0.0  ;;  %v3312_v45 = vmax.f32 %v3276_v10, 0.0 }
 0xc54   : > { %v3208_v32 = vpop.f32.mrf.mxu1  ;;  %v3281_v12 = vpop.f32.mrf.mxu0 }
 0xc55   : > { %v3311_v33 = vmax.f32 %v3205_v0, 0.0  ;;  %v3313_v13 = vmax.f32 %v3278_v31, 0.0  ;;  %v3330_v54 = vpack.c.bf16 %v3310_v27, %v3306_v57  ;;  %v3332_v20 = vpack.c.bf16 %v3312_v45, %v3308_v11 }
 0xc56   : > { %v3210_v30 = vpop.f32.mrf.mxu1  ;;  %v3283_v21 = vpop.f32.mrf.mxu0  ;;  %v3209_v41 = vadd.f32 %v3208_v32, %v7645_v43  ;;  %v3282_v48 = vadd.f32 %v3281_v12, %v7649_v25 }
 0xc57   : > { %v3331_v14 = vpack.c.bf16 %v3311_v33, %v3307_v7  ;;  %v3333_v17 = vpack.c.bf16 %v3313_v13, %v3309_v55  ;;  %v3211_v62 = vadd.f32 %v3210_v30, %v7637_v40  ;;  %v3284_v4 = vadd.f32 %v3283_v21, %v7641_v37 }
 0xc58   : > { %v3212_v47 = vpop.f32.mrf.mxu1  ;;  %v3285_v52 = vpop.f32.mrf.mxu0  ;;  %v3314_v28 = vmax.f32 %v3209_v41, 0.0  ;;  %v3316_v1 = vmax.f32 %v3282_v48, 0.0 }
 0xc59   : > { %v3213_v58 = vadd.f32 %v3212_v47, %v7645_v43  ;;  %v3286_v61 = vadd.f32 %v3285_v52, %v7649_v25  ;;  %3649 = vmatprep.mubr.bf16.mxu1 %v3331_v14  ;;  %3714 = vmatprep.mubr.bf16.mxu0 %v3333_v17  ;;  %v3315_v8 = vmax.f32 %v3211_v62, 0.0  ;;  %v3317_v6 = vmax.f32 %v3284_v4, 0.0 }
 0xc5a   : > { %v3214_v50 = vpop.f32.mrf.mxu1  ;;  %v3287_v19 = vpop.f32.mrf.mxu0  ;;  %3650 = vmatmul.mubr.bf16.gmra.mxu1 %v3330_v54  ;;  %3715 = vmatmul.mubr.bf16.gmra.mxu0 %v3332_v20 }
 0xc5b   : > { %v3215_v34 = vadd.f32 %v3214_v50, %v7637_v40  ;;  %v3288_v5 = vadd.f32 %v3287_v19, %v7641_v37  ;;  %v3318_v60 = vmax.f32 %v3213_v58, 0.0  ;;  %v3320_v53 = vmax.f32 %v3286_v61, 0.0  ;;  %v7688_v37 = vld [vmem:[%s877_s28] ss:$0 sm:$0xff]  ;;  %s8058_s28 = sld [smem:[#allocation31_spill]] }
 0xc5d   : > { %v3319_v23 = vmax.f32 %v3215_v34, 0.0  ;;  %v3321_v36 = vmax.f32 %v3288_v5, 0.0  ;;  %v3334_v25 = vpack.c.bf16 %v3318_v60, %v3314_v28  ;;  %v3336_v16 = vpack.c.bf16 %v3320_v53, %v3316_v1 }
 0xc5f   : > { %v3335_v43 = vpack.c.bf16 %v3319_v23, %v3315_v8  ;;  %v3337_v59 = vpack.c.bf16 %v3321_v36, %v3317_v6 }
 0xc61   : > { %3657 = vmatprep.mubr.bf16.mxu1 %v3335_v43  ;;  %3722 = vmatprep.mubr.bf16.mxu0 %v3337_v59  ;;  %p4798_p8 = scmp.ne.s32.totalorder %s8058_s28, 1 }
 0xc62   : > { %3658 = vmatmul.mubr.bf16.gmra.mxu1 %v3334_v25  ;;  %3723 = vmatmul.mubr.bf16.gmra.mxu0 %v3336_v16  ;;  %s8059_s16 = sld [smem:[#allocation62_spill]] (!%p4798_p8) }
 0xc63   : > { %s8060_s7 = sld [smem:[#allocation63_spill]] (!%p4798_p8) }
 0xc64   : > { %s8061_s12 = sld [smem:[#allocation65_spill]] (!%p4798_p8) }
 0xd07   : > { %v4979_v40 = vpop.f32.mrf.mxu1  ;;  %v5019_v22 = vpop.f32.mrf.mxu0 }
 0xd09   : > { %v4980_v63 = vpop.f32.mrf.mxu1  ;;  %v5020_v10 = vpop.f32.mrf.mxu0 }
 0xd0a   : > { %v4981_v42 = vadd.f32 %v4980_v63, %v4979_v40  ;;  %v5021_v0 = vadd.f32 %v5020_v10, %v5019_v22 }
 0xd0b   : > { %v4982_v39 = vpop.f32.mrf.mxu1  ;;  %v5022_v38 = vpop.f32.mrf.mxu0 }
 0xd0c   : > { %v3636_v18 = vadd.f32 %v4981_v42, %v7688_v37 }
 0xd0d   : > { %v4983_v31 = vpop.f32.mrf.mxu1  ;;  %v5023_v27 = vpop.f32.mrf.mxu0 }
 0xd0e   : > { %v3701_v45 = vadd.f32 %v5021_v0, %v3636_v18  ;;  %v4984_v32 = vadd.f32 %v4983_v31, %v4982_v39  ;;  %v5024_v13 = vadd.f32 %v5023_v27, %v5022_v38 }
 0xd0f   : > { %v4985_v12 = vpop.f32.mrf.mxu1  ;;  %v5025_v7 = vpop.f32.mrf.mxu0 }
 0xd10   : > { %v7692_v55 = vadd.f32 %v3701_v45, %v7464_v44  ;;  %v3639_v33 = vadd.f32 %v4984_v32, %v7688_v37 }
 0xd11   : > { %v4986_v57 = vpop.f32.mrf.mxu1  ;;  %v5026_v11 = vpop.f32.mrf.mxu0 }
 0xd12   : > { %3739 = vst [vmem:[#allocation2 + $0x30] sm:$0xff] %v7692_v55  ;;  %v3704_v30 = vadd.f32 %v5024_v13, %v3639_v33  ;;  %v4987_v21 = vadd.f32 %v4986_v57, %v4985_v12  ;;  %v5027_v62 = vadd.f32 %v5026_v11, %v5025_v7 }
 0xd13   : > { %v4988_v14 = vpop.f32.mrf.mxu1  ;;  %v5028_v17 = vpop.f32.mrf.mxu0 }
 0xd14   : > { %v7697_v54 = vadd.f32 %v3704_v30, %v7469_v24  ;;  %v3644_v20 = vadd.f32 %v4987_v21, %v7688_v37 }
 0xd15   : > { %v4989_v47 = vpop.f32.mrf.mxu1  ;;  %v5029_v44 = vpop.f32.mrf.mxu0 }
 0xd16   : > { %3740 = vst [vmem:[#allocation2] sm:$0xff] %v7697_v54  ;;  %v3709_v52 = vadd.f32 %v5027_v62, %v3644_v20  ;;  %v4990_v4 = vadd.f32 %v4989_v47, %v4988_v14  ;;  %v5030_v41 = vadd.f32 %v5029_v44, %v5028_v17 }
 0xd18   : > { %v7702_v58 = vadd.f32 %v3709_v52, %v7467_v35  ;;  %v3647_v61 = vadd.f32 %v4990_v4, %v7688_v37 }
 0xd1a   : > { %3741 = vst [vmem:[#allocation2 + $0x18] sm:$0xff] %v7702_v58  ;;  %v3712_v48 = vadd.f32 %v5030_v41, %v3647_v61  ;;  %v4991_v24 = vpop.f32.mrf.mxu1  ;;  %v5031_v50 = vpop.f32.mrf.mxu0 }
 0xd1c   : > { %v7707_v19 = vadd.f32 %v3712_v48, %v7473_v2  ;;  %v4992_v34 = vpop.f32.mrf.mxu1  ;;  %v5032_v5 = vpop.f32.mrf.mxu0 }
 0xd1d   : > { %v4993_v60 = vadd.f32 %v4992_v34, %v4991_v24  ;;  %v5033_v6 = vadd.f32 %v5032_v5, %v5031_v50 }
 0xd1e   : > { %3742 = vst [vmem:[#allocation2 + $0x10] sm:$0xff] %v7707_v19  ;;  %v4994_v53 = vpop.f32.mrf.mxu1  ;;  %v5034_v8 = vpop.f32.mrf.mxu0 }
 0xd1f   : > { %v3652_v35 = vadd.f32 %v4993_v60, %v7688_v37 }
 0xd20   : > { %v4995_v23 = vpop.f32.mrf.mxu1  ;;  %v5035_v36 = vpop.f32.mrf.mxu0 }
 0xd21   : > { %v3717_v28 = vadd.f32 %v5033_v6, %v3652_v35  ;;  %v4996_v1 = vadd.f32 %v4995_v23, %v4994_v53  ;;  %v5036_v16 = vadd.f32 %v5035_v36, %v5034_v8 }
 0xd22   : > { %v4997_v43 = vpop.f32.mrf.mxu1  ;;  %v5037_v59 = vpop.f32.mrf.mxu0 }
 0xd23   : > { %v3735_v25 = vadd.f32 %v3717_v28, %v7476_v46  ;;  %v3655_v2 = vadd.f32 %v4996_v1, %v7688_v37 }
 0xd24   : > { %v4998_v40 = vpop.f32.mrf.mxu1  ;;  %v5038_v22 = vpop.f32.mrf.mxu0 }
 0xd25   : > { %3743 = vst [vmem:[#allocation2 + $0x8] sm:$0xff] %v3735_v25  ;;  %v3720_v63 = vadd.f32 %v5036_v16, %v3655_v2  ;;  %v4999_v10 = vadd.f32 %v4998_v40, %v4997_v43  ;;  %v5039_v0 = vadd.f32 %v5038_v22, %v5037_v59 }
 0xd26   : > { %v5000_v42 = vpop.f32.mrf.mxu1  ;;  %v5040_v39 = vpop.f32.mrf.mxu0 }
 0xd27   : > { %v3736_v38 = vadd.f32 %v3720_v63, %v7481_v9  ;;  %v3660_v18 = vadd.f32 %v4999_v10, %v7688_v37 }
 0xd28   : > { %v5001_v31 = vpop.f32.mrf.mxu1  ;;  %v5041_v27 = vpop.f32.mrf.mxu0 }
 0xd29   : > { %3744 = vst [vmem:[#allocation2 + $0x20] sm:$0xff] %v3736_v38  ;;  %v3725_v45 = vadd.f32 %v5039_v0, %v3660_v18  ;;  %v5002_v46 = vadd.f32 %v5001_v31, %v5000_v42  ;;  %v5042_v7 = vadd.f32 %v5041_v27, %v5040_v39 }
 0xd2b   : > { %v3737_v32 = vadd.f32 %v3725_v45, %v7479_v15  ;;  %v3663_v12 = vadd.f32 %v5002_v46, %v7688_v37 }
 0xd2d   : > { %3745 = vst [vmem:[#allocation2 + $0x28] sm:$0xff] %v3737_v32  ;;  %v3728_v33 = vadd.f32 %v5042_v7, %v3663_v12  ;;  %3750 = sbr.rel (%p4798_p8) target bundleno = 3918 (0xf4e), region = 128 }
 0xd2f   : > { %v3738_v13 = vadd.f32 %v3728_v33, %v7485_v26 }
 0xd31   : > { %3746 = vst [vmem:[#allocation2 + $0x38] sm:$0xff] %v3738_v13 }
 0xd32   : > { %3753 = vadd.xlane.f32.xlu0 %v7692_v55  ;;  %3757 = vadd.xlane.f32.xlu1 %v7702_v58  ;;  %v5689_v15 = vld [vmem:[#allocation18 + $0xe4] ss:$16 sps:$4 sm:$0xff]   ;;  %v5691_v9 = vld [vmem:[#allocation18 + $0xec] ss:$16 sps:$4 sm:$0xff]   ;;  %v5693_v8 = vld [vmem:[#allocation18 + $0xe0] ss:$16 sps:$4 sm:$0xff]  }
 0xd33   : > { %4087 = vmatprep.subr.bf16.mxu0 %v5689_v15  ;;  %4160 = vmatprep.subr.bf16.mxu1 %v5691_v9  ;;  %v5694_v35 = vld [vmem:[#allocation18 + $0xe8] ss:$16 sps:$4 sm:$0xff]   ;;  %v5695_v1 = vld [vmem:[#allocation18 + $0xc4] ss:$16 sps:$4 sm:$0xff]   ;;  %v5697_v43 = vld [vmem:[#allocation18 + $0xcc] ss:$16 sps:$4 sm:$0xff]  }
 0xd34   : > { %4088 = vmatpush1.bf16.msra.mxu0 %v5693_v8  ;;  %4161 = vmatpush1.bf16.msra.mxu1 %v5694_v35  ;;  %v5700_v2 = vld [vmem:[#allocation18 + $0xc8] ss:$16 sps:$4 sm:$0xff]   ;;  %v5701_v16 = vld [vmem:[#allocation18 + $0xa4] ss:$16 sps:$4 sm:$0xff]   ;;  %v5703_v40 = vld [vmem:[#allocation18 + $0xac] ss:$16 sps:$4 sm:$0xff]  }
 0xd35   : > { %4089 = vmatprep.subr.bf16.mxu0 %v5695_v1  ;;  %4162 = vmatprep.subr.bf16.mxu1 %v5697_v43  ;;  %v5705_v22 = vld [vmem:[#allocation18 + $0xa0] ss:$16 sps:$4 sm:$0xff]   ;;  %v5706_v63 = vld [vmem:[#allocation18 + $0xa8] ss:$16 sps:$4 sm:$0xff]   ;;  %v5707_v10 = vld [vmem:[#allocation18 + $0x84] ss:$16 sps:$4 sm:$0xff]  }
 0xd36   : > { %3755 = vadd.xlane.f32.xlu0 %v7697_v54  ;;  %3759 = vadd.xlane.f32.xlu1 %v7707_v19  ;;  %v5709_v42 = vld [vmem:[#allocation18 + $0x8c] ss:$16 sps:$4 sm:$0xff]   ;;  %v5711_v39 = vld [vmem:[#allocation18 + $0x80] ss:$16 sps:$4 sm:$0xff]   ;;  %v5713_v18 = vld [vmem:[#allocation18 + $0x64] ss:$16 sps:$4 sm:$0xff]  }
 0xd37   : > { %v5715_v0 = vld [vmem:[#allocation18 + $0x6c] ss:$16 sps:$4 sm:$0xff]   ;;  %v5717_v31 = vld [vmem:[#allocation18 + $0x60] ss:$16 sps:$4 sm:$0xff]   ;;  %v5718_v27 = vld [vmem:[#allocation18 + $0x68] ss:$16 sps:$4 sm:$0xff]  }
 0xd38   : > { %4163 = vmatpush1.bf16.msra.mxu1 %v5700_v2  ;;  %v5719_v45 = vld [vmem:[#allocation18 + $0x44] ss:$16 sps:$4 sm:$0xff]   ;;  %v5721_v46 = vld [vmem:[#allocation18 + $0x4c] ss:$16 sps:$4 sm:$0xff]   ;;  %v5724_v12 = vld [vmem:[#allocation18 + $0x48] ss:$16 sps:$4 sm:$0xff]  }
 0xd39   : > { %4164 = vmatprep.subr.bf16.mxu1 %v5703_v40  ;;  %v5725_v7 = vld [vmem:[#allocation18 + $0x24] ss:$16 sps:$4 sm:$0xff]   ;;  %v5727_v33 = vld [vmem:[#allocation18 + $0x2c] ss:$16 sps:$4 sm:$0xff]   ;;  %v5730_v15 = vld [vmem:[#allocation18 + $0x28] ss:$16 sps:$4 sm:$0xff]  }
 0xd3a   : > { %3761 = vadd.xlane.f32.xlu0 %v3735_v25  ;;  %3763 = vadd.xlane.f32.xlu1 %v3736_v38  ;;  %v5731_v9 = vld [vmem:[#allocation18 + $0x4] ss:$16 sps:$4 sm:$0xff]  }
 0xd3c   : > { %4165 = vmatpush1.bf16.msra.mxu1 %v5706_v63 }
 0xd3d   : > { %4166 = vmatprep.subr.bf16.mxu1 %v5709_v42  ;;  %v4800_v42 = vld [vmem:[%s8060_s7] ss:$0 sm:$0xff] }
 0xd3e   : > { %3765 = vadd.xlane.f32.xlu0 %v3737_v32  ;;  %3767 = vadd.xlane.f32.xlu1 %v3738_v13 }
 0xdbb   : > { %v3754_v26 = vpop.xlane.xlu0 %3753  ;;  %v3758_v37 = vpop.xlane.xlu1 %3757 }
 0xdbc   : > { %v3769_v57 = vmul.f32 0.0078125, %v3754_v26  ;;  %v3771_v11 = vmul.f32 0.0078125, %v3758_v37  ;;  %v5733_v26 = vld [vmem:[#allocation18 + $0xc] ss:$16 sps:$4 sm:$0xff]   ;;  %v6166_v37 = vmov 0  }
 0xdbd   : > { %4119 = vmatprep.mubr.bf16.mxu0 %v6166_v37  ;;  %4192 = vmatprep.mubr.bf16.mxu1 %v6166_v37 }
 0xdbe   : > { %v7724_v30 = vsub.f32 %v7692_v55, %v3769_v57  ;;  %v7727_v21 = vsub.f32 %v7702_v58, %v3771_v11  ;;  %v5735_v57 = vld [vmem:[#allocation18] ss:$16 sps:$4 sm:$0xff]   ;;  %v5736_v11 = vld [vmem:[#allocation18 + $0x8] ss:$16 sps:$4 sm:$0xff]  }
 0xdbf   : > { %v3756_v14 = vpop.xlane.xlu0 %3755  ;;  %v3760_v17 = vpop.xlane.xlu1 %3759 }
 0xdc0   : > { %v3770_v20 = vmul.f32 0.0078125, %v3756_v14  ;;  %v3785_v62 = vmul.f32 %v7724_v30, %v7724_v30  ;;  %v3772_v47 = vmul.f32 0.0078125, %v3760_v17  ;;  %v3787_v55 = vmul.f32 %v7727_v21, %v7727_v21 }
 0xdc2   : > { %v7732_v44 = vsub.f32 %v7697_v54, %v3770_v20  ;;  %3793 = vadd.xlane.f32.xlu0 %v3785_v62  ;;  %v7735_v52 = vsub.f32 %v7707_v19, %v3772_v47 }
 0xdc3   : > { %v3762_v4 = vpop.xlane.xlu0 %3761  ;;  %v3764_v58 = vpop.xlane.xlu1 %3763 }
 0xdc4   : > { %v3773_v61 = vmul.f32 0.0078125, %v3762_v4  ;;  %v3786_v41 = vmul.f32 %v7732_v44, %v7732_v44  ;;  %v3774_v48 = vmul.f32 0.0078125, %v3764_v58  ;;  %v3788_v50 = vmul.f32 %v7735_v52, %v7735_v52 }
 0xdc6   : > { %v7741_v24 = vsub.f32 %v3735_v25, %v3773_v61  ;;  %3797 = vadd.xlane.f32.xlu0 %v3787_v55  ;;  %3795 = vadd.xlane.f32.xlu1 %v3786_v41  ;;  %v7743_v54 = vsub.f32 %v3736_v38, %v3774_v48  ;;  %v5699_v25 = vld [vmem:[#allocation18 + $0xc0] ss:$16 sps:$4 sm:$0xff]   ;;  %v5712_v38 = vld [vmem:[#allocation18 + $0x88] ss:$16 sps:$4 sm:$0xff]  }
 0xdc7   : > { %v3766_v19 = vpop.xlane.xlu0 %3765  ;;  %v3768_v34 = vpop.xlane.xlu1 %3767  ;;  %4090 = vmatpush1.bf16.msra.mxu0 %v5699_v25  ;;  %4167 = vmatpush1.bf16.msra.mxu1 %v5712_v38  ;;  %v4799_v25 = vld [vmem:[%s8059_s16] ss:$0 sm:$0xff] }
 0xdc8   : > { %v3775_v5 = vmul.f32 0.0078125, %v3766_v19  ;;  %v3789_v60 = vmul.f32 %v7741_v24, %v7741_v24  ;;  %v3776_v53 = vmul.f32 0.0078125, %v3768_v34  ;;  %v3790_v36 = vmul.f32 %v7743_v54, %v7743_v54  ;;  %4091 = vmatprep.subr.bf16.mxu0 %v5701_v16  ;;  %4168 = vmatprep.subr.bf16.mxu1 %v5715_v0 }
 0xdca   : > { %v7749_v6 = vsub.f32 %v3737_v32, %v3775_v5  ;;  %3799 = vadd.xlane.f32.xlu1 %v3788_v50  ;;  %3801 = vadd.xlane.f32.xlu0 %v3789_v60  ;;  %v7751_v23 = vsub.f32 %v3738_v13, %v3776_v53  ;;  %v5723_v32 = vld [vmem:[#allocation18 + $0x40] ss:$16 sps:$4 sm:$0xff]  }
 0xdcb   : > { %4092 = vmatpush1.bf16.msra.mxu0 %v5705_v22  ;;  %4169 = vmatpush1.bf16.msra.mxu1 %v5718_v27  ;;  %v5729_v13 = vld [vmem:[#allocation18 + $0x20] ss:$16 sps:$4 sm:$0xff]  }
 0xdcc   : > { %v3791_v28 = vmul.f32 %v7749_v6, %v7749_v6  ;;  %v3792_v59 = vmul.f32 %v7751_v23, %v7751_v23  ;;  %4093 = vmatprep.subr.bf16.mxu0 %v5707_v10  ;;  %4170 = vmatprep.subr.bf16.mxu1 %v5721_v46 }
 0xdce   : > { %3803 = vadd.xlane.f32.xlu1 %v3790_v36  ;;  %3805 = vadd.xlane.f32.xlu0 %v3791_v28 }
 0xdcf   : > { %4094 = vmatpush1.bf16.msra.mxu0 %v5711_v39  ;;  %4171 = vmatpush1.bf16.msra.mxu1 %v5724_v12 }
 0xdd0   : > { %4095 = vmatprep.subr.bf16.mxu0 %v5713_v18  ;;  %4172 = vmatprep.subr.bf16.mxu1 %v5727_v33 }
 0xdd2   : > { %3807 = vadd.xlane.f32.xlu1 %v3792_v59 }
 0xdd3   : > { %4096 = vmatpush1.bf16.msra.mxu0 %v5717_v31  ;;  %4173 = vmatpush1.bf16.msra.mxu1 %v5730_v15 }
 0xdd4   : > { %4097 = vmatprep.subr.bf16.mxu0 %v5719_v45  ;;  %4174 = vmatprep.subr.bf16.mxu1 %v5733_v26 }
 0xdd7   : > { %4098 = vmatpush1.bf16.msra.mxu0 %v5723_v32  ;;  %4175 = vmatpush1.bf16.msra.mxu1 %v5736_v11 }
 0xdd8   : > { %4099 = vmatprep.subr.bf16.mxu0 %v5725_v7 }
 0xddb   : > { %4100 = vmatpush1.bf16.msra.mxu0 %v5729_v13 }
 0xddc   : > { %4101 = vmatprep.subr.bf16.mxu0 %v5731_v9 }
 0xddf   : > { %4102 = vmatpush1.bf16.msra.mxu0 %v5735_v57 }
 0xe4b   : > { %v3794_v14 = vpop.xlane.xlu0 %3793 }
 0xe4c   : > { %v3809_v17 = vmul.f32 0.0078125, %v3794_v14 }
 0xe4e   : > { %v3817_v20 = vadd.f32 1e-05, %v3809_v17 }
 0xe4f   : > { %v3796_v62 = vpop.xlane.xlu1 %3795  ;;  %v3798_v47 = vpop.xlane.xlu0 %3797 }
 0xe50   : > { %5737 = vrsqrt.f32 %v3817_v20  ;;  %v3810_v55 = vmul.f32 0.0078125, %v3796_v62  ;;  %v3811_v4 = vmul.f32 0.0078125, %v3798_v47 }
 0xe52   : > { %v3818_v58 = vadd.f32 1e-05, %v3810_v55  ;;  %v3819_v61 = vadd.f32 1e-05, %v3811_v4 }
 0xe53   : > { %v3800_v41 = vpop.xlane.xlu1 %3799  ;;  %v3802_v48 = vpop.xlane.xlu0 %3801 }
 0xe54   : > { %5739 = vrsqrt.f32 %v3818_v58  ;;  %v3812_v50 = vmul.f32 0.0078125, %v3800_v41  ;;  %v3813_v34 = vmul.f32 0.0078125, %v3802_v48 }
 0xe55   : > { %5741 = vrsqrt.f32 %v3819_v61 }
 0xe56   : > { %v3820_v19 = vadd.f32 1e-05, %v3812_v50  ;;  %v3821_v53 = vadd.f32 1e-05, %v3813_v34 }
 0xe57   : > { %v3804_v5 = vpop.xlane.xlu1 %3803  ;;  %v3806_v35 = vpop.xlane.xlu0 %3805 }
 0xe58   : > { %5743 = vrsqrt.f32 %v3820_v19  ;;  %v3814_v60 = vmul.f32 0.0078125, %v3804_v5  ;;  %v3815_v43 = vmul.f32 0.0078125, %v3806_v35 }
 0xe5a   : > { %v3822_v8 = vadd.f32 1e-05, %v3814_v60  ;;  %v3823_v40 = vadd.f32 1e-05, %v3815_v43 }
 0xe5b   : > { %v3808_v36 = vpop.xlane.xlu1 %3807 }
 0xe5c   : > { %5745 = vrsqrt.f32 %v3822_v8  ;;  %v3816_v28 = vmul.f32 0.0078125, %v3808_v36 }
 0xe5d   : > { %v5738_v1 = vpop.eup %5737  ;;  %5747 = vrsqrt.f32 %v3821_v53 }
 0xe5e   : > { %v3833_v59 = vmul.f32 %v5738_v1, %v7724_v30  ;;  %v3824_v2 = vadd.f32 1e-05, %v3816_v28 }
 0xe60   : > { %v3847_v63 = vmul.f32 %v4799_v25, %v3833_v59  ;;  %5749 = vrsqrt.f32 %v3824_v2 }
 0xe61   : > { %v5740_v16 = vpop.eup %5739  ;;  %5751 = vrsqrt.f32 %v3823_v40 }
 0xe62   : > { %v3834_v22 = vmul.f32 %v5740_v16, %v7732_v44  ;;  %v5742_v10 = vpop.eup %5741  ;;  %v3861_v30 = vadd.f32 %v4800_v42, %v3847_v63 }
 0xe63   : > { %v3835_v0 = vmul.f32 %v5742_v10, %v7727_v21 }
 0xe64   : > { %v3848_v39 = vmul.f32 %v4799_v25, %v3834_v22 }
 0xe65   : > { %v5744_v38 = vpop.eup %5743  ;;  %v3849_v44 = vmul.f32 %v4799_v25, %v3835_v0 }
 0xe66   : > { %v3862_v18 = vadd.f32 %v4800_v42, %v3848_v39  ;;  %v3836_v31 = vmul.f32 %v5744_v38, %v7735_v52 }
 0xe67   : > { %v3863_v33 = vadd.f32 %v4800_v42, %v3849_v44 }
 0xe68   : > { %v3869_v27 = vpack.c.bf16 %v3862_v18, %v3861_v30  ;;  %v3850_v45 = vmul.f32 %v4799_v25, %v3836_v31 }
 0xe69   : > { %v5746_v46 = vpop.eup %5745 }
 0xe6a   : > { %4120 = vmatmul.mubr.bf16.vlgmr.msra.gmra.mxu0 %v3869_v27  ;;  %4193 = vmatmul.mubr.bf16.vlgmr.msra.gmra.mxu1 %v3869_v27  ;;  %v5748_v32 = vpop.eup %5747  ;;  %v3864_v12 = vadd.f32 %v4800_v42, %v3850_v45  ;;  %v3838_v7 = vmul.f32 %v5746_v46, %v7743_v54 }
 0xe6b   : > { %4129 = vmatprep.mubr.bf16.mxu0 %v6166_v37  ;;  %4202 = vmatprep.mubr.bf16.mxu1 %v6166_v37  ;;  %v3837_v13 = vmul.f32 %v5748_v32, %v7741_v24 }
 0xe6c   : > { %v3870_v21 = vpack.c.bf16 %v3864_v12, %v3863_v33  ;;  %v3852_v15 = vmul.f32 %v4799_v25, %v3838_v7 }
 0xe6d   : > { %v5750_v52 = vpop.eup %5749  ;;  %v3851_v26 = vmul.f32 %v4799_v25, %v3837_v13 }
 0xe6e   : > { %v5752_v9 = vpop.eup %5751  ;;  %v3866_v57 = vadd.f32 %v4800_v42, %v3852_v15  ;;  %v3840_v11 = vmul.f32 %v5750_v52, %v7751_v23  ;;  %v3905_v23 = vld [vmem:[%s8061_s12] sm:$0xf] }
 0xe6f   : > { %v3865_v14 = vadd.f32 %v4800_v42, %v3851_v26  ;;  %v3839_v54 = vmul.f32 %v5752_v9, %v7749_v6  ;;  %v7786_v6 = vrot.slane %v3905_v23, %v2966_v3  ;;  %v7790_v4 = vrot.slane %v3905_v23, %v2974_v29 }
 0xe70   : > { %v3854_v20 = vmul.f32 %v4799_v25, %v3840_v11  ;;  %v7798_v58 = vrot.slane %v3905_v23, %v2978_v51 }
 0xe71   : > { %v3871_v17 = vpack.c.bf16 %v3866_v57, %v3865_v14  ;;  %v3853_v24 = vmul.f32 %v4799_v25, %v3839_v54 }
 0xe72   : > { %4130 = vmatmul.mubr.bf16.gmra.mxu0 %v3870_v21  ;;  %4203 = vmatmul.mubr.bf16.gmra.mxu1 %v3870_v21  ;;  %v3868_v62 = vadd.f32 %v4800_v42, %v3854_v20 }
 0xe73   : > { %4139 = vmatprep.mubr.bf16.mxu0 %v6166_v37  ;;  %4212 = vmatprep.mubr.bf16.mxu1 %v6166_v37  ;;  %v3867_v47 = vadd.f32 %v4800_v42, %v3853_v24 }
 0xe75   : > { %v3872_v55 = vpack.c.bf16 %v3868_v62, %v3867_v47 }
 0xe7a   : > { %4140 = vmatmul.mubr.bf16.gmra.mxu0 %v3871_v17  ;;  %4213 = vmatmul.mubr.bf16.gmra.mxu1 %v3871_v17 }
 0xe7b   : > { %4149 = vmatprep.mubr.bf16.mxu0 %v6166_v37  ;;  %4222 = vmatprep.mubr.bf16.mxu1 %v6166_v37  ;;  %v7794_v37 = vrot.slane %v3905_v23, %v2970_v49 }
 0xe82   : > { %4150 = vmatmul.mubr.bf16.gmra.mxu0 %v3872_v55  ;;  %4223 = vmatmul.mubr.bf16.gmra.mxu1 %v3872_v55 }
 0xf2a   : > { %v4121_v61 = vpop.f32.mrf.mxu0  ;;  %v4194_v41 = vpop.f32.mrf.mxu1 }
 0xf2b   : > { %v4122_v3 = vadd.f32 %v4121_v61, %v7786_v6  ;;  %v4195_v19 = vadd.f32 %v4194_v41, %v7790_v4 }
 0xf2c   : > { %v4123_v48 = vpop.f32.mrf.mxu0  ;;  %v4196_v50 = vpop.f32.mrf.mxu1 }
 0xf2d   : > { %v4124_v29 = vadd.f32 %v4123_v48, %v7794_v37  ;;  %v4197_v34 = vadd.f32 %v4196_v50, %v7798_v58 }
 0xf2e   : > { %v4125_v49 = vpop.f32.mrf.mxu0  ;;  %v4198_v5 = vpop.f32.mrf.mxu1 }
 0xf2f   : > { %v4858_v60 = vpack.c.bf16 %v4124_v29, %v4122_v3  ;;  %v4859_v56 = vpack.c.bf16 %v4197_v34, %v4195_v19  ;;  %v4126_v8 = vadd.f32 %v4125_v49, %v7786_v6  ;;  %v4199_v35 = vadd.f32 %v4198_v5, %v7790_v4 }
 0xf30   : > { %v4127_v51 = vpop.f32.mrf.mxu0  ;;  %v4200_v53 = vpop.f32.mrf.mxu1 }
 0xf31   : > { %4329 = vst [vmem:[%s6609_s26] sm:$0xff] %v4858_v60  ;;  %4330 = vst [vmem:[%s6609_s26 + $0x8] sm:$0xff] %v4859_v56  ;;  %v4128_v36 = vadd.f32 %v4127_v51, %v7794_v37  ;;  %v4201_v28 = vadd.f32 %v4200_v53, %v7798_v58 }
 0xf32   : > { %v4131_v1 = vpop.f32.mrf.mxu0  ;;  %v4204_v43 = vpop.f32.mrf.mxu1 }
 0xf33   : > { %v4860_v59 = vpack.c.bf16 %v4128_v36, %v4126_v8  ;;  %v4861_v25 = vpack.c.bf16 %v4201_v28, %v4199_v35  ;;  %v4132_v40 = vadd.f32 %v4131_v1, %v7786_v6  ;;  %v4205_v22 = vadd.f32 %v4204_v43, %v7790_v4 }
 0xf34   : > { %v4133_v2 = vpop.f32.mrf.mxu0  ;;  %v4206_v16 = vpop.f32.mrf.mxu1 }
 0xf35   : > { %4331 = vst [vmem:[%s6609_s26 + $0x10] sm:$0xff] %v4860_v59  ;;  %4332 = vst [vmem:[%s6609_s26 + $0x18] sm:$0xff] %v4861_v25  ;;  %v4134_v63 = vadd.f32 %v4133_v2, %v7794_v37  ;;  %v4207_v10 = vadd.f32 %v4206_v16, %v7798_v58 }
 0xf36   : > { %v4135_v42 = vpop.f32.mrf.mxu0  ;;  %v4208_v39 = vpop.f32.mrf.mxu1 }
 0xf37   : > { %v4862_v38 = vpack.c.bf16 %v4134_v63, %v4132_v40  ;;  %v4863_v30 = vpack.c.bf16 %v4207_v10, %v4205_v22  ;;  %v4136_v31 = vadd.f32 %v4135_v42, %v7786_v6  ;;  %v4209_v27 = vadd.f32 %v4208_v39, %v7790_v4 }
 0xf38   : > { %v4137_v18 = vpop.f32.mrf.mxu0  ;;  %v4210_v0 = vpop.f32.mrf.mxu1 }
 0xf39   : > { %4333 = vst [vmem:[%s6609_s26 + $0x20] sm:$0xff] %v4862_v38  ;;  %4334 = vst [vmem:[%s6609_s26 + $0x28] sm:$0xff] %v4863_v30  ;;  %v4138_v45 = vadd.f32 %v4137_v18, %v7794_v37  ;;  %v4211_v46 = vadd.f32 %v4210_v0, %v7798_v58 }
 0xf3a   : > { %v4141_v44 = vpop.f32.mrf.mxu0  ;;  %v4214_v32 = vpop.f32.mrf.mxu1 }
 0xf3b   : > { %v4864_v12 = vpack.c.bf16 %v4138_v45, %v4136_v31  ;;  %v4865_v7 = vpack.c.bf16 %v4211_v46, %v4209_v27  ;;  %v4142_v21 = vadd.f32 %v4141_v44, %v7786_v6  ;;  %v4215_v15 = vadd.f32 %v4214_v32, %v7790_v4 }
 0xf3c   : > { %v4143_v33 = vpop.f32.mrf.mxu0  ;;  %v4216_v13 = vpop.f32.mrf.mxu1 }
 0xf3d   : > { %4335 = vst [vmem:[%s6609_s26 + $0x30] sm:$0xff] %v4864_v12  ;;  %4336 = vst [vmem:[%s6609_s26 + $0x38] sm:$0xff] %v4865_v7  ;;  %v4144_v52 = vadd.f32 %v4143_v33, %v7794_v37  ;;  %v4217_v9 = vadd.f32 %v4216_v13, %v7798_v58 }
 0xf3e   : > { %v4145_v26 = vpop.f32.mrf.mxu0  ;;  %v4218_v57 = vpop.f32.mrf.mxu1 }
 0xf3f   : > { %v4866_v11 = vpack.c.bf16 %v4144_v52, %v4142_v21  ;;  %v4867_v14 = vpack.c.bf16 %v4217_v9, %v4215_v15  ;;  %v4146_v20 = vadd.f32 %v4145_v26, %v7786_v6  ;;  %v4219_v24 = vadd.f32 %v4218_v57, %v7790_v4 }
 0xf40   : > { %v4147_v54 = vpop.f32.mrf.mxu0  ;;  %v4220_v17 = vpop.f32.mrf.mxu1 }
 0xf41   : > { %4337 = vst [vmem:[%s6609_s26 + $0x40] sm:$0xff] %v4866_v11  ;;  %4338 = vst [vmem:[%s6609_s26 + $0x48] sm:$0xff] %v4867_v14  ;;  %v4148_v62 = vadd.f32 %v4147_v54, %v7794_v37  ;;  %v4221_v47 = vadd.f32 %v4220_v17, %v7798_v58 }
 0xf42   : > { %v4151_v55 = vpop.f32.mrf.mxu0  ;;  %v4224_v23 = vpop.f32.mrf.mxu1 }
 0xf43   : > { %v4868_v61 = vpack.c.bf16 %v4148_v62, %v4146_v20  ;;  %v4869_v41 = vpack.c.bf16 %v4221_v47, %v4219_v24  ;;  %v4152_v3 = vadd.f32 %v4151_v55, %v7786_v6  ;;  %v4225_v19 = vadd.f32 %v4224_v23, %v7790_v4 }
 0xf44   : > { %v4153_v48 = vpop.f32.mrf.mxu0  ;;  %v4226_v50 = vpop.f32.mrf.mxu1 }
 0xf45   : > { %4339 = vst [vmem:[%s6609_s26 + $0x50] sm:$0xff] %v4868_v61  ;;  %4340 = vst [vmem:[%s6609_s26 + $0x58] sm:$0xff] %v4869_v41  ;;  %v4154_v29 = vadd.f32 %v4153_v48, %v7794_v37  ;;  %v4227_v34 = vadd.f32 %v4226_v50, %v7798_v58 }
 0xf46   : > { %v4155_v49 = vpop.f32.mrf.mxu0  ;;  %v4228_v5 = vpop.f32.mrf.mxu1 }
 0xf47   : > { %v4870_v60 = vpack.c.bf16 %v4154_v29, %v4152_v3  ;;  %v4871_v56 = vpack.c.bf16 %v4227_v34, %v4225_v19  ;;  %v4156_v8 = vadd.f32 %v4155_v49, %v7786_v6  ;;  %v4229_v35 = vadd.f32 %v4228_v5, %v7790_v4 }
 0xf48   : > { %v4157_v51 = vpop.f32.mrf.mxu0  ;;  %v4230_v53 = vpop.f32.mrf.mxu1 }
 0xf49   : > { %4341 = vst [vmem:[%s6609_s26 + $0x60] sm:$0xff] %v4870_v60  ;;  %4342 = vst [vmem:[%s6609_s26 + $0x68] sm:$0xff] %v4871_v56  ;;  %v4158_v36 = vadd.f32 %v4157_v51, %v7794_v37  ;;  %v4231_v28 = vadd.f32 %v4230_v53, %v7798_v58 }
 0xf4b   : > { %v4872_v1 = vpack.c.bf16 %v4158_v36, %v4156_v8  ;;  %v4873_v43 = vpack.c.bf16 %v4231_v28, %v4229_v35 }
 0xf4d   : > { %4343 = vst [vmem:[%s6609_s26 + $0x70] sm:$0xff] %v4872_v1  ;;  %4344 = vst [vmem:[%s6609_s26 + $0x78] sm:$0xff] %v4873_v43 }
 0xf4e PF: > { %s8062_s5 = sld [smem:[#allocation32_spill]]  ;;  %s4359_s13 = sshll.u32 %s6609_s26, 4  ;;  %s7855_s13 = int_to_ptr.vmem [resolvable:$true] %s4359_s13 }
 0xf4f   : > { %s8063_s9 = sld [smem:[#allocation66_spill]]  ;;  %s4346_s27 = scalar_lea.sflag [#allocation6], %s6538_s18 }
 0xf50   : > { %s6003_s21 = scalar_lea.vmem %s7855_s13, 2048  ;;  %p8064_p6 = scmp.ne.s32.totalorder %s8008_s23, 0 }
 0xf51   : > { %p6004_p9 = scmp.ne.s32.totalorder %s7855_s13, %s6003_s21  ;;  %s6167_s4 = smov [#allocation19]  }
 0xf52   : > { %s6007_s1 = sshll.u32 %s6167_s4, 4  ;;  %s6008_s1 = int_to_ptr.vmem [resolvable:$false] %s6007_s1 }
 0xf53   : > { %p6005_p3 = pnand %p6004_p9, %p8064_p6  ;;  %s6009_s10 = scalar_lea.vmem %s6008_s1, 4096 }
 0xf54   : > { %s4874_s3 = sshll.u32 %s8062_s5, 11  ;;  %p6010_p1 = scmp.lt.s32.totalorder %s7855_s13, %s6008_s1 }
 0xf55   : > { %s7852_s11 = scalar_lea.hbm %s8063_s9, %s4874_s3  ;;  %p6006_p12 = pneg %p6005_p3 }
 0xf56   : > { %p6011_p13 = scmp.lt.s32.totalorder %s6009_s10, %s6003_s21 }
 0xf58   : > { %p6012_p7 = por %p6011_p13, %p6010_p1 }
 0xf5a   : > { %p6013_p11 = pnand %p6012_p7, %p6006_p12 }
 0xf5c   : > { %6016 = shalt.err (!%p6013_p11)
}
 0xf5d   : > { %s6017_s26 = scalar_lea.hbm %s7852_s11, 2048  ;;  %s6021_s8 = scalar_lea.hbm %s8063_s9, 4096 }
 0xf5e   : > { %p6018_p10 = scmp.ne.s32.totalorder %s7852_s11, %s6017_s26  ;;  %p6022_p5 = scmp.lt.s32.totalorder %s7852_s11, %s8063_s9 }
 0xf5f   : > { %p6023_p0 = scmp.lt.s32.totalorder %s6021_s8, %s6017_s26 }
 0xf60   : > { %p6019_p4 = pnand %p6018_p10, %p8064_p6 }
 0xf61   : > { %p6024_p8 = por %p6023_p0, %p6022_p5 }
 0xf62   : > { %p6020_p2 = pneg %p6019_p4 }
 0xf64   : > { %p6025_p9 = pnand %p6024_p8, %p6020_p2 }
 0xf66   : > { %6028 = shalt.err (!%p6025_p9)
}
 0xf67   : > { %s6168_s15 = smov 256   ;;  %s6169_s19 = smov 16  }
 0xf68   : > { %5258 = dma.vmem_to_hbm [thread:$0]  (%p8064_p6), %s7855_s13, 2048, %s7852_s11, %s4346_s27, %s6168_s15, %s6168_s15, %s6169_s19  }
 0xf69 PF: > { %s8065_s16 = sld [smem:[#allocation29_spill]]  ;;  %p5296_p3 = scmp.ge.s32.totalorder %s6143_s0, 2 }
 0xf6a   : > { %s8066_s30 = sld [smem:[#allocation37_spill]] }
 0xf6f   : > { %s4374_s14 = sand.u32 1, %s8065_s16  }
 0xf70   : > { %p8067_p12 = scmp.ne.s32.totalorder %s8066_s30, 0  ;;  %s4375_s7 = scalar_lea.sflag [#allocation6], %s4374_s14 }
 0xf72   : > { %p5290_p1 = pnand %p5296_p3, %p8067_p12 }
 0xf74   : > { %p5291_p13 = pneg %p5290_p1 }
 0xf76   : > { %6098 = dma.done.wait (%p5291_p13), %s4375_s7, 2048  }
 0xf77   : > { %6100 = vsyncadd (%p5291_p13), %s4375_s7, 4294965248  ;;  %s44_s0 = sadd.s32 1, %s6143_s0   ;;  %s8068_s21 = sld [smem:[#allocation27_spill]] }
 0xf78   : > { %p41_p7 = scmp.ge.s32.totalorder %s44_s0, 6   ;;  %s8069_s22 = sld [smem:[#allocation28_spill]] }
 0xf79   : > { %s8070_s23 = sld [smem:[#allocation40_spill]]  ;;  %s8077_s24 = smov %s6119_s25 }
 0xf7a   : > { %s8071_s18 = sld [smem:[#allocation30_spill]] }
 0xf7b   : > { %s8072_s26 = sld [smem:[#allocation42_spill]] }
 0xf7c   : > { %s8073_s27 = sld [smem:[#allocation33_spill]]  ;;  %43 = sbr.rel (!%p41_p7) target bundleno = 35 (0x23), region = 238 }
 0xf7d   : > { %s8074_s28 = sld [smem:[#allocation34_spill]] }
 0xf7e   : > { %s8075_s29 = sld [smem:[#allocation39_spill]] }
 0xf7f   : > { %s8076_s30 = sld [smem:[#allocation41_spill]] }
 0xf80   : > { %s8078_s25 = smov %s8071_s18 }
 0xf81   :  { %4380 = vsyncpa [#allocation5], 1 }
 0xf82   :  { %4382 = vsyncpa [#allocation5 + $0x1], 1 }
 0xf83   :  { %4383 = vsyncpa [#allocation8], 1 }
 0xf84   :  { %4385 = vsyncpa [#allocation8 + $0x1], 1 }
 0xf85   :  { %4386 = vsyncpa [#allocation11], 1 }
 0xf86   :  { %4388 = vsyncpa [#allocation11 + $0x1], 1 }
 0xf87   :  { %4389 = vsyncpa [#allocation14], 1 }
 0xf88   :  { %4391 = vsyncpa [#allocation14 + $0x1], 1 }
 0xf89   :  { %4392 = vsyncpa [#allocation17], 1 }
 0xf8a   :  { %4394 = vsyncpa [#allocation17 + $0x1], 1 }
 0xf8b   :  { %4395 = vsyncpa [#allocation6], 1 }
 0xf8c   :  { %4397 = vsyncpa [#allocation6 + $0x1], 1 }

</bundles_post_ra>
